<compile_context>
chip_gen: v6e
topology: v6e:2x2x1
jax: 0.10.0
libtpu: 0.0.40
codegen_flags: <defaults>
</compile_context>

<pallas_src>
import functools

import jax
import jax.numpy as jnp
from jax.experimental import pallas as pl
from jax.experimental.pallas import tpu as pltpu


def _round_up(x, m):
    return (x + m - 1) // m * m


def _pad_to(a, shape):
    """Zero-pad trailing edges of `a` up to `shape` (no-op if already there)."""
    if tuple(a.shape) == tuple(shape):
        return a
    widths = [(0, t - s) for s, t in zip(a.shape, shape)]
    return jnp.pad(a, widths)


# ---------------------------------------------------------------------------
# Generation-aware defaults.
# ---------------------------------------------------------------------------

# Arithmetic intensity of this layout is ~TM flops per byte of weight traffic,
# so TM must clear ~240 (v5e), ~320 (v7x), ~700 (v6e) flops/B to be
# compute-bound on weight streaming.
_TILE_M_DEFAULT = {"v5e": 256, "v6e": 1024, "v7x": 512, "unknown": 256}
_TILE_F_DEFAULT = {"v5e": 1024, "v6e": 1024, "v7x": 512, "unknown": 512}
# VMEM request cap (MiB): physical is 128 MiB on v5e/v6e, 64 MiB per TC on
# v7x; leave headroom for compiler scratch / spills.
_VMEM_CAP_MIB = {"v5e": 100, "v6e": 110, "v7x": 52, "unknown": 48}


def _tpu_generation():
    try:
        kind = jax.devices()[0].device_kind.lower()
    except Exception:
        return "unknown"
    if "v7" in kind:
        return "v7x"
    if "v6" in kind:
        return "v6e"
    if "v5 lite" in kind or "v5e" in kind or "v5lite" in kind:
        return "v5e"
    return "unknown"


def _vmem_cap_bytes(gen):
    """VMEM budget: actual chip capacity minus headroom, else per-gen table."""
    try:
        phys = int(pltpu.get_tpu_info().vmem_capacity_bytes)
        return max(32 << 20, min(int(phys * 0.82), phys - (12 << 20)))
    except Exception:
        return _VMEM_CAP_MIB.get(gen, 48) << 20


@functools.lru_cache(maxsize=1)
def _single_buffering_supported():
    """Probe once whether pipeline_mode=pl.Buffered(1) works on this JAX/libtpu.

    The probe mirrors the FFN structure: input block constant along the inner
    (reduction) axis, output block revisited (accumulated) along it.  Falls
    back to default double buffering if the feature is missing or misbehaves.
    """
    def _probe_kernel(x_ref, o_ref):
        @pl.when(pl.program_id(1) == 0)
        def _():
            o_ref[...] = jnp.zeros_like(o_ref)
        o_ref[...] += x_ref[...]

    try:
        out = pl.pallas_call(
            _probe_kernel,
            out_shape=jax.ShapeDtypeStruct((16, 128), jnp.float32),
            grid=(2, 2),
            in_specs=[pl.BlockSpec((8, 128), lambda i, k: (i, 0),
                                   pipeline_mode=pl.Buffered(1))],
            out_specs=pl.BlockSpec((8, 128), lambda i, k: (i, 0),
                                   pipeline_mode=pl.Buffered(1)),
        )(jnp.ones((16, 128), jnp.float32))
        out = jax.block_until_ready(out)
        return bool(jnp.allclose(out, 2.0))
    except Exception:
        return False


# ---------------------------------------------------------------------------
# Kernels.
# ---------------------------------------------------------------------------

def _ffn_kernel_acc_in_out(x_ref, w1_ref, b1_ref, w2_ref, b2_ref, o_ref):
    """f32-output variant: the (revisited) output block is the accumulator.

    x_ref  : (TM, H)  input rows, resident across the F axis
    w1_ref : (H, TF)  slice of linear1 weight (already (in, out))
    b1_ref : (1, TF)  slice of linear1 bias (f32)
    w2_ref : (TF, H)  slice of linear2 weight (already (in, out))
    b2_ref : (1, H)   linear2 bias (f32)
    o_ref  : (TM, H)  f32 output block, accumulated across the F axis
    """
    k = pl.program_id(1)

    @pl.when(k == 0)
    def _():
        o_ref[...] = jnp.zeros_like(o_ref)

    x = x_ref[...]
    if x.dtype != w1_ref.dtype:          # in-kernel cast; no wrapper copy
        x = x.astype(w1_ref.dtype)
    # linear1 slice + bias + ReLU in f32 on the (TM, TF) tile.
    h = jnp.dot(x, w1_ref[...], preferred_element_type=jnp.float32)
    h = jnp.maximum(h + b1_ref[...], 0.0)
    # dropout1 == identity (eval mode).
    o_ref[...] += jnp.dot(h.astype(w2_ref.dtype), w2_ref[...],
                          preferred_element_type=jnp.float32)

    @pl.when(k == pl.num_programs(1) - 1)
    def _():
        # dropout2 == identity (eval mode).
        o_ref[...] += b2_ref[...]


def _ffn_kernel_scratch_acc(x_ref, w1_ref, b1_ref, w2_ref, b2_ref, o_ref,
                            acc_ref):
    """Narrow-output variant: accumulate in a f32 scratch, cast at the end."""
    k = pl.program_id(1)

    @pl.when(k == 0)
    def _():
        acc_ref[...] = jnp.zeros_like(acc_ref)

    x = x_ref[...]
    if x.dtype != w1_ref.dtype:
        x = x.astype(w1_ref.dtype)
    h = jnp.dot(x, w1_ref[...], preferred_element_type=jnp.float32)
    h = jnp.maximum(h + b1_ref[...], 0.0)
    acc_ref[...] += jnp.dot(h.astype(w2_ref.dtype), w2_ref[...],
                            preferred_element_type=jnp.float32)

    @pl.when(k == pl.num_programs(1) - 1)
    def _():
        o_ref[...] = (acc_ref[...] + b2_ref[...]).astype(o_ref.dtype)


# ---------------------------------------------------------------------------
# Wrappers.
# ---------------------------------------------------------------------------

def prepare_ffn_params(w1, b1, w2, b2, compute_dtype=jnp.bfloat16):
    """One-time parameter prep, hoisted out of the per-call path.

    w1: (F, H), b1: (F,), w2: (H, F), b2: (H,)  (nn.Linear layout)
    Returns weights transposed to (in, out) in `compute_dtype`, biases as
    (1, out) f32 rows.
    """
    w1_t = jnp.asarray(w1, dtype=compute_dtype).T                # (H, F)
    w2_t = jnp.asarray(w2, dtype=compute_dtype).T                # (F, H)
    b1_2d = jnp.asarray(b1, dtype=jnp.float32).reshape(1, -1)    # (1, F)
    b2_2d = jnp.asarray(b2, dtype=jnp.float32).reshape(1, -1)    # (1, H)
    return w1_t, b1_2d, w2_t, b2_2d


@functools.partial(jax.jit,
                   static_argnames=("tm", "tf", "single_buf", "vmem_limit"))
def _ffn_forward(x, w1_t, b1, w2_t, b2, *, tm, tf, single_buf, vmem_limit):
    seq, batch, hidden = x.shape
    _, ffn = w1_t.shape
    in_dtype = x.dtype
    w_dtype = w1_t.dtype
    out_dtype = in_dtype

    m = seq * batch
    hidden_p = _round_up(hidden, 128)
    m_p = _round_up(m, tm)
    ffn_p = _round_up(ffn, tf)

    # Zero padding is exact (padded rows/cols contribute nothing and are
    # stripped below); all pads are no-ops when shapes are already aligned,
    # and x keeps its original dtype (cast happens inside the kernel).
    x2d = _pad_to(x.reshape(m, hidden), (m_p, hidden_p))
    w1_p = _pad_to(w1_t, (hidden_p, ffn_p))
    b1_p = _pad_to(b1, (1, ffn_p))
    w2_p = _pad_to(w2_t, (ffn_p, hidden_p))
    b2_p = _pad_to(b2, (1, hidden_p))

    grid_m = m_p // tm
    grid_f = ffn_p // tf
    grid = (grid_m, grid_f)

    # x / out block indices only depend on the outer (row) axis -> single
    # buffering reclaims VMEM for larger tiles (when supported).
    if single_buf:
        x_spec = pl.BlockSpec((tm, hidden_p), lambda i, k: (i, 0),
                              pipeline_mode=pl.Buffered(1))
        out_spec = pl.BlockSpec((tm, hidden_p), lambda i, k: (i, 0),
                                pipeline_mode=pl.Buffered(1))
    else:
        x_spec = pl.BlockSpec((tm, hidden_p), lambda i, k: (i, 0))
        out_spec = pl.BlockSpec((tm, hidden_p), lambda i, k: (i, 0))

    # Streamed weights keep default double buffering.  (On v5e, if profiling
    # shows exposed weight DMA at TM=256, bump these to pl.Buffered(3).)
    in_specs = [
        x_spec,
        pl.BlockSpec((hidden_p, tf), lambda i, k: (0, k)),   # w1 slice
        pl.BlockSpec((1, tf), lambda i, k: (0, k)),          # b1 slice
        pl.BlockSpec((tf, hidden_p), lambda i, k: (k, 0)),   # w2 slice
        pl.BlockSpec((1, hidden_p), lambda i, k: (0, 0)),    # b2
    ]

    use_scratch = out_dtype != jnp.float32
    if use_scratch:
        kernel = _ffn_kernel_scratch_acc
        scratch_shapes = [pltpu.VMEM((tm, hidden_p), jnp.float32)]
    else:
        kernel = _ffn_kernel_acc_in_out
        scratch_shapes = []

    x_bytes = jnp.dtype(in_dtype).itemsize
    o_bytes = jnp.dtype(out_dtype).itemsize
    w_bytes = jnp.dtype(w_dtype).itemsize
    flops = 4 * m_p * hidden_p * ffn_p                        # two matmuls
    bytes_accessed = int(m_p * hidden_p * (x_bytes + o_bytes)
                         + grid_m * 2 * hidden_p * ffn_p * w_bytes
                         + (ffn_p + hidden_p) * 4)

    out = pl.pallas_call(
        kernel,
        out_shape=jax.ShapeDtypeStruct((m_p, hidden_p), out_dtype),
        grid_spec=pltpu.PrefetchScalarGridSpec(
            num_scalar_prefetch=0,
            grid=grid,
            in_specs=in_specs,
            out_specs=out_spec,
            scratch_shapes=scratch_shapes,
        ),
        compiler_params=pltpu.CompilerParams(
            dimension_semantics=("parallel", "arbitrary"),
            vmem_limit_bytes=int(vmem_limit),
        ),
        cost_estimate=pl.CostEstimate(
            flops=flops, transcendentals=0, bytes_accessed=bytes_accessed),
    )(x2d, w1_p, b1_p, w2_p, b2_p)

    if m_p != m or hidden_p != hidden:
        out = out[:m, :hidden]
    return out.reshape(seq, batch, hidden)


def feed_forward_layer(x, w1_t, b1, w2_t, b2, *, tile_m=None, tile_f=None):
    """x: (seq, batch, hidden). Params from prepare_ffn_params.

    Plain-Python driver: picks generation-aware tiles / VMEM budget (static),
    then dispatches to the jitted Pallas implementation.
    """
    seq, batch, hidden = x.shape
    h_in, ffn = w1_t.shape
    assert h_in == hidden and w2_t.shape == (ffn, hidden)
    assert b1.shape == (1, ffn) and b2.shape == (1, hidden)

    gen = _tpu_generation()
    m = seq * batch
    m_r = _round_up(m, 16)                        # bf16 sublane pack
    hidden_p = _round_up(hidden, 128)

    tm = tile_m if tile_m is not None else _TILE_M_DEFAULT[gen]
    tf = tile_f if tile_f is not None else _TILE_F_DEFAULT[gen]
    tm = _round_up(min(int(tm), m_r), 16)
    tf = _round_up(min(int(tf), _round_up(ffn, 128)), 128)

    # v7x has two TensorCores per chip: keep at least two row tiles so the
    # "parallel" axis actually splits, instead of leaving one core idle.
    if gen == "v7x" and m_r >= 512 and _round_up(m_r, tm) // tm < 2:
        tm = _round_up(-(-m_r // 2), 16)

    single_buf = _single_buffering_supported()
    use_scratch = x.dtype != jnp.float32
    x_bytes = jnp.dtype(x.dtype).itemsize
    w_bytes = jnp.dtype(w1_t.dtype).itemsize

    def _vmem_need(tm_, tf_):
        nb = 1 if single_buf else 2               # x / out buffer count
        need = (nb * tm_ * hidden_p * x_bytes              # x tile
                + 2 * hidden_p * tf_ * w_bytes             # w1 tile (dbl buf)
                + 2 * tf_ * hidden_p * w_bytes             # w2 tile (dbl buf)
                + 2 * 8 * tf_ * 4 + 2 * 8 * hidden_p * 4   # biases
                + nb * tm_ * hidden_p * x_bytes)           # out tile
        if use_scratch:
            need += tm_ * hidden_p * 4                     # f32 accumulator
        return need

    cap = _vmem_cap_bytes(gen)
    # Down-tile gracefully (TF first, then TM) instead of failing to compile
    # when a configuration would exceed the per-generation VMEM budget.
    while _vmem_need(tm, tf) > cap and (tf > 256 or tm > 256):
        if tf > 256:
            tf = max(256, _round_up(tf // 2, 128))
        else:
            tm = max(256, _round_up(tm // 2, 16))

    vmem_limit = int(min(cap, max(int(_vmem_need(tm, tf) * 1.25) + (4 << 20),
                                  32 << 20)))

    return _ffn_forward(x, w1_t, b1, w2_t, b2, tm=int(tm), tf=int(tf),
                        single_buf=bool(single_buf), vmem_limit=vmem_limit)


# ---------------------------------------------------------------------------
# Reference + self-test.
# ---------------------------------------------------------------------------

def _reference(x, w1, b1, w2, b2, compute_dtype=jnp.bfloat16):
    """Pure-JAX reference with matching bf16-operand / f32-accumulate math."""
    cd = compute_dtype
    h = jnp.einsum("sbh,fh->sbf", x.astype(cd), jnp.asarray(w1, cd),
                   preferred_element_type=jnp.float32)
    h = jnp.maximum(h + jnp.asarray(b1, jnp.float32), 0.0)
    y = jnp.einsum("sbf,hf->sbh", h.astype(cd), jnp.asarray(w2, cd),
                   preferred_element_type=jnp.float32)
    return (y + jnp.asarray(b2, jnp.float32)).astype(x.dtype)


def _run_case(key, seq, batch, hidden, ffn, dtype=jnp.float32,
              tile_m=None, tile_f=None):
    kx, k1, k2, k3, k4 = jax.random.split(key, 5)
    x = jax.random.normal(kx, (seq, batch, hidden),
                          dtype=jnp.float32).astype(dtype)
    # nn.Linear layouts: weight (out, in), bias (out,)
    w1 = jax.random.normal(k1, (ffn, hidden), dtype=jnp.float32) * 0.05
    b1 = jax.random.normal(k2, (ffn,), dtype=jnp.float32) * 0.05
    w2 = jax.random.normal(k3, (hidden, ffn), dtype=jnp.float32) * 0.05
    b2 = jax.random.normal(k4, (hidden,), dtype=jnp.float32) * 0.05

    params = prepare_ffn_params(w1, b1, w2, b2)   # one-time transpose + cast
    out = feed_forward_layer(x, *params, tile_m=tile_m, tile_f=tile_f)
    out = jax.block_until_ready(out)

    ref = _reference(x, w1, b1, w2, b2)
    assert out.shape == (seq, batch, hidden)
    assert out.dtype == x.dtype
    tol = 2e-2 if jnp.dtype(dtype) == jnp.dtype(jnp.bfloat16) else 2e-3
    o32 = out.astype(jnp.float32)
    r32 = ref.astype(jnp.float32)
    assert jnp.allclose(o32, r32, atol=tol, rtol=tol), (
        float(jnp.max(jnp.abs(o32 - r32))))
    return out


if __name__ == "__main__":
    key = jax.random.PRNGKey(0)
    k_a, k_b, k_c = jax.random.split(key, 3)

    # Aligned f32 case: exercises M tiling, F-axis accumulation, and direct
    # accumulation into the (resident) f32 output block.
    _run_case(k_a, seq=32, batch=16, hidden=256, ffn=1024)

    # Unaligned small f32 case: exercises the zero-padding path for
    # hidden / ffn / M.
    _run_case(k_b, seq=8, batch=2, hidden=32, ffn=64)

    # bf16 activations: exercises the f32 scratch-accumulator + cast epilogue.
    _run_case(k_c, seq=4, batch=4, hidden=64, ffn=128, dtype=jnp.bfloat16)

    print("KERNEL_OK")
</pallas_src>

<mosaic_0001>
module attributes {stable_mosaic.version = 11 : i64} {
  func.func @_probe_kernel(%arg0: i32, %arg1: i32, %arg2: memref<8x128xf32, #tpu.memory_space<vmem>>, %arg3: memref<8x128xf32, #tpu.memory_space<vmem>>) attributes {dimension_semantics = [#tpu.dimension_semantics<arbitrary>, #tpu.dimension_semantics<arbitrary>], iteration_bounds = array<i64: 2, 2>, scalar_prefetch = 0 : i64, scratch_operands = 0 : i64, tpu.core_type = #tpu.core_type<tc>, window_params = [{pipeline_mode = #tpu.pipeline_mode<synchronous>, transform_indices = @transform_0, window_bounds = array<i64: 8, 128>}, {pipeline_mode = #tpu.pipeline_mode<synchronous>, transform_indices = @transform_1, window_bounds = array<i64: 8, 128>}]} {
    %c0_i32 = arith.constant 0 : i32
    %0 = arith.cmpi eq, %arg1, %c0_i32 : i32
    %1 = arith.extui %0 : i1 to i32
    %c0_i32_0 = arith.constant 0 : i32
    %2 = arith.cmpi ne, %1, %c0_i32_0 : i32
    scf.if %2 {
      %cst = arith.constant 0.000000e+00 : f32
      %7 = vector.broadcast %cst : f32 to vector<8x128xf32>
      %c0_6 = arith.constant 0 : index
      %c0_7 = arith.constant 0 : index
      %8 = vector.load %arg3[%c0_6, %c0_7] : memref<8x128xf32, #tpu.memory_space<vmem>>, vector<8x128xf32>
      tpu.vector_store %arg3[%c0_6, %c0_7], %7 {strides = array<i32>} : memref<8x128xf32, #tpu.memory_space<vmem>>, vector<8x128xf32>,
    } else {
    }
    %c0 = arith.constant 0 : index
    %c0_1 = arith.constant 0 : index
    %3 = vector.load %arg3[%c0, %c0_1] : memref<8x128xf32, #tpu.memory_space<vmem>>, vector<8x128xf32>
    %c0_2 = arith.constant 0 : index
    %c0_3 = arith.constant 0 : index
    %4 = vector.load %arg2[%c0_2, %c0_3] : memref<8x128xf32, #tpu.memory_space<vmem>>, vector<8x128xf32>
    %5 = arith.addf %3, %4 : vector<8x128xf32>
    %c0_4 = arith.constant 0 : index
    %c0_5 = arith.constant 0 : index
    %6 = vector.load %arg3[%c0_4, %c0_5] : memref<8x128xf32, #tpu.memory_space<vmem>>, vector<8x128xf32>
    tpu.vector_store %arg3[%c0_4, %c0_5], %5 {strides = array<i32>} : memref<8x128xf32, #tpu.memory_space<vmem>>, vector<8x128xf32>,
    return
  }
  func.func @transform_0(%arg0: i32, %arg1: i32) -> (i32, i32) {
    %c0_i32 = arith.constant 0 : i32
    %c0_i32_0 = arith.constant 0 : i32
    return %arg0, %c0_i32 : i32, i32
  }
  func.func @transform_1(%arg0: i32, %arg1: i32) -> (i32, i32) {
    %c0_i32 = arith.constant 0 : i32
    %c0_i32_0 = arith.constant 0 : i32
    return %arg0, %c0_i32 : i32, i32
  }
}

module attributes {stable_mosaic.version = 11 : i64} {
  func.func @_ffn_kernel_acc_in_out(%arg0: i32, %arg1: i32, %arg2: memref<256x256xf32, #tpu.memory_space<vmem>>, %arg3: memref<256x512xbf16, #tpu.memory_space<vmem>>, %arg4: memref<1x512xf32, #tpu.memory_space<vmem>>, %arg5: memref<512x256xbf16, #tpu.memory_space<vmem>>, %arg6: memref<1x256xf32, #tpu.memory_space<vmem>>, %arg7: memref<256x256xf32, #tpu.memory_space<vmem>>) attributes {dimension_semantics = [#tpu.dimension_semantics<parallel>, #tpu.dimension_semantics<arbitrary>], iteration_bounds = array<i64: 2, 2>, scalar_prefetch = 0 : i64, scratch_operands = 0 : i64, tpu.core_type = #tpu.core_type<tc>, window_params = [{transform_indices = @transform_0, window_bounds = array<i64: 256, 256>}, {transform_indices = @transform_1, window_bounds = array<i64: 256, 512>}, {transform_indices = @transform_2, window_bounds = array<i64: 1, 512>}, {transform_indices = @transform_3, window_bounds = array<i64: 512, 256>}, {pipeline_mode = #tpu.pipeline_mode<synchronous>, transform_indices = @transform_4, window_bounds = array<i64: 1, 256>}, {transform_indices = @transform_5, window_bounds = array<i64: 256, 256>}]} {
    %c0_i32 = arith.constant 0 : i32
    %0 = arith.cmpi eq, %arg1, %c0_i32 : i32
    %1 = arith.extui %0 : i1 to i32
    %c0_i32_0 = arith.constant 0 : i32
    %2 = arith.cmpi ne, %1, %c0_i32_0 : i32
    scf.if %2 {
      %cst_15 = arith.constant 0.000000e+00 : f32
      %21 = vector.broadcast %cst_15 : f32 to vector<256x256xf32>
      %c0_16 = arith.constant 0 : index
      %c0_17 = arith.constant 0 : index
      %22 = vector.load %arg7[%c0_16, %c0_17] : memref<256x256xf32, #tpu.memory_space<vmem>>, vector<256x256xf32>
      tpu.vector_store %arg7[%c0_16, %c0_17], %21 {strides = array<i32>} : memref<256x256xf32, #tpu.memory_space<vmem>>, vector<256x256xf32>,
    } else {
    }
    %c0 = arith.constant 0 : index
    %c0_1 = arith.constant 0 : index
    %3 = vector.load %arg2[%c0, %c0_1] : memref<256x256xf32, #tpu.memory_space<vmem>>, vector<256x256xf32>
    %4 = arith.truncf %3 : vector<256x256xf32> to vector<256x256xbf16>
    %c0_2 = arith.constant 0 : index
    %c0_3 = arith.constant 0 : index
    %5 = vector.load %arg3[%c0_2, %c0_3] : memref<256x512xbf16, #tpu.memory_space<vmem>>, vector<256x512xbf16>
    %cst = arith.constant dense<0.000000e+00> : vector<256x512xf32>
    %6 = tpu.matmul %4, %5, %cst {dimension_numbers = #tpu.dot_dimension_numbers<[1], [0], [0], [1], [0, 0, 1, 1], [], []>} : vector<256x256xbf16>, vector<256x512xbf16>, vector<256x512xf32> -> vector<256x512xf32>
    %c0_4 = arith.constant 0 : index
    %c0_5 = arith.constant 0 : index
    %7 = vector.load %arg4[%c0_4, %c0_5] : memref<1x512xf32, #tpu.memory_space<vmem>>, vector<1x512xf32>
    %8 = vector.broadcast %7 : vector<1x512xf32> to vector<256x512xf32>
    %9 = arith.addf %6, %8 : vector<256x512xf32>
    %cst_6 = arith.constant 0.000000e+00 : f32
    %10 = vector.broadcast %cst_6 : f32 to vector<256x512xf32>
    %11 = arith.maximumf %9, %10 : vector<256x512xf32>
    %c0_7 = arith.constant 0 : index
    %c0_8 = arith.constant 0 : index
    %12 = vector.load %arg7[%c0_7, %c0_8] : memref<256x256xf32, #tpu.memory_space<vmem>>, vector<256x256xf32>
    %13 = arith.truncf %11 : vector<256x512xf32> to vector<256x512xbf16>
    %c0_9 = arith.constant 0 : index
    %c0_10 = arith.constant 0 : index
    %14 = vector.load %arg5[%c0_9, %c0_10] : memref<512x256xbf16, #tpu.memory_space<vmem>>, vector<512x256xbf16>
    %cst_11 = arith.constant dense<0.000000e+00> : vector<256x256xf32>
    %15 = tpu.matmul %13, %14, %cst_11 {dimension_numbers = #tpu.dot_dimension_numbers<[1], [0], [0], [1], [0, 0, 1, 1], [], []>} : vector<256x512xbf16>, vector<512x256xbf16>, vector<256x256xf32> -> vector<256x256xf32>
    %16 = arith.addf %12, %15 : vector<256x256xf32>
    %c0_12 = arith.constant 0 : index
    %c0_13 = arith.constant 0 : index
    %17 = vector.load %arg7[%c0_12, %c0_13] : memref<256x256xf32, #tpu.memory_space<vmem>>, vector<256x256xf32>
    tpu.vector_store %arg7[%c0_12, %c0_13], %16 {strides = array<i32>} : memref<256x256xf32, #tpu.memory_space<vmem>>, vector<256x256xf32>,
    %c1_i32 = arith.constant 1 : i32
    %18 = arith.cmpi eq, %arg1, %c1_i32 : i32
    %19 = arith.extui %18 : i1 to i32
    %c0_i32_14 = arith.constant 0 : i32
    %20 = arith.cmpi ne, %19, %c0_i32_14 : i32
    scf.if %20 {
      %c0_15 = arith.constant 0 : index
      %c0_16 = arith.constant 0 : index
      %21 = vector.load %arg7[%c0_15, %c0_16] : memref<256x256xf32, #tpu.memory_space<vmem>>, vector<256x256xf32>
      %c0_17 = arith.constant 0 : index
      %c0_18 = arith.constant 0 : index
      %22 = vector.load %arg6[%c0_17, %c0_18] : memref<1x256xf32, #tpu.memory_space<vmem>>, vector<1x256xf32>
      %23 = vector.broadcast %22 : vector<1x256xf32> to vector<256x256xf32>
      %24 = arith.addf %21, %23 : vector<256x256xf32>
      %c0_19 = arith.constant 0 : index
      %c0_20 = arith.constant 0 : index
      %25 = vector.load %arg7[%c0_19, %c0_20] : memref<256x256xf32, #tpu.memory_space<vmem>>, vector<256x256xf32>
      tpu.vector_store %arg7[%c0_19, %c0_20], %24 {strides = array<i32>} : memref<256x256xf32, #tpu.memory_space<vmem>>, vector<256x256xf32>,
    } else {
    }
    return
  }
  func.func @transform_0(%arg0: i32, %arg1: i32) -> (i32, i32) {
    %c0_i32 = arith.constant 0 : i32
    %c0_i32_0 = arith.constant 0 : i32
    return %arg0, %c0_i32 : i32, i32
  }
  func.func @transform_1(%arg0: i32, %arg1: i32) -> (i32, i32) {
    %c0_i32 = arith.constant 0 : i32
    %c0_i32_0 = arith.constant 0 : i32
    return %c0_i32, %arg1 : i32, i32
  }
  func.func @transform_2(%arg0: i32, %arg1: i32) -> (i32, i32) {
    %c0_i32 = arith.constant 0 : i32
    %c0_i32_0 = arith.constant 0 : i32
    return %c0_i32, %arg1 : i32, i32
  }
  func.func @transform_3(%arg0: i32, %arg1: i32) -> (i32, i32) {
    %c0_i32 = arith.constant 0 : i32
    %c0_i32_0 = arith.constant 0 : i32
    return %arg1, %c0_i32 : i32, i32
  }
  func.func @transform_4(%arg0: i32, %arg1: i32) -> (i32, i32) {
    %c0_i32 = arith.constant 0 : i32
    %c0_i32_0 = arith.constant 0 : i32
    %c0_i32_1 = arith.constant 0 : i32
    return %c0_i32, %c0_i32_0 : i32, i32
  }
  func.func @transform_5(%arg0: i32, %arg1: i32) -> (i32, i32) {
    %c0_i32 = arith.constant 0 : i32
    %c0_i32_0 = arith.constant 0 : i32
    return %arg0, %c0_i32 : i32, i32
  }
}

</mosaic_0001>

<bundles_post_ra>
// kernel: tpu_custom_call.1
= control target key start
LH: loop header
LB: loop body
LE: loop exit
PB: predicated region body
PF: predicated region fallthrough
CT: control target
= control target key end

     0   :  { %6 = vsyncpa [#allocation3], 0  ;;  %s562_s0 = inlined_call_operand.hbm [shape: f32[16,128], index: 0, kind: input, shape index: {}]   ;;  %s563_s1 = inlined_call_operand.hbm [shape: f32[16,128], index: 1, kind: output, shape index: {}]  }
   0x1   :  { %7 = vsyncpa [#allocation4], 0  ;;  %s415_s6 = smov 0   ;;  %s417_s7 = smov 0  }
   0x2   :  { %s419_s8 = smov 0   ;;  %s421_s9 = smov 0  }
   0x3   :  { %s423_s10 = smov 0   ;;  %s425_s11 = smov 0  }
   0x4   :  { %s427_s12 = smov 0   ;;  %s429_s13 = smov 0  }
   0x5 LB: > { %s22_s14 = sadd.s32 1, %s392_s11  ;;  %s25_s15 = sadd.s32 1, %s396_s12  ;;  %s400_s13 = sphi %s429_s13, %s13_s13   ;;  %s396_s12 = sphi %s427_s12, %s581_s12   ;;  %s392_s11 = sphi %s425_s11, %s580_s11   ;;  %s388_s10 = sphi %s423_s10, %s579_s10   ;;  %s384_s9 = sphi %s421_s9, %s578_s9   ;;  %s380_s8 = sphi %s419_s8, %s577_s8   ;;  %s376_s7 = sphi %s417_s7, %s576_s7   ;;  %s372_s6 = sphi %s415_s6, %s575_s6  }
   0x6   : > { %p23_p0 = scmp.ge.s32.totalorder %s22_s14, 2  ;;  %s193_s16 = sadd.s32 4294967295, %s400_s13  }
   0x7   : > { %p45_p1 = scmp.ne.s32.totalorder %s376_s7, %s372_s6  ;;  %p46_p2 = scmp.eq.s32.totalorder %s193_s16, 0 }
   0x8   : > { %s583_s14 = smov (%p23_p0, %s22_s14), 0  ;;  %s585_s15 = smov (!%p23_p0, %s25_s15), %s396_s12 }
   0x9   : > { %p68_p3 = scmp.ne.s32.totalorder %s380_s8, %s376_s7  ;;  %p27_p4 = scmp.ge.s32.totalorder %s585_s15, 2 }
   0xa   : > { %p69_p5 = scmp.eq.s32.totalorder %s193_s16, 3  ;;  %s32_s17 = sadd.s32 1, %s380_s8 }
   0xb   : > { %p194_p6 = scmp.ge.s32.totalorder %s400_s13, 1  ;;  %s587_s15 = smov (%p27_p4, %s585_s15), 0 }
   0xc   : > { %p466_p7 = por %p69_p5, %p68_p3  ;;  %p82_p8 = scmp.lt.s32.totalorder %s400_s13, 5 }
   0xd   : > { %s29_s19 = ssub.s32 %s396_s12, %s587_s15  ;;  %p475_p9 = por %p46_p2, %p45_p1 }
   0xe   : > { %s568_s18 = scalar_select %p466_p7, 1, 0 }
   0xf   : > { %s569_s20 = scalar_select %p475_p9, 1, 0 }
  0x10   : > { %p30_p10 = scmp.eq.s32.totalorder %s29_s19, 0  ;;  %p479_p11 = pnand %p194_p6, %p82_p8 }
  0x11   : > { %s195_s22 = sshll.u32 %s388_s10, 7  ;;  %s402_s24 = smov [#allocation2]  }
  0x12   : > { %s570_s21 = scalar_select %p479_p11, 1, 0 }
  0x13   : > { %s485_s23 = scalar_select %p30_p10, %s380_s8, %s32_s17  }
  0x14   : > { %p205_p12 = pneg %p479_p11  ;;  %s97_s25 = sshll.u32 %s402_s24, 4  ;;  %s98_s25 = int_to_ptr.vmem [resolvable:$true] %s97_s25 }
  0x15   : > { %s95_s28 = scalar_lea.hbm %s562_s0, %s195_s22  ;;  %s281_s4 = scalar_lea.hbm %s562_s0, 256 }
  0x16   : > { %p496_p13 = pnand %p205_p12, %p475_p9  ;;  %s276_s30 = scalar_lea.hbm %s95_s28, 128 }
  0x17   : > { %p277_p0 = scmp.ne.s32.totalorder %s95_s28, %s276_s30  ;;  %p282_p4 = scmp.lt.s32.totalorder %s95_s28, %s562_s0 }
  0x18   : > { %p278_p1 = pneg %p496_p13  ;;  %p283_p5 = scmp.lt.s32.totalorder %s281_s4, %s276_s30 }
  0x1a   : > { %p279_p2 = pnand %p278_p1, %p277_p0  ;;  %p284_p6 = por %p283_p5, %p282_p4 }
  0x1c   : > { %p280_p3 = pneg %p279_p2 }
  0x1e   : > { %p285_p8 = pnand %p284_p6, %p280_p3 }
  0x20   : > { %288 = shalt.err (!%p285_p8)
}
  0x21   : > { %s289_s16 = scalar_lea.vmem %s98_s25, 128  ;;  %p297_p9 = scmp.lt.s32.totalorder %s98_s25, %s98_s25 }
  0x22   : > { %p290_p10 = scmp.ne.s32.totalorder %s98_s25, %s289_s16  ;;  %p298_p11 = scmp.lt.s32.totalorder %s289_s16, %s289_s16 }
  0x24   : > { %p292_p12 = pnand %p290_p10, %p278_p1  ;;  %p299_p0 = por %p298_p11, %p297_p9 }
  0x26   : > { %p293_p7 = pneg %p292_p12 }
  0x28   : > { %p300_p2 = pnand %p299_p0, %p293_p7 }
  0x2a   : > { %303 = shalt.err (!%p300_p2)
}
  0x2b   : > { %208 = dma.hbm_to_vmem [thread:$0]  (!%p496_p13), %s95_s28, 128, %s98_s25, [#allocation3]  }
  0x2c   : > { %p572_p4 = scmp.ne.s32.totalorder %s570_s21, 0 }
  0x2d   : > { %p573_p5 = scmp.ne.s32.totalorder (!%p572_p4), %s569_s20, 0 }
  0x2e   : > { %110 = sbr.rel (%p572_p4) target bundleno = 86 (0x56), region = 24 }
  0x33   : > { %363 = dma.done.wait (%p573_p5), [#allocation3], 128  }
  0x34   : > { %365 = vsyncadd (%p573_p5), [#allocation3], 4294967168  ;;  %p197_p1 = scmp.ne.s32.totalorder %s384_s9, 0 }
  0x36   : > { %123 = sbr.rel (%p197_p1) target bundleno = 61 (0x3d), region = 32 }
  0x3b   : > { %v403_v0 = vmov 0.0  }
  0x3c   : > { %124 = vst [vmem:[#allocation5] sm:$0xff] %v403_v0 }
  0x3d PF: > { %v126_v2 = vld [vmem:[#allocation2] sm:$0xff]  ;;  %s136_s21 = scalar_lea.hbm %s563_s1, %s195_s22  ;;  %s404_s24 = smov [#allocation5]  }
  0x3e   : > { %s138_s25 = sshll.u32 %s404_s24, 4  ;;  %p574_p9 = scmp.ne.s32.totalorder %s568_s18, 0  ;;  %s139_s25 = int_to_ptr.vmem [resolvable:$true] %s138_s25 }
  0x3f   : > { %s304_s20 = scalar_lea.vmem %s139_s25, 128  ;;  %p311_p3 = scmp.lt.s32.totalorder %s139_s25, %s139_s25 }
  0x40   : > { %p305_p7 = scmp.ne.s32.totalorder %s139_s25, %s304_s20  ;;  %p312_p6 = scmp.lt.s32.totalorder %s304_s20, %s304_s20 }
  0x42   : > { %p306_p11 = pnand %p305_p7, %p574_p9  ;;  %p313_p8 = por %p312_p6, %p311_p3 }
  0x43   : > { %v125_v1 = vld [vmem:[#allocation5] sm:$0xff] }
  0x44   : > { %v127_v3 = vadd.f32 %v126_v2, %v125_v1  ;;  %p307_p13 = pneg %p306_p11 }
  0x46   : > { %128 = vst [vmem:[#allocation5] sm:$0xff] %v127_v3  ;;  %p314_p10 = pnand %p313_p8, %p307_p13 }
  0x48   : > { %317 = shalt.err (!%p314_p10)
}
  0x49   : > { %s318_s9 = scalar_lea.hbm %s136_s21, 128  ;;  %s322_s26 = scalar_lea.hbm %s563_s1, 256 }
  0x4a   : > { %p319_p12 = scmp.ne.s32.totalorder %s136_s21, %s318_s9  ;;  %p323_p4 = scmp.lt.s32.totalorder %s136_s21, %s563_s1 }
  0x4b   : > { %p324_p5 = scmp.lt.s32.totalorder %s322_s26, %s318_s9 }
  0x4c   : > { %p320_p0 = pnand %p319_p12, %p574_p9 }
  0x4d   : > { %p325_p1 = por %p324_p5, %p323_p4 }
  0x4e   : > { %p321_p2 = pneg %p320_p0 }
  0x50   : > { %p326_p7 = pnand %p325_p1, %p321_p2 }
  0x52   : > { %329 = shalt.err (!%p326_p7)
}
  0x53   : > { %203 = dma.vmem_to_hbm [thread:$0]  (%p574_p9), %s139_s25, 128, %s136_s21, [#allocation4]  }
  0x54   : > { %367 = dma.done.wait (%p574_p9), [#allocation4], 128  }
  0x55   : > { %369 = vsyncadd (%p574_p9), [#allocation4], 4294967168 }
  0x56 PF: > { %s13_s13 = sadd.s32 1, %s400_s13   ;;  %s575_s6 = smov %s376_s7 }
  0x57   : > { %p10_p11 = scmp.ge.s32.totalorder %s13_s13, 6   ;;  %s576_s7 = smov %s380_s8 }
  0x58   : > { %s577_s8 = smov %s485_s23  ;;  %s578_s9 = smov %s392_s11 }
  0x59   : > { %s579_s10 = smov %s396_s12  ;;  %s580_s11 = smov %s583_s14 }
  0x5a   : > { %s581_s12 = smov %s587_s15  ;;  %12 = sbr.rel (!%p10_p11) target bundleno = 5 (0x5), region = 59 }
  0x5f   :  { %151 = vsyncpa [#allocation3], 1 }
  0x60   :  { %153 = vsyncpa [#allocation3 + $0x1], 1 }
  0x61   :  { %154 = vsyncpa [#allocation4], 1 }
  0x62   :  { %156 = vsyncpa [#allocation4 + $0x1], 1 }

// kernel: _ffn_forward.1
= control target key start
LH: loop header
LB: loop body
LE: loop exit
PB: predicated region body
PF: predicated region fallthrough
CT: control target
= control target key end

     0   :  { %s4741_s0 = inlined_call_operand.hbm [shape: f32[512,256], index: 0, kind: input, shape index: {}]   ;;  %s4742_s1 = inlined_call_operand.hbm [shape: bf16[256,1024], index: 1, kind: input, shape index: {}]   ;;  %s4743_s2 = inlined_call_operand.hbm [shape: f32[1,1024], index: 2, kind: input, shape index: {}]   ;;  %s4744_s3 = inlined_call_operand.hbm [shape: bf16[1024,256], index: 3, kind: input, shape index: {}]   ;;  %s4745_s4 = inlined_call_operand.vmem [shape: f32[1,256], index: 4, kind: input, shape index: {}]   ;;  %s4746_s5 = inlined_call_operand.hbm [shape: f32[512,256], index: 5, kind: output, shape index: {}]  }
   0x1   :  { %4762 = sst [smem:[#allocation26_spill]] %s4741_s0 }
   0x2   :  { %4763 = sst [smem:[#allocation27_spill]] %s4742_s1 }
   0x3   :  { %4764 = sst [smem:[#allocation28_spill]] %s4745_s4 }
   0x4   :  { %4765 = sst [smem:[#allocation29_spill]] %s4746_s5 }
   0x5   :  { %10 = vsyncpa [#allocation3], 0 }
   0x6   :  { %12 = vsyncpa [#allocation3 + $0x1], 0 }
   0x7   :  { %13 = vsyncpa [#allocation6], 0 }
   0x8   :  { %15 = vsyncpa [#allocation6 + $0x1], 0 }
   0x9   :  { %16 = vsyncpa [#allocation9], 0 }
   0xa   :  { %18 = vsyncpa [#allocation9 + $0x1], 0 }
   0xb   :  { %19 = vsyncpa [#allocation4], 0 }
   0xc   :  { %21 = vsyncpa [#allocation4 + $0x1], 0  ;;  %s3630_s18 = smov 0   ;;  %s3632_s19 = smov 0  }
   0xd   :  { %s3634_s20 = smov 0   ;;  %s3636_s21 = smov 0  }
   0xe   :  { %s3638_s22 = smov 0   ;;  %s3640_s23 = smov 0  }
   0xf   :  { %s3642_s24 = smov 0   ;;  %s3644_s25 = smov 0  }
  0x10   :  { %s3646_s26 = smov 0   ;;  %s3648_s27 = smov 0  }
  0x11   :  { %s3650_s28 = smov 0  }
  0x12 LB: > { %4766 = sst [smem:[#allocation15_spill]] %s3553_s20  ;;  %p54_p0 = scmp.eq.s32.totalorder %s3585_s28, 0  ;;  %s3585_s28 = sphi %s3650_s28, %s27_s28   ;;  %s3581_s27 = sphi %s3648_s27, %s4806_s27   ;;  %s3577_s26 = sphi %s3646_s26, %s4812_s26   ;;  %s3573_s25 = sphi %s3644_s25, %s4804_s25   ;;  %s3569_s24 = sphi %s3642_s24, %s4811_s24   ;;  %s3565_s23 = sphi %s3640_s23, %s4803_s23   ;;  %s3561_s22 = sphi %s3638_s22, %s4810_s22   ;;  %s3557_s21 = sphi %s3636_s21, %s4809_s21   ;;  %s3553_s20 = sphi %s3634_s20, %s4801_s20   ;;  %s3549_s19 = sphi %s3632_s19, %s4808_s19   ;;  %s3545_s18 = sphi %s3630_s18, %s4807_s18  }
  0x13   : > { %4767 = sst [smem:[#allocation16_spill]] %s3557_s21  ;;  %s72_s29 = sadd.s32 1, %s3553_s20 }
  0x14   : > { %4768 = sst [smem:[#allocation17_spill]] %s3565_s23  ;;  %p79_p1 = scmp.ne.s32.totalorder %s3553_s20, %s3549_s19 }
  0x15   : > { %4769 = sst [smem:[#allocation18_spill]] %s3573_s25  ;;  %p85_p2 = scmp.ne.s32.totalorder %s3549_s19, %s3545_s18 }
  0x16   : > { %4770 = sst [smem:[#allocation19_spill]] %s3581_s27  ;;  %p4752_p3 = scmp.lt.s32.totalorder %s3585_s28, 4 }
  0x17   : > { %4771 = sst [smem:[#allocation20_spill]] %s3585_s28  ;;  %p81_p4 = por %p79_p1, %p54_p0 }
  0x18   : > { %s233_s30 = sand.u32 1, %s3585_s28   ;;  %s3696_s6 = sand.u32 1, %s3553_s20  }
  0x19   : > { %s4747_s7 = sshll.u32 %s3696_s6, 9  ;;  %s3022_s8 = sshll.u32 %s3577_s26, 8 }
  0x1a   : > { %s4772_s1 = sld [smem:[#allocation27_spill]]  ;;  %s237_s12 = scalar_lea.vmem [#allocation5], %s4747_s7 }
  0x1b   : > { %s244_s13 = sshll.u32 %s237_s12, 4  ;;  %p3707_p5 = pnand %p4752_p3, %p81_p4  ;;  %s245_s13 = int_to_ptr.vmem [resolvable:$true] %s244_s13 }
  0x1c   : > { %p2878_p6 = scmp.ge.s32.totalorder %s3585_s28, 1  ;;  %s3712_s15 = scalar_lea.sflag [#allocation6], %s233_s30 }
  0x1d   : > { %p4751_p7 = pneg %p3707_p5  ;;  %s3358_s16 = scalar_lea.vmem %s245_s13, 8192 }
  0x1e   : > { %p3359_p8 = scmp.ne.s32.totalorder %s245_s13, %s3358_s16  ;;  %s3587_s17 = smov [#allocation5]  }
  0x20   : > { %s243_s11 = scalar_lea.hbm %s4772_s1, %s3022_s8  ;;  %p3361_p9 = pnand %p3359_p8, %p4751_p7 }
  0x21   : > { %s3363_s8 = sshll.u32 %s3587_s17, 4  ;;  %s3364_s8 = int_to_ptr.vmem [resolvable:$false] %s3363_s8 }
  0x22   : > { %p3362_p10 = pneg %p3361_p9  ;;  %s3365_s9 = scalar_lea.vmem %s3364_s8, 16384 }
  0x23   : > { %p3366_p11 = scmp.lt.s32.totalorder %s245_s13, %s3364_s8  ;;  %p3367_p12 = scmp.lt.s32.totalorder %s3365_s9, %s3358_s16 }
  0x25   : > { %p3368_p13 = por %p3367_p12, %p3366_p11 }
  0x27   : > { %p3369_p1 = pnand %p3368_p13, %p3362_p10 }
  0x29   : > { %3372 = shalt.err (!%p3369_p1)
}
  0x2a   : > { %s3588_s10 = smov 512   ;;  %s4748_s30 = smov 256  }
  0x2b   : > { %s4749_s12 = smov 16   ;;  %p293_p4 = scmp.lt.s32.totalorder %s3585_s28, 5 }
  0x2c   : > { %3044 = dma.hbm_to_vmem [thread:$0]  (!%p3707_p5), %s243_s11, 8192, %s245_s13, %s3712_s15, %s3588_s10, %s4748_s30, %s4749_s12  }
  0x2d   : > { %p3727_p8 = pnand %p2878_p6, %p293_p4  ;;  %s3732_s17 = sadd.s32 4294967295, %s3585_s28  }
  0x2e   : > { %s2861_s8 = sadd.s32 4294967294, %s3585_s28   ;;  %s36_s9 = sadd.s32 1, %s3577_s26 }
  0x2f   : > { %s39_s7 = sadd.s32 1, %s3581_s27  ;;  %p37_p9 = scmp.ge.s32.totalorder %s36_s9, 2 }
  0x30   : > { %s46_s11 = sadd.s32 1, %s3565_s23  ;;  %p53_p10 = scmp.ne.s32.totalorder %s3565_s23, %s3561_s22 }
  0x31   : > { %p59_p11 = scmp.ne.s32.totalorder %s3561_s22, %s3557_s21  ;;  %s4814_s9 = smov (%p37_p9, %s36_s9), 0 }
  0x32   : > { %4775 = sst [smem:[#allocation21_spill]] %s4814_s9  ;;  %s4816_s7 = smov (!%p37_p9, %s39_s7), %s3581_s27 }
  0x33   : > { %p3750_p6 = por %p54_p0, %p53_p10  ;;  %p60_p12 = scmp.eq.s32.totalorder %s3732_s17, 0 }
  0x34   : > { %p41_p13 = scmp.ge.s32.totalorder %s4816_s7, 2  ;;  %s69_s10 = ssub.s32 %s3577_s26, %s4814_s9 }
  0x35   : > { %p3760_p1 = por %p60_p12, %p59_p11  ;;  %p70_p4 = scmp.eq.s32.totalorder %s69_s10, 0 }
  0x36   : > { %s4818_s7 = smov (%p41_p13, %s4816_s7), 0  ;;  %p3776_p0 = por %p85_p2, %p60_p12 }
  0x37   : > { %4778 = sst [smem:[#allocation22_spill]] %s4818_s7  ;;  %s43_s1 = ssub.s32 %s3581_s27, %s4818_s7 }
  0x38   : > { %s3769_s12 = scalar_select %p70_p4, %s3553_s20, %s72_s29  }
  0x39   : > { %p44_p9 = scmp.eq.s32.totalorder %s43_s1, 0  ;;  %p182_p7 = scmp.eq.s32.totalorder %s3732_s17, 3 }
  0x3a   : > { %4779 = sst [smem:[#allocation23_spill]] %s3769_s12  ;;  %p188_p3 = scmp.eq.s32.totalorder %s2861_s8, 3 }
  0x3b   : > { %s211_s10 = sand.u32 1, %s3565_s23   ;;  %p3788_p13 = por %p182_p7, %p53_p10 }
  0x3c   : > { %s3783_s9 = scalar_select %p44_p9, %s3565_s23, %s46_s11  }
  0x3d   : > { %p3795_p4 = por %p188_p3, %p59_p11  ;;  %s2864_s7 = sshll.u32 %s211_s10, 9 }
  0x3e   : > { %4781 = sst [smem:[#allocation24_spill]] %s3783_s9  ;;  %s3021_s12 = sshll.u32 %s3581_s27, 13 }
  0x3f   : > { %s4783_s18 = scalar_select %p3795_p4, 1, 0 }
  0x40   : > { %s4785_s0 = sld [smem:[#allocation26_spill]]  ;;  %s215_s8 = scalar_lea.vmem [#allocation2], %s2864_s7 }
  0x41   : > { %4784 = sst [smem:[#allocation25_spill]] %s4783_s18  ;;  %s223_s4 = sshll.u32 %s215_s8, 4  ;;  %s224_s4 = int_to_ptr.vmem [resolvable:$true] %s223_s4 }
  0x42   : > { %p4786_p2 = scmp.lt.s32.totalorder %s3585_s28, 4  ;;  %s2871_s9 = sshll.u32 %s3696_s6, 2 }
  0x43   : > { %s3023_s23 = sshll.u32 %s3577_s26, 6  ;;  %s212_s21 = scalar_lea.sflag [#allocation3], %s211_s10 }
  0x44   : > { %p3807_p7 = pnand %p4786_p2, %p3750_p6  ;;  %s3386_s27 = scalar_lea.vmem %s224_s4, 8192 }
  0x45   : > { %p3387_p10 = scmp.ne.s32.totalorder %s224_s4, %s3386_s27  ;;  %s3591_s20 = smov [#allocation2]  }
  0x46   : > { %s222_s1 = scalar_lea.hbm %s4785_s0, %s3021_s12  ;;  %p3375_p3 = pneg %p3807_p7 }
  0x47   : > { %s3391_s25 = sshll.u32 %s3591_s20, 4  ;;  %s3392_s25 = int_to_ptr.vmem [resolvable:$false] %s3391_s25 }
  0x48   : > { %p3389_p11 = pnand %p3387_p10, %p3375_p3  ;;  %s3393_s7 = scalar_lea.vmem %s3392_s25, 16384 }
  0x49   : > { %p3394_p9 = scmp.lt.s32.totalorder %s224_s4, %s3392_s25  ;;  %p3395_p4 = scmp.lt.s32.totalorder %s3393_s7, %s3386_s27 }
  0x4a   : > { %p3390_p12 = pneg %p3389_p11 }
  0x4b   : > { %p3396_p6 = por %p3395_p4, %p3394_p9 }
  0x4d   : > { %p3397_p2 = pnand %p3396_p6, %p3390_p12 }
  0x4f   : > { %3400 = shalt.err (!%p3397_p2)
}
  0x50   : > { %s4788_s12 = smov 16   ;;  %s4789_s13 = smov 256  }
  0x51   : > { %3041 = dma.hbm_to_vmem [thread:$0]  (!%p3807_p7), %s222_s1, 8192, %s224_s4, %s212_s21, %s4789_s13, %s4789_s13, %s4788_s12  }
  0x52   : > { %s264_s0 = scalar_lea.hbm %s4743_s2, %s3023_s23  ;;  %s258_s18 = scalar_lea.vmem [#allocation7], %s2871_s9 }
  0x53   : > { %s266_s20 = sshll.u32 %s258_s18, 4  ;;  %p4790_p4 = pneg %p3707_p5  ;;  %s267_s20 = int_to_ptr.vmem [resolvable:$true] %s266_s20 }
  0x54   : > { %s3414_s28 = scalar_lea.vmem %s267_s20, 64  ;;  %s3592_s27 = smov [#allocation7]  }
  0x55   : > { %p3415_p3 = scmp.ne.s32.totalorder %s267_s20, %s3414_s28  ;;  %s3419_s11 = sshll.u32 %s3592_s27, 4  ;;  %s3420_s11 = int_to_ptr.vmem [resolvable:$false] %s3419_s11 }
  0x56   : > { %s3421_s25 = scalar_lea.vmem %s3420_s11, 128  ;;  %p3422_p12 = scmp.lt.s32.totalorder %s267_s20, %s3420_s11 }
  0x57   : > { %p3417_p10 = pnand %p3415_p3, %p4790_p4  ;;  %p3423_p9 = scmp.lt.s32.totalorder %s3421_s25, %s3414_s28 }
  0x59   : > { %p3418_p11 = pneg %p3417_p10  ;;  %p3424_p7 = por %p3423_p9, %p3422_p12 }
  0x5b   : > { %p3425_p6 = pnand %p3424_p7, %p3418_p11 }
  0x5d   : > { %3428 = shalt.err (!%p3425_p6)
}
  0x5e   : > { %3047 = dma.hbm_to_vmem [thread:$0]  (!%p3707_p5), %s264_s0, 64, %s267_s20, %s3712_s15  }
  0x5f   : > { %s3025_s4 = sshll.u32 %s3577_s26, 13  ;;  %s4791_s18 = sshll.u32 %s3696_s6, 9 }
  0x60   : > { %s284_s9 = scalar_lea.hbm %s4744_s3, %s3025_s4  ;;  %s277_s1 = scalar_lea.vmem [#allocation8], %s4791_s18 }
  0x61   : > { %s285_s7 = sshll.u32 %s277_s1, 4  ;;  %s274_s28 = scalar_lea.sflag [#allocation9], %s3696_s6  ;;  %s286_s7 = int_to_ptr.vmem [resolvable:$true] %s285_s7 }
  0x62   : > { %s3442_s12 = scalar_lea.vmem %s286_s7, 8192  ;;  %p4792_p3 = pmov %p4790_p4 }
  0x63   : > { %p3443_p2 = scmp.ne.s32.totalorder %s286_s7, %s3442_s12  ;;  %s3593_s13 = smov [#allocation8]  }
  0x64   : > { %s3447_s10 = sshll.u32 %s3593_s13, 4  ;;  %s3448_s10 = int_to_ptr.vmem [resolvable:$false] %s3447_s10 }
  0x65   : > { %p3445_p4 = pnand %p3443_p2, %p4792_p3  ;;  %s3449_s0 = scalar_lea.vmem %s3448_s10, 16384 }
  0x66   : > { %p3450_p11 = scmp.lt.s32.totalorder %s286_s7, %s3448_s10  ;;  %p3451_p12 = scmp.lt.s32.totalorder %s3449_s0, %s3442_s12 }
  0x67   : > { %p3446_p10 = pneg %p3445_p4 }
  0x68   : > { %p3452_p9 = por %p3451_p12, %p3450_p11 }
  0x6a   : > { %p3453_p7 = pnand %p3452_p9, %p3446_p10 }
  0x6c   : > { %3456 = shalt.err (!%p3453_p7)
}
  0x6d   : > { %s3594_s15 = smov 128   ;;  %s3595_s8 = smov 8  }
  0x6e   : > { %3050 = dma.hbm_to_vmem [thread:$0]  (!%p3707_p5), %s284_s9, 8192, %s286_s7, %s274_s28, %s3594_s15, %s3594_s15, %s3595_s8  }
  0x6f   : > { %297 = sbr.rel (%p3727_p8) target bundleno = 821 (0x335), region = 40  ;;  %s3844_s6 = sand.u32 (!%p3727_p8), 1, %s3561_s22  }
  0x70   : > { %s2879_s20 = sshll.u32 (!%p3727_p8), %s3844_s6, 9  ;;  %s300_s27 = scalar_lea.sflag (!%p3727_p8), [#allocation3], %s3844_s6 }
  0x71   : > { %s3848_s11 = scalar_lea.vmem (!%p3727_p8), [#allocation2], %s2879_s20 }
  0x74   : > { %3528 = dma.done.wait (%p3760_p1), %s300_s27, 8192  }
  0x75   : > { %3530 = vsyncadd (%p3760_p1), %s300_s27, 4294959104  ;;  %s308_s14 = sand.u32 1, %s3732_s17   ;;  %s310_s16 = sand.u32 1, %s3549_s19  }
  0x76   : > { %s2880_s25 = sshll.u32 %s310_s16, 9  ;;  %s309_s4 = scalar_lea.sflag [#allocation6], %s308_s14 }
  0x77   : > { %s3856_s21 = scalar_lea.vmem [#allocation5], %s2880_s25 }
  0x78   : > { %3532 = dma.done.wait (%p3776_p0), %s309_s4, 8256  }
  0x79   : > { %3534 = vsyncadd (%p3776_p0), %s309_s4, 4294959040  ;;  %s2881_s23 = sshll.u32 %s310_s16, 2  ;;  %s327_s30 = scalar_lea.sflag [#allocation9], %s310_s16 }
  0x7a   : > { %s3862_s9 = scalar_lea.vmem [#allocation7], %s2881_s23  ;;  %s3864_s18 = scalar_lea.vmem [#allocation8], %s2880_s25 }
  0x7b   : > { %3536 = dma.done.wait (%p3776_p0), %s327_s30, 8192  }
  0x7c   : > { %3538 = vsyncadd (%p3776_p0), %s327_s30, 4294959104  ;;  %s3870_s17 = scalar_lea.vmem [#allocation10], %s2879_s20  ;;  %p2884_p5 = scmp.ne.s32.totalorder %s3569_s24, 0 }
  0x7e   : > { %380 = sbr.rel (%p2884_p5) target bundleno = 164 (0xa4), region = 60 }
  0x83   : > { %v3596_v0 = vmov 0.0  }
  0x84   : > { %381 = vst [vmem:[%s3870_s17] sm:$0xff] %v3596_v0  ;;  %382 = vst [vmem:[%s3870_s17 + $0x8] sm:$0xff] %v3596_v0 }
  0x85   : > { %383 = vst [vmem:[%s3870_s17 + $0x10] sm:$0xff] %v3596_v0  ;;  %384 = vst [vmem:[%s3870_s17 + $0x18] sm:$0xff] %v3596_v0 }
  0x86   : > { %385 = vst [vmem:[%s3870_s17 + $0x20] sm:$0xff] %v3596_v0  ;;  %386 = vst [vmem:[%s3870_s17 + $0x28] sm:$0xff] %v3596_v0 }
  0x87   : > { %387 = vst [vmem:[%s3870_s17 + $0x30] sm:$0xff] %v3596_v0  ;;  %388 = vst [vmem:[%s3870_s17 + $0x38] sm:$0xff] %v3596_v0 }
  0x88   : > { %389 = vst [vmem:[%s3870_s17 + $0x40] sm:$0xff] %v3596_v0  ;;  %390 = vst [vmem:[%s3870_s17 + $0x48] sm:$0xff] %v3596_v0 }
  0x89   : > { %391 = vst [vmem:[%s3870_s17 + $0x50] sm:$0xff] %v3596_v0  ;;  %392 = vst [vmem:[%s3870_s17 + $0x58] sm:$0xff] %v3596_v0 }
  0x8a   : > { %393 = vst [vmem:[%s3870_s17 + $0x60] sm:$0xff] %v3596_v0  ;;  %394 = vst [vmem:[%s3870_s17 + $0x68] sm:$0xff] %v3596_v0 }
  0x8b   : > { %395 = vst [vmem:[%s3870_s17 + $0x70] sm:$0xff] %v3596_v0  ;;  %396 = vst [vmem:[%s3870_s17 + $0x78] sm:$0xff] %v3596_v0 }
  0x8c   : > { %397 = vst [vmem:[%s3870_s17 + $0x80] sm:$0xff] %v3596_v0  ;;  %398 = vst [vmem:[%s3870_s17 + $0x88] sm:$0xff] %v3596_v0 }
  0x8d   : > { %399 = vst [vmem:[%s3870_s17 + $0x90] sm:$0xff] %v3596_v0  ;;  %400 = vst [vmem:[%s3870_s17 + $0x98] sm:$0xff] %v3596_v0 }
  0x8e   : > { %401 = vst [vmem:[%s3870_s17 + $0xa0] sm:$0xff] %v3596_v0  ;;  %402 = vst [vmem:[%s3870_s17 + $0xa8] sm:$0xff] %v3596_v0 }
  0x8f   : > { %403 = vst [vmem:[%s3870_s17 + $0xb0] sm:$0xff] %v3596_v0  ;;  %404 = vst [vmem:[%s3870_s17 + $0xb8] sm:$0xff] %v3596_v0 }
  0x90   : > { %405 = vst [vmem:[%s3870_s17 + $0xc0] sm:$0xff] %v3596_v0  ;;  %406 = vst [vmem:[%s3870_s17 + $0xc8] sm:$0xff] %v3596_v0 }
  0x91   : > { %407 = vst [vmem:[%s3870_s17 + $0xd0] sm:$0xff] %v3596_v0  ;;  %408 = vst [vmem:[%s3870_s17 + $0xd8] sm:$0xff] %v3596_v0 }
  0x92   : > { %409 = vst [vmem:[%s3870_s17 + $0xe0] sm:$0xff] %v3596_v0  ;;  %410 = vst [vmem:[%s3870_s17 + $0xe8] sm:$0xff] %v3596_v0 }
  0x93   : > { %411 = vst [vmem:[%s3870_s17 + $0xf0] sm:$0xff] %v3596_v0  ;;  %412 = vst [vmem:[%s3870_s17 + $0xf8] sm:$0xff] %v3596_v0 }
  0x94   : > { %413 = vst [vmem:[%s3870_s17 + $0x100] sm:$0xff] %v3596_v0  ;;  %414 = vst [vmem:[%s3870_s17 + $0x108] sm:$0xff] %v3596_v0 }
  0x95   : > { %415 = vst [vmem:[%s3870_s17 + $0x110] sm:$0xff] %v3596_v0  ;;  %416 = vst [vmem:[%s3870_s17 + $0x118] sm:$0xff] %v3596_v0 }
  0x96   : > { %417 = vst [vmem:[%s3870_s17 + $0x120] sm:$0xff] %v3596_v0  ;;  %418 = vst [vmem:[%s3870_s17 + $0x128] sm:$0xff] %v3596_v0 }
  0x97   : > { %419 = vst [vmem:[%s3870_s17 + $0x130] sm:$0xff] %v3596_v0  ;;  %420 = vst [vmem:[%s3870_s17 + $0x138] sm:$0xff] %v3596_v0 }
  0x98   : > { %421 = vst [vmem:[%s3870_s17 + $0x140] sm:$0xff] %v3596_v0  ;;  %422 = vst [vmem:[%s3870_s17 + $0x148] sm:$0xff] %v3596_v0 }
  0x99   : > { %423 = vst [vmem:[%s3870_s17 + $0x150] sm:$0xff] %v3596_v0  ;;  %424 = vst [vmem:[%s3870_s17 + $0x158] sm:$0xff] %v3596_v0 }
  0x9a   : > { %425 = vst [vmem:[%s3870_s17 + $0x160] sm:$0xff] %v3596_v0  ;;  %426 = vst [vmem:[%s3870_s17 + $0x168] sm:$0xff] %v3596_v0 }
  0x9b   : > { %427 = vst [vmem:[%s3870_s17 + $0x170] sm:$0xff] %v3596_v0  ;;  %428 = vst [vmem:[%s3870_s17 + $0x178] sm:$0xff] %v3596_v0 }
  0x9c   : > { %429 = vst [vmem:[%s3870_s17 + $0x180] sm:$0xff] %v3596_v0  ;;  %430 = vst [vmem:[%s3870_s17 + $0x188] sm:$0xff] %v3596_v0 }
  0x9d   : > { %431 = vst [vmem:[%s3870_s17 + $0x190] sm:$0xff] %v3596_v0  ;;  %432 = vst [vmem:[%s3870_s17 + $0x198] sm:$0xff] %v3596_v0 }
  0x9e   : > { %433 = vst [vmem:[%s3870_s17 + $0x1a0] sm:$0xff] %v3596_v0  ;;  %434 = vst [vmem:[%s3870_s17 + $0x1a8] sm:$0xff] %v3596_v0 }
  0x9f   : > { %435 = vst [vmem:[%s3870_s17 + $0x1b0] sm:$0xff] %v3596_v0  ;;  %436 = vst [vmem:[%s3870_s17 + $0x1b8] sm:$0xff] %v3596_v0 }
  0xa0   : > { %437 = vst [vmem:[%s3870_s17 + $0x1c0] sm:$0xff] %v3596_v0  ;;  %438 = vst [vmem:[%s3870_s17 + $0x1c8] sm:$0xff] %v3596_v0 }
  0xa1   : > { %439 = vst [vmem:[%s3870_s17 + $0x1d0] sm:$0xff] %v3596_v0  ;;  %440 = vst [vmem:[%s3870_s17 + $0x1d8] sm:$0xff] %v3596_v0 }
  0xa2   : > { %441 = vst [vmem:[%s3870_s17 + $0x1e0] sm:$0xff] %v3596_v0  ;;  %442 = vst [vmem:[%s3870_s17 + $0x1e8] sm:$0xff] %v3596_v0 }
  0xa3   : > { %443 = vst [vmem:[%s3870_s17 + $0x1f0] sm:$0xff] %v3596_v0  ;;  %444 = vst [vmem:[%s3870_s17 + $0x1f8] sm:$0xff] %v3596_v0 }
  0xa4 PF: > { %v3153_v1 = vld [vmem:[%s3856_s21 + $0xe4] ss:$16 sps:$4 sm:$0xff]   ;;  %v3155_v2 = vld [vmem:[%s3856_s21 + $0xec] ss:$16 sps:$4 sm:$0xff]   ;;  %v3157_v3 = vld [vmem:[%s3856_s21 + $0xe0] ss:$16 sps:$4 sm:$0xff]  }
  0xa5   : > { %947 = vmatprep.subr.bf16.mxu0 %v3153_v1  ;;  %v3158_v4 = vld [vmem:[%s3856_s21 + $0xe8] ss:$16 sps:$4 sm:$0xff]   ;;  %1140 = vmatprep.subr.bf16.mxu1 %v3155_v2  ;;  %v3159_v5 = vld [vmem:[%s3856_s21 + $0xc4] ss:$16 sps:$4 sm:$0xff]   ;;  %v3161_v6 = vld [vmem:[%s3856_s21 + $0xcc] ss:$16 sps:$4 sm:$0xff]  }
  0xa6   : > { %948 = vmatpush1.bf16.msra.mxu0 %v3157_v3  ;;  %1141 = vmatpush1.bf16.msra.mxu1 %v3158_v4  ;;  %v3163_v7 = vld [vmem:[%s3856_s21 + $0xc0] ss:$16 sps:$4 sm:$0xff]   ;;  %v3164_v8 = vld [vmem:[%s3856_s21 + $0xc8] ss:$16 sps:$4 sm:$0xff]   ;;  %v3165_v9 = vld [vmem:[%s3856_s21 + $0xa4] ss:$16 sps:$4 sm:$0xff]  }
  0xa7   : > { %949 = vmatprep.subr.bf16.mxu0 %v3159_v5  ;;  %1142 = vmatprep.subr.bf16.mxu1 %v3161_v6  ;;  %v3167_v10 = vld [vmem:[%s3856_s21 + $0xac] ss:$16 sps:$4 sm:$0xff]   ;;  %v3169_v11 = vld [vmem:[%s3856_s21 + $0xa0] ss:$16 sps:$4 sm:$0xff]   ;;  %v3170_v12 = vld [vmem:[%s3856_s21 + $0xa8] ss:$16 sps:$4 sm:$0xff]  }
  0xa8   : > { %v3171_v13 = vld [vmem:[%s3856_s21 + $0x84] ss:$16 sps:$4 sm:$0xff]   ;;  %v3173_v14 = vld [vmem:[%s3856_s21 + $0x8c] ss:$16 sps:$4 sm:$0xff]   ;;  %v3175_v15 = vld [vmem:[%s3856_s21 + $0x80] ss:$16 sps:$4 sm:$0xff]  }
  0xa9   : > { %v3176_v16 = vld [vmem:[%s3856_s21 + $0x88] ss:$16 sps:$4 sm:$0xff]   ;;  %v3177_v17 = vld [vmem:[%s3856_s21 + $0x64] ss:$16 sps:$4 sm:$0xff]   ;;  %v3179_v18 = vld [vmem:[%s3856_s21 + $0x6c] ss:$16 sps:$4 sm:$0xff]  }
  0xaa   : > { %950 = vmatpush1.bf16.msra.mxu0 %v3163_v7  ;;  %1143 = vmatpush1.bf16.msra.mxu1 %v3164_v8  ;;  %v3181_v19 = vld [vmem:[%s3856_s21 + $0x60] ss:$16 sps:$4 sm:$0xff]   ;;  %v3182_v20 = vld [vmem:[%s3856_s21 + $0x68] ss:$16 sps:$4 sm:$0xff]   ;;  %v3183_v21 = vld [vmem:[%s3856_s21 + $0x44] ss:$16 sps:$4 sm:$0xff]  }
  0xab   : > { %951 = vmatprep.subr.bf16.mxu0 %v3165_v9  ;;  %1144 = vmatprep.subr.bf16.mxu1 %v3167_v10  ;;  %v3185_v22 = vld [vmem:[%s3856_s21 + $0x4c] ss:$16 sps:$4 sm:$0xff]   ;;  %v3187_v23 = vld [vmem:[%s3856_s21 + $0x40] ss:$16 sps:$4 sm:$0xff]   ;;  %v3188_v24 = vld [vmem:[%s3856_s21 + $0x48] ss:$16 sps:$4 sm:$0xff]  }
  0xac   : > { %v3189_v25 = vld [vmem:[%s3856_s21 + $0x24] ss:$16 sps:$4 sm:$0xff]   ;;  %v3191_v26 = vld [vmem:[%s3856_s21 + $0x2c] ss:$16 sps:$4 sm:$0xff]   ;;  %v3193_v27 = vld [vmem:[%s3856_s21 + $0x20] ss:$16 sps:$4 sm:$0xff]  }
  0xad   : > { %v3194_v28 = vld [vmem:[%s3856_s21 + $0x28] ss:$16 sps:$4 sm:$0xff]   ;;  %v3195_v29 = vld [vmem:[%s3856_s21 + $0x4] ss:$16 sps:$4 sm:$0xff]   ;;  %v3197_v30 = vld [vmem:[%s3856_s21 + $0xc] ss:$16 sps:$4 sm:$0xff]  }
  0xae   : > { %952 = vmatpush1.bf16.msra.mxu0 %v3169_v11  ;;  %1145 = vmatpush1.bf16.msra.mxu1 %v3170_v12  ;;  %v3199_v31 = vld [vmem:[%s3856_s21] ss:$16 sps:$4 sm:$0xff]   ;;  %v3200_v32 = vld [vmem:[%s3856_s21 + $0x8] ss:$16 sps:$4 sm:$0xff]   ;;  %v3201_v33 = vld [vmem:[%s3856_s21 + $0x1e4] ss:$16 sps:$4 sm:$0xff]  }
  0xaf   : > { %953 = vmatprep.subr.bf16.mxu0 %v3171_v13  ;;  %1146 = vmatprep.subr.bf16.mxu1 %v3173_v14  ;;  %v3203_v34 = vld [vmem:[%s3856_s21 + $0x1ec] ss:$16 sps:$4 sm:$0xff]   ;;  %v3205_v35 = vld [vmem:[%s3856_s21 + $0x1e0] ss:$16 sps:$4 sm:$0xff]   ;;  %v3206_v36 = vld [vmem:[%s3856_s21 + $0x1e8] ss:$16 sps:$4 sm:$0xff]  }
  0xb0   : > { %v3207_v37 = vld [vmem:[%s3856_s21 + $0x1c4] ss:$16 sps:$4 sm:$0xff]   ;;  %v3209_v38 = vld [vmem:[%s3856_s21 + $0x1cc] ss:$16 sps:$4 sm:$0xff]   ;;  %v3211_v39 = vld [vmem:[%s3856_s21 + $0x1c0] ss:$16 sps:$4 sm:$0xff]  }
  0xb1   : > { %v3212_v40 = vld [vmem:[%s3856_s21 + $0x1c8] ss:$16 sps:$4 sm:$0xff]   ;;  %v3213_v41 = vld [vmem:[%s3856_s21 + $0x1a4] ss:$16 sps:$4 sm:$0xff]   ;;  %v3215_v42 = vld [vmem:[%s3856_s21 + $0x1ac] ss:$16 sps:$4 sm:$0xff]  }
  0xb2   : > { %954 = vmatpush1.bf16.msra.mxu0 %v3175_v15  ;;  %1147 = vmatpush1.bf16.msra.mxu1 %v3176_v16  ;;  %v3217_v43 = vld [vmem:[%s3856_s21 + $0x1a0] ss:$16 sps:$4 sm:$0xff]   ;;  %v3218_v44 = vld [vmem:[%s3856_s21 + $0x1a8] ss:$16 sps:$4 sm:$0xff]   ;;  %v3219_v45 = vld [vmem:[%s3856_s21 + $0x184] ss:$16 sps:$4 sm:$0xff]  }
  0xb3   : > { %955 = vmatprep.subr.bf16.mxu0 %v3177_v17  ;;  %1148 = vmatprep.subr.bf16.mxu1 %v3179_v18  ;;  %v3221_v46 = vld [vmem:[%s3856_s21 + $0x18c] ss:$16 sps:$4 sm:$0xff]   ;;  %v3223_v49 = vld [vmem:[%s3856_s21 + $0x180] ss:$16 sps:$4 sm:$0xff]   ;;  %v3224_v50 = vld [vmem:[%s3856_s21 + $0x188] ss:$16 sps:$4 sm:$0xff]  }
  0xb4   : > { %v446_v47 = vld [vmem:[%s3848_s11 + $0x8] sm:$0xff]  ;;  %v448_v48 = vld [vmem:[%s3848_s11 + $0x18] sm:$0xff]  ;;  %v3225_v52 = vld [vmem:[%s3856_s21 + $0x164] ss:$16 sps:$4 sm:$0xff]   ;;  %p3013_p8 = scmp.ne.s32.totalorder %s3569_s24, 1 }
  0xb5   : > { %v510_v51 = vpack.c.bf16 %v448_v48, %v446_v47  ;;  %v3227_v53 = vld [vmem:[%s3856_s21 + $0x16c] ss:$16 sps:$4 sm:$0xff]   ;;  %v3229_v54 = vld [vmem:[%s3856_s21 + $0x160] ss:$16 sps:$4 sm:$0xff]   ;;  %v3230_v55 = vld [vmem:[%s3856_s21 + $0x168] ss:$16 sps:$4 sm:$0xff]  }
  0xb6   : > { %956 = vmatpush1.bf16.msra.mxu0 %v3181_v19  ;;  %1149 = vmatpush1.bf16.msra.mxu1 %v3182_v20  ;;  %v3231_v56 = vld [vmem:[%s3856_s21 + $0x144] ss:$16 sps:$4 sm:$0xff]   ;;  %v3233_v57 = vld [vmem:[%s3856_s21 + $0x14c] ss:$16 sps:$4 sm:$0xff]   ;;  %v3235_v58 = vld [vmem:[%s3856_s21 + $0x140] ss:$16 sps:$4 sm:$0xff]  }
  0xb7   : > { %957 = vmatprep.subr.bf16.mxu0 %v3183_v21  ;;  %1150 = vmatprep.subr.bf16.mxu1 %v3185_v22  ;;  %v3236_v59 = vld [vmem:[%s3856_s21 + $0x148] ss:$16 sps:$4 sm:$0xff]   ;;  %v3237_v60 = vld [vmem:[%s3856_s21 + $0x124] ss:$16 sps:$4 sm:$0xff]   ;;  %v3239_v61 = vld [vmem:[%s3856_s21 + $0x12c] ss:$16 sps:$4 sm:$0xff]  }
  0xb8   : > { %979 = vmatprep.mubr.bf16.mxu0 %v510_v51  ;;  %1172 = vmatprep.mubr.bf16.mxu1 %v510_v51  ;;  %v3241_v62 = vld [vmem:[%s3856_s21 + $0x120] ss:$16 sps:$4 sm:$0xff]   ;;  %v3242_v63 = vld [vmem:[%s3856_s21 + $0x128] ss:$16 sps:$4 sm:$0xff]   ;;  %v3243_v0 = vld [vmem:[%s3856_s21 + $0x104] ss:$16 sps:$4 sm:$0xff]  }
  0xb9   : > { %v3245_v1 = vld [vmem:[%s3856_s21 + $0x10c] ss:$16 sps:$4 sm:$0xff]   ;;  %v3247_v2 = vld [vmem:[%s3856_s21 + $0x100] ss:$16 sps:$4 sm:$0xff]   ;;  %v3248_v3 = vld [vmem:[%s3856_s21 + $0x108] ss:$16 sps:$4 sm:$0xff]  }
  0xba   : > { %958 = vmatpush1.bf16.msra.mxu0 %v3187_v23  ;;  %1151 = vmatpush1.bf16.msra.mxu1 %v3188_v24  ;;  %v445_v4 = vld [vmem:[%s3848_s11] sm:$0xff]  ;;  %v447_v5 = vld [vmem:[%s3848_s11 + $0x10] sm:$0xff]  ;;  %v450_v6 = vld [vmem:[%s3848_s11 + $0x28] sm:$0xff]  ;;  %s4793_s7 = sld [smem:[#allocation28_spill]] (!%p3013_p8) }
  0xbb   : > { %959 = vmatprep.subr.bf16.mxu0 %v3189_v25  ;;  %1152 = vmatprep.subr.bf16.mxu1 %v3191_v26  ;;  %v452_v7 = vld [vmem:[%s3848_s11 + $0x38] sm:$0xff]  ;;  %v509_v10 = vpack.c.bf16 %v447_v5, %v445_v4  ;;  %v449_v14 = vld [vmem:[%s3848_s11 + $0x20] sm:$0xff]  ;;  %v3257_v15 = vld [vmem:[%s3864_s18 + $0x64] ss:$8 sps:$4 sm:$0xff]  }
  0xbc   : > { %v3251_v8 = vld [vmem:[%s3864_s18 + $0x74] ss:$8 sps:$4 sm:$0xff]   ;;  %v512_v11 = vpack.c.bf16 %v452_v7, %v450_v6  ;;  %v3249_v12 = vld [vmem:[%s3864_s18 + $0x70] ss:$8 sps:$4 sm:$0xff]   ;;  %v3260_v16 = vld [vmem:[%s3864_s18 + $0x164] ss:$8 sps:$4 sm:$0xff]  }
  0xbd   : > { %v3254_v9 = vld [vmem:[%s3864_s18 + $0x174] ss:$8 sps:$4 sm:$0xff]   ;;  %v3252_v13 = vld [vmem:[%s3864_s18 + $0x170] ss:$8 sps:$4 sm:$0xff]   ;;  %v451_v17 = vld [vmem:[%s3848_s11 + $0x30] sm:$0xff] }
  0xbe   : > { %960 = vmatpush1.bf16.msra.mxu0 %v3193_v27  ;;  %1153 = vmatpush1.bf16.msra.mxu1 %v3194_v28  ;;  %v454_v18 = vld [vmem:[%s3848_s11 + $0x48] sm:$0xff]  ;;  %v456_v19 = vld [vmem:[%s3848_s11 + $0x58] sm:$0xff]  ;;  %v511_v24 = vpack.c.bf16 %v451_v17, %v449_v14  ;;  %v453_v28 = vld [vmem:[%s3848_s11 + $0x40] sm:$0xff] }
  0xbf   : > { %961 = vmatprep.subr.bf16.mxu0 %v3195_v29  ;;  %1154 = vmatprep.subr.bf16.mxu1 %v3197_v30  ;;  %v3255_v20 = vld [vmem:[%s3864_s18 + $0x60] ss:$8 sps:$4 sm:$0xff]   ;;  %v3263_v22 = vld [vmem:[%s3864_s18 + $0x54] ss:$8 sps:$4 sm:$0xff]   ;;  %v514_v25 = vpack.c.bf16 %v456_v19, %v454_v18  ;;  %v3261_v26 = vld [vmem:[%s3864_s18 + $0x50] ss:$8 sps:$4 sm:$0xff]  }
  0xc0   : > { %v3258_v21 = vld [vmem:[%s3864_s18 + $0x160] ss:$8 sps:$4 sm:$0xff]   ;;  %v3266_v23 = vld [vmem:[%s3864_s18 + $0x154] ss:$8 sps:$4 sm:$0xff]   ;;  %v3264_v27 = vld [vmem:[%s3864_s18 + $0x150] ss:$8 sps:$4 sm:$0xff]  }
  0xc1   : > { %v3269_v29 = vld [vmem:[%s3864_s18 + $0x44] ss:$8 sps:$4 sm:$0xff]   ;;  %v464_v47 = vld [vmem:[%s3848_s11 + $0x98] sm:$0xff]  ;;  %v3279_v48 = vld [vmem:[%s3864_s18 + $0x20] ss:$8 sps:$4 sm:$0xff]  }
  0xc2   : > { %962 = vmatpush1.bf16.msra.mxu0 %v3199_v31  ;;  %1155 = vmatpush1.bf16.msra.mxu1 %v3200_v32  ;;  %v3272_v30 = vld [vmem:[%s3864_s18 + $0x144] ss:$8 sps:$4 sm:$0xff]   ;;  %v3290_v51 = vld [vmem:[%s3864_s18 + $0x114] ss:$8 sps:$4 sm:$0xff]   ;;  %v3297_v4 = vld [vmem:[%s3864_s18 + $0xf0] ss:$8 sps:$4 sm:$0xff]  }
  0xc3   : > { %963 = vmatprep.subr.bf16.mxu0 %v3201_v33  ;;  %1156 = vmatprep.subr.bf16.mxu1 %v3203_v34  ;;  %v455_v31 = vld [vmem:[%s3848_s11 + $0x50] sm:$0xff]  ;;  %v458_v32 = vld [vmem:[%s3848_s11 + $0x68] sm:$0xff]  ;;  %v460_v33 = vld [vmem:[%s3848_s11 + $0x78] sm:$0xff] }
  0xc4   : > { %v3267_v34 = vld [vmem:[%s3864_s18 + $0x40] ss:$8 sps:$4 sm:$0xff]   ;;  %v3300_v5 = vld [vmem:[%s3864_s18 + $0x1f0] ss:$8 sps:$4 sm:$0xff]   ;;  %v3311_v14 = vld [vmem:[%s3864_s18 + $0xd4] ss:$8 sps:$4 sm:$0xff]  }
  0xc5   : > { %v465_v6 = vld [vmem:[%s3848_s11 + $0xa0] sm:$0xff]  ;;  %v467_v7 = vld [vmem:[%s3848_s11 + $0xb0] sm:$0xff] }
  0xc6   : > { %964 = vmatpush2.bf16.msra.mxu0 %v3205_v35  ;;  %1157 = vmatpush2.bf16.msra.mxu1 %v3206_v36  ;;  %v3270_v35 = vld [vmem:[%s3864_s18 + $0x140] ss:$8 sps:$4 sm:$0xff]   ;;  %v3275_v36 = vld [vmem:[%s3864_s18 + $0x34] ss:$8 sps:$4 sm:$0xff]   ;;  %v3309_v18 = vld [vmem:[%s3864_s18 + $0xd0] ss:$8 sps:$4 sm:$0xff]  }
  0xc7   : > { %965 = vmatprep.subr.bf16.mxu0 %v3207_v37  ;;  %1158 = vmatprep.subr.bf16.mxu1 %v3209_v38  ;;  %v3278_v37 = vld [vmem:[%s3864_s18 + $0x134] ss:$8 sps:$4 sm:$0xff]   ;;  %v513_v38 = vpack.c.bf16 %v455_v31, %v453_v28  ;;  %v3312_v19 = vld [vmem:[%s3864_s18 + $0x1d0] ss:$8 sps:$4 sm:$0xff]  }
  0xc8   : > { %v3323_v28 = vld [vmem:[%s3864_s18 + $0xb4] ss:$8 sps:$4 sm:$0xff]  }
  0xca   : > { %966 = vmatpush2.bf16.msra.mxu0 %v3211_v39  ;;  %1159 = vmatpush2.bf16.msra.mxu1 %v3212_v40  ;;  %v516_v39 = vpack.c.bf16 %v460_v33, %v458_v32  ;;  %v3273_v40 = vld [vmem:[%s3864_s18 + $0x30] ss:$8 sps:$4 sm:$0xff]  }
  0xcb   : > { %967 = vmatprep.subr.bf16.mxu0 %v3213_v41  ;;  %1160 = vmatprep.subr.bf16.mxu1 %v3215_v42  ;;  %v3276_v41 = vld [vmem:[%s3864_s18 + $0x130] ss:$8 sps:$4 sm:$0xff]  }
  0xcc   : > { %v457_v42 = vld [vmem:[%s3848_s11 + $0x60] sm:$0xff] }
  0xcd   : > { %v3321_v32 = vld [vmem:[%s3864_s18 + $0xb0] ss:$8 sps:$4 sm:$0xff]  }
  0xce   : > { %968 = vmatpush2.bf16.msra.mxu0 %v3217_v43  ;;  %1161 = vmatpush2.bf16.msra.mxu1 %v3218_v44  ;;  %v459_v43 = vld [vmem:[%s3848_s11 + $0x70] sm:$0xff]  ;;  %v3324_v33 = vld [vmem:[%s3864_s18 + $0x1b0] ss:$8 sps:$4 sm:$0xff]  }
  0xcf   : > { %969 = vmatprep.subr.bf16.mxu0 %v3219_v45  ;;  %1162 = vmatprep.subr.bf16.mxu1 %v3221_v46  ;;  %v3281_v44 = vld [vmem:[%s3864_s18 + $0x24] ss:$8 sps:$4 sm:$0xff]  }
  0xd0   : > { %v3284_v45 = vld [vmem:[%s3864_s18 + $0x124] ss:$8 sps:$4 sm:$0xff]  }
  0xd1   : > { %v462_v46 = vld [vmem:[%s3848_s11 + $0x88] sm:$0xff] }
  0xd2   : > { %970 = vmatpush2.bf16.msra.mxu0 %v3223_v49  ;;  %1163 = vmatpush2.bf16.msra.mxu1 %v3224_v50  ;;  %v3282_v49 = vld [vmem:[%s3864_s18 + $0x120] ss:$8 sps:$4 sm:$0xff]   ;;  %v3287_v50 = vld [vmem:[%s3864_s18 + $0x14] ss:$8 sps:$4 sm:$0xff]  }
  0xd3   : > { %971 = vmatprep.subr.bf16.mxu0 %v3225_v52  ;;  %1164 = vmatprep.subr.bf16.mxu1 %v3227_v53  ;;  %v515_v52 = vpack.c.bf16 %v459_v43, %v457_v42  ;;  %v518_v53 = vpack.c.bf16 %v464_v47, %v462_v46  ;;  %v3335_v42 = vld [vmem:[%s3864_s18 + $0x94] ss:$8 sps:$4 sm:$0xff]   ;;  %v3333_v46 = vld [vmem:[%s3864_s18 + $0x90] ss:$8 sps:$4 sm:$0xff]  }
  0xd4   : > { %v3338_v43 = vld [vmem:[%s3864_s18 + $0x194] ss:$8 sps:$4 sm:$0xff]   ;;  %v3336_v47 = vld [vmem:[%s3864_s18 + $0x190] ss:$8 sps:$4 sm:$0xff]  }
  0xd6   : > { %972 = vmatpush2.bf16.msra.mxu0 %v3229_v54  ;;  %1165 = vmatpush2.bf16.msra.mxu1 %v3230_v55  ;;  %v3285_v54 = vld [vmem:[%s3864_s18 + $0x10] ss:$8 sps:$4 sm:$0xff]  }
  0xd7   : > { %973 = vmatprep.subr.bf16.mxu0 %v3231_v56  ;;  %1166 = vmatprep.subr.bf16.mxu1 %v3233_v57  ;;  %v3288_v55 = vld [vmem:[%s3864_s18 + $0x110] ss:$8 sps:$4 sm:$0xff]   ;;  %v463_v57 = vld [vmem:[%s3848_s11 + $0x90] sm:$0xff] }
  0xd8   : > { %v461_v56 = vld [vmem:[%s3848_s11 + $0x80] sm:$0xff] }
  0xda   : > { %974 = vmatpush2.bf16.msra.mxu0 %v3235_v58  ;;  %1167 = vmatpush2.bf16.msra.mxu1 %v3236_v59  ;;  %v3293_v58 = vld [vmem:[%s3864_s18 + $0x4] ss:$8 sps:$4 sm:$0xff]  }
  0xdb   : > { %975 = vmatprep.subr.bf16.mxu0 %v3237_v60  ;;  %1168 = vmatprep.subr.bf16.mxu1 %v3239_v61  ;;  %v3296_v59 = vld [vmem:[%s3864_s18 + $0x104] ss:$8 sps:$4 sm:$0xff]   ;;  %v468_v61 = vld [vmem:[%s3848_s11 + $0xb8] sm:$0xff] }
  0xdc   : > { %v466_v60 = vld [vmem:[%s3848_s11 + $0xa8] sm:$0xff] }
  0xde   : > { %976 = vmatpush2.bf16.msra.mxu0 %v3241_v62  ;;  %1169 = vmatpush2.bf16.msra.mxu1 %v3242_v63  ;;  %v3291_v62 = vld [vmem:[%s3864_s18] ss:$8 sps:$4 sm:$0xff]  }
  0xdf   : > { %977 = vmatprep.subr.bf16.mxu0 %v3243_v0  ;;  %1170 = vmatprep.subr.bf16.mxu1 %v3245_v1  ;;  %v3294_v63 = vld [vmem:[%s3864_s18 + $0x100] ss:$8 sps:$4 sm:$0xff]   ;;  %v3299_v0 = vld [vmem:[%s3864_s18 + $0xf4] ss:$8 sps:$4 sm:$0xff]  }
  0xe0   : > { %v3302_v1 = vld [vmem:[%s3864_s18 + $0x1f4] ss:$8 sps:$4 sm:$0xff]  }
  0xe2   : > { %978 = vmatpush2.bf16.msra.mxu0 %v3247_v2  ;;  %1171 = vmatpush2.bf16.msra.mxu1 %v3248_v3  ;;  %v517_v2 = vpack.c.bf16 %v463_v57, %v461_v56  ;;  %v520_v3 = vpack.c.bf16 %v468_v61, %v466_v60  ;;  %v486_v56 = vld [vmem:[%s3848_s11 + $0x148] sm:$0xff]  ;;  %v488_v57 = vld [vmem:[%s3848_s11 + $0x158] sm:$0xff]  ;;  %v485_v60 = vld [vmem:[%s3848_s11 + $0x140] sm:$0xff] }
  0xe3   : > { %1973 = vmatprep.subr.bf16.mxu0 %v3251_v8  ;;  %2166 = vmatprep.subr.bf16.mxu1 %v3254_v9  ;;  %v3305_v8 = vld [vmem:[%s3864_s18 + $0xe4] ss:$8 sps:$4 sm:$0xff]  }
  0xe4   : > { %v3308_v9 = vld [vmem:[%s3864_s18 + $0x1e4] ss:$8 sps:$4 sm:$0xff]  }
  0xe5   : > { %980 = vmatmul.mubr.bf16.vlgmr.msra.gmra.mxu0 %v509_v10  ;;  %1173 = vmatmul.mubr.bf16.vlgmr.msra.gmra.mxu1 %v509_v10  ;;  %v470_v10 = vld [vmem:[%s3848_s11 + $0xc8] sm:$0xff] }
  0xe6   : > { %989 = vmatprep.mubr.bf16.mxu0 %v512_v11  ;;  %1182 = vmatprep.mubr.bf16.mxu1 %v512_v11  ;;  %v472_v11 = vld [vmem:[%s3848_s11 + $0xd8] sm:$0xff]  ;;  %v3341_v61 = vld [vmem:[%s3864_s18 + $0x84] ss:$8 sps:$4 sm:$0xff]  }
  0xe7   : > { %1974 = vmatpush1.bf16.msra.mxu0 %v3249_v12  ;;  %2167 = vmatpush1.bf16.msra.mxu1 %v3252_v13  ;;  %v3303_v12 = vld [vmem:[%s3864_s18 + $0xe0] ss:$8 sps:$4 sm:$0xff]   ;;  %v522_v17 = vpack.c.bf16 %v472_v11, %v470_v10 }
  0xe8   : > { %1975 = vmatprep.subr.bf16.mxu0 %v3257_v15  ;;  %2168 = vmatprep.subr.bf16.mxu1 %v3260_v16  ;;  %v3306_v13 = vld [vmem:[%s3864_s18 + $0x1e0] ss:$8 sps:$4 sm:$0xff]   ;;  %v3314_v15 = vld [vmem:[%s3864_s18 + $0x1d4] ss:$8 sps:$4 sm:$0xff]   ;;  %v519_v16 = vpack.c.bf16 %v467_v7, %v465_v6 }
  0xe9   : > { %v489_v6 = vld [vmem:[%s3848_s11 + $0x160] sm:$0xff]  ;;  %v491_v7 = vld [vmem:[%s3848_s11 + $0x170] sm:$0xff] }
  0xea   : > { %v531_v10 = vpack.c.bf16 %v491_v7, %v489_v6 }
  0xeb   : > { %1976 = vmatpush1.bf16.msra.mxu0 %v3255_v20  ;;  %2169 = vmatpush1.bf16.msra.mxu1 %v3258_v21  ;;  %v3317_v20 = vld [vmem:[%s3864_s18 + $0xc4] ss:$8 sps:$4 sm:$0xff]  }
  0xec   : > { %1977 = vmatprep.subr.bf16.mxu0 %v3263_v22  ;;  %2170 = vmatprep.subr.bf16.mxu1 %v3266_v23  ;;  %v3320_v21 = vld [vmem:[%s3864_s18 + $0x1c4] ss:$8 sps:$4 sm:$0xff]   ;;  %v469_v22 = vld [vmem:[%s3848_s11 + $0xc0] sm:$0xff] }
  0xed   : > { %990 = vmatmul.mubr.bf16.gmra.mxu0 %v511_v24  ;;  %1183 = vmatmul.mubr.bf16.gmra.mxu1 %v511_v24  ;;  %v471_v23 = vld [vmem:[%s3848_s11 + $0xd0] sm:$0xff]  ;;  %v474_v24 = vld [vmem:[%s3848_s11 + $0xe8] sm:$0xff] }
  0xee   : > { %999 = vmatprep.mubr.bf16.mxu0 %v514_v25  ;;  %1192 = vmatprep.mubr.bf16.mxu1 %v514_v25  ;;  %v476_v25 = vld [vmem:[%s3848_s11 + $0xf8] sm:$0xff] }
  0xef   : > { %1978 = vmatpush1.bf16.msra.mxu0 %v3261_v26  ;;  %2171 = vmatpush1.bf16.msra.mxu1 %v3264_v27  ;;  %v3315_v26 = vld [vmem:[%s3864_s18 + $0xc0] ss:$8 sps:$4 sm:$0xff]   ;;  %v524_v31 = vpack.c.bf16 %v476_v25, %v474_v24  ;;  %v501_v24 = vld [vmem:[%s3848_s11 + $0x1c0] sm:$0xff] }
  0xf0   : > { %1979 = vmatprep.subr.bf16.mxu0 %v3269_v29  ;;  %2172 = vmatprep.subr.bf16.mxu1 %v3272_v30  ;;  %v3318_v27 = vld [vmem:[%s3864_s18 + $0x1c0] ss:$8 sps:$4 sm:$0xff]   ;;  %v3326_v29 = vld [vmem:[%s3864_s18 + $0x1b4] ss:$8 sps:$4 sm:$0xff]   ;;  %v521_v30 = vpack.c.bf16 %v471_v23, %v469_v22 }
  0xf1   : > { %v503_v25 = vld [vmem:[%s3848_s11 + $0x1d0] sm:$0xff] }
  0xf3   : > { %1980 = vmatpush1.bf16.msra.mxu0 %v3267_v34  ;;  %2173 = vmatpush1.bf16.msra.mxu1 %v3270_v35  ;;  %v3329_v34 = vld [vmem:[%s3864_s18 + $0xa4] ss:$8 sps:$4 sm:$0xff]  }
  0xf4   : > { %1981 = vmatprep.subr.bf16.mxu0 %v3275_v36  ;;  %2174 = vmatprep.subr.bf16.mxu1 %v3278_v37  ;;  %v3332_v35 = vld [vmem:[%s3864_s18 + $0x1a4] ss:$8 sps:$4 sm:$0xff]   ;;  %v473_v36 = vld [vmem:[%s3848_s11 + $0xe0] sm:$0xff] }
  0xf5   : > { %1000 = vmatmul.mubr.bf16.gmra.mxu0 %v513_v38  ;;  %1193 = vmatmul.mubr.bf16.gmra.mxu1 %v513_v38  ;;  %v475_v37 = vld [vmem:[%s3848_s11 + $0xf0] sm:$0xff]  ;;  %v478_v38 = vld [vmem:[%s3848_s11 + $0x108] sm:$0xff] }
  0xf6   : > { %1009 = vmatprep.mubr.bf16.mxu0 %v516_v39  ;;  %1202 = vmatprep.mubr.bf16.mxu1 %v516_v39  ;;  %v480_v39 = vld [vmem:[%s3848_s11 + $0x118] sm:$0xff] }
  0xf7   : > { %1982 = vmatpush1.bf16.msra.mxu0 %v3273_v40  ;;  %2175 = vmatpush1.bf16.msra.mxu1 %v3276_v41  ;;  %v3327_v40 = vld [vmem:[%s3864_s18 + $0xa0] ss:$8 sps:$4 sm:$0xff]  }
  0xf8   : > { %1983 = vmatprep.subr.bf16.mxu0 %v3281_v44  ;;  %2176 = vmatprep.subr.bf16.mxu1 %v3284_v45  ;;  %v3330_v41 = vld [vmem:[%s3864_s18 + $0x1a0] ss:$8 sps:$4 sm:$0xff]   ;;  %v523_v44 = vpack.c.bf16 %v475_v37, %v473_v36  ;;  %v526_v45 = vpack.c.bf16 %v480_v39, %v478_v38  ;;  %v605_v39 = vld [vmem:[%s3862_s9] sm:$0xf] }
  0xfb   : > { %1984 = vmatpush1.bf16.msra.mxu0 %v3279_v48  ;;  %2177 = vmatpush1.bf16.msra.mxu1 %v3282_v49  ;;  %v477_v48 = vld [vmem:[%s3848_s11 + $0x100] sm:$0xff]  ;;  %v479_v49 = vld [vmem:[%s3848_s11 + $0x110] sm:$0xff] }
  0xfc   : > { %1985 = vmatprep.subr.bf16.mxu0 %v3287_v50  ;;  %2178 = vmatprep.subr.bf16.mxu1 %v3290_v51  ;;  %v482_v50 = vld [vmem:[%s3848_s11 + $0x128] sm:$0xff]  ;;  %v484_v51 = vld [vmem:[%s3848_s11 + $0x138] sm:$0xff] }
  0xfd   : > { %1010 = vmatmul.mubr.bf16.gmra.mxu0 %v515_v52  ;;  %1203 = vmatmul.mubr.bf16.gmra.mxu1 %v515_v52  ;;  %v525_v52 = vpack.c.bf16 %v479_v49, %v477_v48 }
  0xfe   : > { %1019 = vmatprep.mubr.bf16.mxu0 %v518_v53  ;;  %1212 = vmatprep.mubr.bf16.mxu1 %v518_v53  ;;  %v528_v53 = vpack.c.bf16 %v484_v51, %v482_v50 }
  0xff   : > { %1986 = vmatpush1.bf16.msra.mxu0 %v3285_v54  ;;  %2179 = vmatpush1.bf16.msra.mxu1 %v3288_v55  ;;  %v481_v54 = vld [vmem:[%s3848_s11 + $0x120] sm:$0xff]  ;;  %v483_v55 = vld [vmem:[%s3848_s11 + $0x130] sm:$0xff] }
 0x100   : > { %1987 = vmatprep.subr.bf16.mxu0 %v3293_v58  ;;  %2180 = vmatprep.subr.bf16.mxu1 %v3296_v59  ;;  %v527_v58 = vpack.c.bf16 %v483_v55, %v481_v54  ;;  %v530_v59 = vpack.c.bf16 %v488_v57, %v486_v56 }
 0x103   : > { %1988 = vmatpush1.bf16.msra.mxu0 %v3291_v62  ;;  %2181 = vmatpush1.bf16.msra.mxu1 %v3294_v63  ;;  %v3344_v62 = vld [vmem:[%s3864_s18 + $0x184] ss:$8 sps:$4 sm:$0xff]  }
 0x104   : > { %1989 = vmatprep.subr.bf16.mxu0 %v3299_v0  ;;  %2182 = vmatprep.subr.bf16.mxu1 %v3302_v1  ;;  %v487_v63 = vld [vmem:[%s3848_s11 + $0x150] sm:$0xff] }
 0x105   : > { %1020 = vmatmul.mubr.bf16.gmra.mxu0 %v517_v2  ;;  %1213 = vmatmul.mubr.bf16.gmra.mxu1 %v517_v2  ;;  %v3339_v0 = vld [vmem:[%s3864_s18 + $0x80] ss:$8 sps:$4 sm:$0xff]  }
 0x106   : > { %1029 = vmatprep.mubr.bf16.mxu0 %v520_v3  ;;  %1222 = vmatprep.mubr.bf16.mxu1 %v520_v3  ;;  %v3342_v1 = vld [vmem:[%s3864_s18 + $0x180] ss:$8 sps:$4 sm:$0xff]   ;;  %v492_v3 = vld [vmem:[%s3848_s11 + $0x178] sm:$0xff] }
 0x107   : > { %1990 = vmatpush2.bf16.msra.mxu0 %v3297_v4  ;;  %2183 = vmatpush2.bf16.msra.mxu1 %v3300_v5  ;;  %v490_v2 = vld [vmem:[%s3848_s11 + $0x168] sm:$0xff]  ;;  %v529_v4 = vpack.c.bf16 %v487_v63, %v485_v60 }
 0x108   : > { %1991 = vmatprep.subr.bf16.mxu0 %v3305_v8  ;;  %2184 = vmatprep.subr.bf16.mxu1 %v3308_v9  ;;  %v532_v5 = vpack.c.bf16 %v492_v3, %v490_v2  ;;  %v494_v8 = vld [vmem:[%s3848_s11 + $0x188] sm:$0xff]  ;;  %v496_v9 = vld [vmem:[%s3848_s11 + $0x198] sm:$0xff] }
 0x109   : > { %v534_v11 = vpack.c.bf16 %v496_v9, %v494_v8 }
 0x10b   : > { %1992 = vmatpush2.bf16.msra.mxu0 %v3303_v12  ;;  %2185 = vmatpush2.bf16.msra.mxu1 %v3306_v13  ;;  %v493_v12 = vld [vmem:[%s3848_s11 + $0x180] sm:$0xff]  ;;  %v495_v13 = vld [vmem:[%s3848_s11 + $0x190] sm:$0xff] }
 0x10c   : > { %1993 = vmatprep.subr.bf16.mxu0 %v3311_v14  ;;  %2186 = vmatprep.subr.bf16.mxu1 %v3314_v15  ;;  %v498_v14 = vld [vmem:[%s3848_s11 + $0x1a8] sm:$0xff]  ;;  %v500_v15 = vld [vmem:[%s3848_s11 + $0x1b8] sm:$0xff] }
 0x10d   : > { %1030 = vmatmul.mubr.bf16.gmra.mxu0 %v519_v16  ;;  %1223 = vmatmul.mubr.bf16.gmra.mxu1 %v519_v16  ;;  %v533_v16 = vpack.c.bf16 %v495_v13, %v493_v12 }
 0x10e   : > { %1039 = vmatprep.mubr.bf16.mxu0 %v522_v17  ;;  %1232 = vmatprep.mubr.bf16.mxu1 %v522_v17  ;;  %v536_v17 = vpack.c.bf16 %v500_v15, %v498_v14 }
 0x10f   : > { %1994 = vmatpush2.bf16.msra.mxu0 %v3309_v18  ;;  %2187 = vmatpush2.bf16.msra.mxu1 %v3312_v19  ;;  %v497_v18 = vld [vmem:[%s3848_s11 + $0x1a0] sm:$0xff]  ;;  %v499_v19 = vld [vmem:[%s3848_s11 + $0x1b0] sm:$0xff] }
 0x110   : > { %1995 = vmatprep.subr.bf16.mxu0 %v3317_v20  ;;  %2188 = vmatprep.subr.bf16.mxu1 %v3320_v21  ;;  %v502_v20 = vld [vmem:[%s3848_s11 + $0x1c8] sm:$0xff]  ;;  %v504_v21 = vld [vmem:[%s3848_s11 + $0x1d8] sm:$0xff]  ;;  %v535_v22 = vpack.c.bf16 %v499_v19, %v497_v18 }
 0x111   : > { %v538_v23 = vpack.c.bf16 %v504_v21, %v502_v20 }
 0x113   : > { %1996 = vmatpush2.bf16.msra.mxu0 %v3315_v26  ;;  %2189 = vmatpush2.bf16.msra.mxu1 %v3318_v27  ;;  %v506_v26 = vld [vmem:[%s3848_s11 + $0x1e8] sm:$0xff]  ;;  %v508_v27 = vld [vmem:[%s3848_s11 + $0x1f8] sm:$0xff] }
 0x114   : > { %1997 = vmatprep.subr.bf16.mxu0 %v3323_v28  ;;  %2190 = vmatprep.subr.bf16.mxu1 %v3326_v29  ;;  %v537_v28 = vpack.c.bf16 %v503_v25, %v501_v24  ;;  %v540_v29 = vpack.c.bf16 %v508_v27, %v506_v26 }
 0x115   : > { %1040 = vmatmul.mubr.bf16.gmra.mxu0 %v521_v30  ;;  %1233 = vmatmul.mubr.bf16.gmra.mxu1 %v521_v30  ;;  %v505_v30 = vld [vmem:[%s3848_s11 + $0x1e0] sm:$0xff] }
 0x116   : > { %1049 = vmatprep.mubr.bf16.mxu0 %v524_v31  ;;  %1242 = vmatprep.mubr.bf16.mxu1 %v524_v31  ;;  %v507_v31 = vld [vmem:[%s3848_s11 + $0x1f0] sm:$0xff] }
 0x117   : > { %1998 = vmatpush2.bf16.msra.mxu0 %v3321_v32  ;;  %2191 = vmatpush2.bf16.msra.mxu1 %v3324_v33  ;;  %v539_v32 = vpack.c.bf16 %v507_v31, %v505_v30  ;;  %v607_v33 = vlaneseq }
 0x118   : > { %1999 = vmatprep.subr.bf16.mxu0 %v3329_v34  ;;  %2192 = vmatprep.subr.bf16.mxu1 %v3332_v35 }
 0x119   : > { %v4193_v34 = vshrl.u32 %v607_v33, 7 }
 0x11b   : > { %2000 = vmatpush2.bf16.msra.mxu0 %v3327_v40  ;;  %2193 = vmatpush2.bf16.msra.mxu1 %v3330_v41  ;;  %v613_v35 = vsub.s32 1, %v4193_v34  ;;  %v621_v36 = vsub.s32 3, %v4193_v34  ;;  %v609_v37 = vsub.s32 0, %v4193_v34  ;;  %v617_v38 = vsub.s32 2, %v4193_v34 }
 0x11c   : > { %2001 = vmatprep.subr.bf16.mxu0 %v3335_v42  ;;  %2194 = vmatprep.subr.bf16.mxu1 %v3338_v43 }
 0x11d   : > { %1050 = vmatmul.mubr.bf16.gmra.mxu0 %v523_v44  ;;  %1243 = vmatmul.mubr.bf16.gmra.mxu1 %v523_v44  ;;  %v4202_v42 = vrot.slane %v605_v39, %v613_v35  ;;  %v4204_v43 = vrot.slane %v605_v39, %v621_v36  ;;  %v4208_v44 = vrot.slane %v605_v39, %v609_v37 }
 0x11e   : > { %1059 = vmatprep.mubr.bf16.mxu0 %v526_v45  ;;  %1252 = vmatprep.mubr.bf16.mxu1 %v526_v45  ;;  %v4210_v45 = vrot.slane %v605_v39, %v617_v38 }
 0x11f   : > { %2002 = vmatpush2.bf16.msra.mxu0 %v3333_v46  ;;  %2195 = vmatpush2.bf16.msra.mxu1 %v3336_v47 }
 0x120   : > { %2003 = vmatprep.subr.bf16.mxu0 %v3341_v61  ;;  %2196 = vmatprep.subr.bf16.mxu1 %v3344_v62 }
 0x123   : > { %2004 = vmatpush2.bf16.msra.mxu0 %v3339_v0  ;;  %2197 = vmatpush2.bf16.msra.mxu1 %v3342_v1 }
 0x125   : > { %1060 = vmatmul.mubr.bf16.gmra.mxu0 %v525_v52  ;;  %1253 = vmatmul.mubr.bf16.gmra.mxu1 %v525_v52 }
 0x126   : > { %1069 = vmatprep.mubr.bf16.mxu0 %v528_v53  ;;  %1262 = vmatprep.mubr.bf16.mxu1 %v528_v53 }
 0x12d   : > { %1070 = vmatmul.mubr.bf16.gmra.mxu0 %v527_v58  ;;  %1263 = vmatmul.mubr.bf16.gmra.mxu1 %v527_v58 }
 0x12e   : > { %1079 = vmatprep.mubr.bf16.mxu0 %v530_v59  ;;  %1272 = vmatprep.mubr.bf16.mxu1 %v530_v59 }
 0x135   : > { %1080 = vmatmul.mubr.bf16.gmra.mxu0 %v529_v4  ;;  %1273 = vmatmul.mubr.bf16.gmra.mxu1 %v529_v4 }
 0x136   : > { %1089 = vmatprep.mubr.bf16.mxu0 %v532_v5  ;;  %1282 = vmatprep.mubr.bf16.mxu1 %v532_v5 }
 0x13d   : > { %1090 = vmatmul.mubr.bf16.gmra.mxu0 %v531_v10  ;;  %1283 = vmatmul.mubr.bf16.gmra.mxu1 %v531_v10 }
 0x13e   : > { %1099 = vmatprep.mubr.bf16.mxu0 %v534_v11  ;;  %1292 = vmatprep.mubr.bf16.mxu1 %v534_v11 }
 0x145   : > { %1100 = vmatmul.mubr.bf16.gmra.mxu0 %v533_v16  ;;  %1293 = vmatmul.mubr.bf16.gmra.mxu1 %v533_v16 }
 0x146   : > { %1109 = vmatprep.mubr.bf16.mxu0 %v536_v17  ;;  %1302 = vmatprep.mubr.bf16.mxu1 %v536_v17 }
 0x14d   : > { %1110 = vmatmul.mubr.bf16.gmra.mxu0 %v535_v22  ;;  %1303 = vmatmul.mubr.bf16.gmra.mxu1 %v535_v22 }
 0x14e   : > { %1119 = vmatprep.mubr.bf16.mxu0 %v538_v23  ;;  %1312 = vmatprep.mubr.bf16.mxu1 %v538_v23 }
 0x155   : > { %1120 = vmatmul.mubr.bf16.gmra.mxu0 %v537_v28  ;;  %1313 = vmatmul.mubr.bf16.gmra.mxu1 %v537_v28 }
 0x156   : > { %1129 = vmatprep.mubr.bf16.mxu0 %v540_v29  ;;  %1322 = vmatprep.mubr.bf16.mxu1 %v540_v29 }
 0x15d   : > { %1130 = vmatmul.mubr.bf16.gmra.mxu0 %v539_v32  ;;  %1323 = vmatmul.mubr.bf16.gmra.mxu1 %v539_v32 }
 0x1a5   : > { %v981_v40 = vpop.f32.mrf.mxu0  ;;  %v1174_v41 = vpop.f32.mrf.mxu1 }
 0x1a6   : > { %v982_v54 = vadd.f32 %v981_v40, %v4208_v44  ;;  %v1175_v55 = vadd.f32 %v1174_v41, %v4210_v45 }
 0x1a7   : > { %v983_v46 = vpop.f32.mrf.mxu0  ;;  %v1176_v47 = vpop.f32.mrf.mxu1 }
 0x1a8   : > { %v984_v50 = vadd.f32 %v983_v46, %v4202_v42  ;;  %v1177_v51 = vadd.f32 %v1176_v47, %v4204_v43  ;;  %v1333_v4 = vmax.f32 %v982_v54, 0.0  ;;  %v1335_v5 = vmax.f32 %v1175_v55, 0.0 }
 0x1a9   : > { %v985_v48 = vpop.f32.mrf.mxu0  ;;  %v1178_v49 = vpop.f32.mrf.mxu1 }
 0x1aa   : > { %v986_v52 = vadd.f32 %v985_v48, %v4208_v44  ;;  %v1179_v53 = vadd.f32 %v1178_v49, %v4210_v45  ;;  %v1334_v0 = vmax.f32 %v984_v50, 0.0  ;;  %v1336_v1 = vmax.f32 %v1177_v51, 0.0 }
 0x1ab   : > { %v987_v56 = vpop.f32.mrf.mxu0  ;;  %v1180_v57 = vpop.f32.mrf.mxu1 }
 0x1ac   : > { %v988_v58 = vadd.f32 %v987_v56, %v4202_v42  ;;  %v1181_v59 = vadd.f32 %v1180_v57, %v4204_v43  ;;  %v1337_v60 = vmax.f32 %v986_v52, 0.0  ;;  %v1339_v61 = vmax.f32 %v1179_v53, 0.0 }
 0x1ad   : > { %v991_v62 = vpop.f32.mrf.mxu0  ;;  %v1184_v63 = vpop.f32.mrf.mxu1 }
 0x1ae   : > { %v1338_v2 = vmax.f32 %v988_v58, 0.0  ;;  %v1340_v3 = vmax.f32 %v1181_v59, 0.0  ;;  %v1525_v10 = vpack.c.bf16 %v1337_v60, %v1333_v4  ;;  %v1527_v11 = vpack.c.bf16 %v1339_v61, %v1335_v5 }
 0x1af   : > { %v993_v6 = vpop.f32.mrf.mxu0  ;;  %v1186_v7 = vpop.f32.mrf.mxu1  ;;  %v992_v18 = vadd.f32 %v991_v62, %v4208_v44  ;;  %v1185_v19 = vadd.f32 %v1184_v63, %v4210_v45 }
 0x1b0   : > { %v1526_v8 = vpack.c.bf16 %v1338_v2, %v1334_v0  ;;  %v1528_v9 = vpack.c.bf16 %v1340_v3, %v1336_v1  ;;  %v994_v12 = vadd.f32 %v993_v6, %v4202_v42  ;;  %v1187_v15 = vadd.f32 %v1186_v7, %v4204_v43 }
 0x1b1   : > { %v995_v13 = vpop.f32.mrf.mxu0  ;;  %v1188_v14 = vpop.f32.mrf.mxu1  ;;  %v1341_v32 = vmax.f32 %v992_v18, 0.0  ;;  %v1343_v33 = vmax.f32 %v1185_v19, 0.0 }
 0x1b2   : > { %v996_v16 = vadd.f32 %v995_v13, %v4208_v44  ;;  %v1189_v17 = vadd.f32 %v1188_v14, %v4210_v45  ;;  %2005 = vmatprep.mubr.bf16.mxu0 %v1526_v8  ;;  %2198 = vmatprep.mubr.bf16.mxu1 %v1528_v9  ;;  %v1342_v28 = vmax.f32 %v994_v12, 0.0  ;;  %v1344_v29 = vmax.f32 %v1187_v15, 0.0 }
 0x1b3   : > { %v997_v20 = vpop.f32.mrf.mxu0  ;;  %v1190_v21 = vpop.f32.mrf.mxu1  ;;  %2006 = vmatmul.mubr.bf16.vlgmr.msra.gmra.mxu0 %v1525_v10  ;;  %2199 = vmatmul.mubr.bf16.vlgmr.msra.gmra.mxu1 %v1527_v11 }
 0x1b4   : > { %v998_v22 = vadd.f32 %v997_v20, %v4202_v42  ;;  %v1191_v23 = vadd.f32 %v1190_v21, %v4204_v43  ;;  %v1345_v24 = vmax.f32 %v996_v16, 0.0  ;;  %v1347_v25 = vmax.f32 %v1189_v17, 0.0 }
 0x1b5   : > { %v1001_v26 = vpop.f32.mrf.mxu0  ;;  %v1194_v27 = vpop.f32.mrf.mxu1 }
 0x1b6   : > { %v1346_v30 = vmax.f32 %v998_v22, 0.0  ;;  %v1348_v31 = vmax.f32 %v1191_v23, 0.0  ;;  %v1529_v41 = vpack.c.bf16 %v1345_v24, %v1341_v32  ;;  %v1531_v46 = vpack.c.bf16 %v1347_v25, %v1343_v33 }
 0x1b7   : > { %v1003_v36 = vpop.f32.mrf.mxu0  ;;  %v1196_v38 = vpop.f32.mrf.mxu1  ;;  %v1002_v53 = vadd.f32 %v1001_v26, %v4208_v44  ;;  %v1195_v54 = vadd.f32 %v1194_v27, %v4210_v45 }
 0x1b8   : > { %v1530_v39 = vpack.c.bf16 %v1346_v30, %v1342_v28  ;;  %v1532_v40 = vpack.c.bf16 %v1348_v31, %v1344_v29  ;;  %v1004_v47 = vadd.f32 %v1003_v36, %v4202_v42  ;;  %v1197_v50 = vadd.f32 %v1196_v38, %v4204_v43 }
 0x1b9   : > { %v1005_v48 = vpop.f32.mrf.mxu0  ;;  %v1198_v49 = vpop.f32.mrf.mxu1  ;;  %v1349_v3 = vmax.f32 %v1002_v53, 0.0  ;;  %v1351_v4 = vmax.f32 %v1195_v54, 0.0 }
 0x1ba   : > { %v1006_v51 = vadd.f32 %v1005_v48, %v4208_v44  ;;  %v1199_v52 = vadd.f32 %v1198_v49, %v4210_v45  ;;  %2015 = vmatprep.mubr.bf16.mxu0 %v1530_v39  ;;  %2208 = vmatprep.mubr.bf16.mxu1 %v1532_v40  ;;  %v1350_v63 = vmax.f32 %v1004_v47, 0.0  ;;  %v1352_v0 = vmax.f32 %v1197_v50, 0.0 }
 0x1bb   : > { %v1007_v55 = vpop.f32.mrf.mxu0  ;;  %v1200_v56 = vpop.f32.mrf.mxu1  ;;  %2016 = vmatmul.mubr.bf16.gmra.mxu0 %v1529_v41  ;;  %2209 = vmatmul.mubr.bf16.gmra.mxu1 %v1531_v46 }
 0x1bc   : > { %v1008_v57 = vadd.f32 %v1007_v55, %v4202_v42  ;;  %v1201_v58 = vadd.f32 %v1200_v56, %v4204_v43  ;;  %v1353_v59 = vmax.f32 %v1006_v51, 0.0  ;;  %v1355_v60 = vmax.f32 %v1199_v52, 0.0 }
 0x1bd   : > { %v1011_v61 = vpop.f32.mrf.mxu0  ;;  %v1204_v62 = vpop.f32.mrf.mxu1 }
 0x1be   : > { %v1354_v1 = vmax.f32 %v1008_v57, 0.0  ;;  %v1356_v2 = vmax.f32 %v1201_v58, 0.0  ;;  %v1533_v9 = vpack.c.bf16 %v1353_v59, %v1349_v3  ;;  %v1535_v10 = vpack.c.bf16 %v1355_v60, %v1351_v4 }
 0x1bf   : > { %v1013_v5 = vpop.f32.mrf.mxu0  ;;  %v1206_v6 = vpop.f32.mrf.mxu1  ;;  %v1012_v17 = vadd.f32 %v1011_v61, %v4208_v44  ;;  %v1205_v18 = vadd.f32 %v1204_v62, %v4210_v45 }
 0x1c0   : > { %v1534_v7 = vpack.c.bf16 %v1354_v1, %v1350_v63  ;;  %v1536_v8 = vpack.c.bf16 %v1356_v2, %v1352_v0  ;;  %v1014_v11 = vadd.f32 %v1013_v5, %v4202_v42  ;;  %v1207_v14 = vadd.f32 %v1206_v6, %v4204_v43 }
 0x1c1   : > { %v1015_v12 = vpop.f32.mrf.mxu0  ;;  %v1208_v13 = vpop.f32.mrf.mxu1  ;;  %v1357_v31 = vmax.f32 %v1012_v17, 0.0  ;;  %v1359_v32 = vmax.f32 %v1205_v18, 0.0 }
 0x1c2   : > { %v1016_v15 = vadd.f32 %v1015_v12, %v4208_v44  ;;  %v1209_v16 = vadd.f32 %v1208_v13, %v4210_v45  ;;  %2025 = vmatprep.mubr.bf16.mxu0 %v1534_v7  ;;  %2218 = vmatprep.mubr.bf16.mxu1 %v1536_v8  ;;  %v1358_v27 = vmax.f32 %v1014_v11, 0.0  ;;  %v1360_v28 = vmax.f32 %v1207_v14, 0.0 }
 0x1c3   : > { %v1017_v19 = vpop.f32.mrf.mxu0  ;;  %v1210_v20 = vpop.f32.mrf.mxu1  ;;  %2026 = vmatmul.mubr.bf16.gmra.mxu0 %v1533_v9  ;;  %2219 = vmatmul.mubr.bf16.gmra.mxu1 %v1535_v10 }
 0x1c4   : > { %v1018_v21 = vadd.f32 %v1017_v19, %v4202_v42  ;;  %v1211_v22 = vadd.f32 %v1210_v20, %v4204_v43  ;;  %v1361_v23 = vmax.f32 %v1016_v15, 0.0  ;;  %v1363_v24 = vmax.f32 %v1209_v16, 0.0 }
 0x1c5   : > { %v1021_v25 = vpop.f32.mrf.mxu0  ;;  %v1214_v26 = vpop.f32.mrf.mxu1 }
 0x1c6   : > { %v1362_v29 = vmax.f32 %v1018_v21, 0.0  ;;  %v1364_v30 = vmax.f32 %v1211_v22, 0.0  ;;  %v1537_v40 = vpack.c.bf16 %v1361_v23, %v1357_v31  ;;  %v1539_v41 = vpack.c.bf16 %v1363_v24, %v1359_v32 }
 0x1c7   : > { %v1023_v33 = vpop.f32.mrf.mxu0  ;;  %v1216_v36 = vpop.f32.mrf.mxu1  ;;  %v1022_v52 = vadd.f32 %v1021_v25, %v4208_v44  ;;  %v1215_v53 = vadd.f32 %v1214_v26, %v4210_v45 }
 0x1c8   : > { %v1538_v38 = vpack.c.bf16 %v1362_v29, %v1358_v27  ;;  %v1540_v39 = vpack.c.bf16 %v1364_v30, %v1360_v28  ;;  %v1024_v46 = vadd.f32 %v1023_v33, %v4202_v42  ;;  %v1217_v49 = vadd.f32 %v1216_v36, %v4204_v43 }
 0x1c9   : > { %v1025_v47 = vpop.f32.mrf.mxu0  ;;  %v1218_v48 = vpop.f32.mrf.mxu1  ;;  %v1365_v2 = vmax.f32 %v1022_v52, 0.0  ;;  %v1367_v3 = vmax.f32 %v1215_v53, 0.0 }
 0x1ca   : > { %v1026_v50 = vadd.f32 %v1025_v47, %v4208_v44  ;;  %v1219_v51 = vadd.f32 %v1218_v48, %v4210_v45  ;;  %2035 = vmatprep.mubr.bf16.mxu0 %v1538_v38  ;;  %2228 = vmatprep.mubr.bf16.mxu1 %v1540_v39  ;;  %v1366_v62 = vmax.f32 %v1024_v46, 0.0  ;;  %v1368_v63 = vmax.f32 %v1217_v49, 0.0 }
 0x1cb   : > { %v1027_v54 = vpop.f32.mrf.mxu0  ;;  %v1220_v55 = vpop.f32.mrf.mxu1  ;;  %2036 = vmatmul.mubr.bf16.gmra.mxu0 %v1537_v40  ;;  %2229 = vmatmul.mubr.bf16.gmra.mxu1 %v1539_v41 }
 0x1cc   : > { %v1028_v56 = vadd.f32 %v1027_v54, %v4202_v42  ;;  %v1221_v57 = vadd.f32 %v1220_v55, %v4204_v43  ;;  %v1369_v58 = vmax.f32 %v1026_v50, 0.0  ;;  %v1371_v59 = vmax.f32 %v1219_v51, 0.0 }
 0x1cd   : > { %v1031_v60 = vpop.f32.mrf.mxu0  ;;  %v1224_v61 = vpop.f32.mrf.mxu1 }
 0x1ce   : > { %v1370_v0 = vmax.f32 %v1028_v56, 0.0  ;;  %v1372_v1 = vmax.f32 %v1221_v57, 0.0  ;;  %v1541_v8 = vpack.c.bf16 %v1369_v58, %v1365_v2  ;;  %v1543_v9 = vpack.c.bf16 %v1371_v59, %v1367_v3 }
 0x1cf   : > { %v1033_v4 = vpop.f32.mrf.mxu0  ;;  %v1226_v5 = vpop.f32.mrf.mxu1  ;;  %v1032_v16 = vadd.f32 %v1031_v60, %v4208_v44  ;;  %v1225_v17 = vadd.f32 %v1224_v61, %v4210_v45 }
 0x1d0   : > { %v1542_v6 = vpack.c.bf16 %v1370_v0, %v1366_v62  ;;  %v1544_v7 = vpack.c.bf16 %v1372_v1, %v1368_v63  ;;  %v1034_v10 = vadd.f32 %v1033_v4, %v4202_v42  ;;  %v1227_v13 = vadd.f32 %v1226_v5, %v4204_v43 }
 0x1d1   : > { %v1035_v11 = vpop.f32.mrf.mxu0  ;;  %v1228_v12 = vpop.f32.mrf.mxu1  ;;  %v1373_v30 = vmax.f32 %v1032_v16, 0.0  ;;  %v1375_v31 = vmax.f32 %v1225_v17, 0.0 }
 0x1d2   : > { %v1036_v14 = vadd.f32 %v1035_v11, %v4208_v44  ;;  %v1229_v15 = vadd.f32 %v1228_v12, %v4210_v45  ;;  %2045 = vmatprep.mubr.bf16.mxu0 %v1542_v6  ;;  %2238 = vmatprep.mubr.bf16.mxu1 %v1544_v7  ;;  %v1374_v26 = vmax.f32 %v1034_v10, 0.0  ;;  %v1376_v27 = vmax.f32 %v1227_v13, 0.0 }
 0x1d3   : > { %v1037_v18 = vpop.f32.mrf.mxu0  ;;  %v1230_v19 = vpop.f32.mrf.mxu1  ;;  %2046 = vmatmul.mubr.bf16.gmra.mxu0 %v1541_v8  ;;  %2239 = vmatmul.mubr.bf16.gmra.mxu1 %v1543_v9 }
 0x1d4   : > { %v1038_v20 = vadd.f32 %v1037_v18, %v4202_v42  ;;  %v1231_v21 = vadd.f32 %v1230_v19, %v4204_v43  ;;  %v1377_v22 = vmax.f32 %v1036_v14, 0.0  ;;  %v1379_v23 = vmax.f32 %v1229_v15, 0.0 }
 0x1d5   : > { %v1041_v24 = vpop.f32.mrf.mxu0  ;;  %v1234_v25 = vpop.f32.mrf.mxu1 }
 0x1d6   : > { %v1378_v28 = vmax.f32 %v1038_v20, 0.0  ;;  %v1380_v29 = vmax.f32 %v1231_v21, 0.0  ;;  %v1545_v39 = vpack.c.bf16 %v1377_v22, %v1373_v30  ;;  %v1547_v40 = vpack.c.bf16 %v1379_v23, %v1375_v31 }
 0x1d7   : > { %v1043_v32 = vpop.f32.mrf.mxu0  ;;  %v1236_v33 = vpop.f32.mrf.mxu1  ;;  %v1042_v51 = vadd.f32 %v1041_v24, %v4208_v44  ;;  %v1235_v52 = vadd.f32 %v1234_v25, %v4210_v45 }
 0x1d8   : > { %v1546_v36 = vpack.c.bf16 %v1378_v28, %v1374_v26  ;;  %v1548_v38 = vpack.c.bf16 %v1380_v29, %v1376_v27  ;;  %v1044_v41 = vadd.f32 %v1043_v32, %v4202_v42  ;;  %v1237_v48 = vadd.f32 %v1236_v33, %v4204_v43 }
 0x1d9   : > { %v1045_v46 = vpop.f32.mrf.mxu0  ;;  %v1238_v47 = vpop.f32.mrf.mxu1  ;;  %v1381_v1 = vmax.f32 %v1042_v51, 0.0  ;;  %v1383_v2 = vmax.f32 %v1235_v52, 0.0 }
 0x1da   : > { %v1046_v49 = vadd.f32 %v1045_v46, %v4208_v44  ;;  %v1239_v50 = vadd.f32 %v1238_v47, %v4210_v45  ;;  %2055 = vmatprep.mubr.bf16.mxu0 %v1546_v36  ;;  %2248 = vmatprep.mubr.bf16.mxu1 %v1548_v38  ;;  %v1382_v61 = vmax.f32 %v1044_v41, 0.0  ;;  %v1384_v62 = vmax.f32 %v1237_v48, 0.0 }
 0x1db   : > { %v1047_v53 = vpop.f32.mrf.mxu0  ;;  %v1240_v54 = vpop.f32.mrf.mxu1  ;;  %2056 = vmatmul.mubr.bf16.gmra.mxu0 %v1545_v39  ;;  %2249 = vmatmul.mubr.bf16.gmra.mxu1 %v1547_v40 }
 0x1dc   : > { %v1048_v55 = vadd.f32 %v1047_v53, %v4202_v42  ;;  %v1241_v56 = vadd.f32 %v1240_v54, %v4204_v43  ;;  %v1385_v57 = vmax.f32 %v1046_v49, 0.0  ;;  %v1387_v58 = vmax.f32 %v1239_v50, 0.0 }
 0x1dd   : > { %v1051_v59 = vpop.f32.mrf.mxu0  ;;  %v1244_v60 = vpop.f32.mrf.mxu1 }
 0x1de   : > { %v1386_v63 = vmax.f32 %v1048_v55, 0.0  ;;  %v1388_v0 = vmax.f32 %v1241_v56, 0.0  ;;  %v1549_v7 = vpack.c.bf16 %v1385_v57, %v1381_v1  ;;  %v1551_v8 = vpack.c.bf16 %v1387_v58, %v1383_v2 }
 0x1df   : > { %v1053_v3 = vpop.f32.mrf.mxu0  ;;  %v1246_v4 = vpop.f32.mrf.mxu1  ;;  %v1052_v15 = vadd.f32 %v1051_v59, %v4208_v44  ;;  %v1245_v16 = vadd.f32 %v1244_v60, %v4210_v45 }
 0x1e0   : > { %v1550_v5 = vpack.c.bf16 %v1386_v63, %v1382_v61  ;;  %v1552_v6 = vpack.c.bf16 %v1388_v0, %v1384_v62  ;;  %v1054_v9 = vadd.f32 %v1053_v3, %v4202_v42  ;;  %v1247_v12 = vadd.f32 %v1246_v4, %v4204_v43 }
 0x1e1   : > { %v1055_v10 = vpop.f32.mrf.mxu0  ;;  %v1248_v11 = vpop.f32.mrf.mxu1  ;;  %v1389_v29 = vmax.f32 %v1052_v15, 0.0  ;;  %v1391_v30 = vmax.f32 %v1245_v16, 0.0 }
 0x1e2   : > { %v1056_v13 = vadd.f32 %v1055_v10, %v4208_v44  ;;  %v1249_v14 = vadd.f32 %v1248_v11, %v4210_v45  ;;  %2065 = vmatprep.mubr.bf16.mxu0 %v1550_v5  ;;  %2258 = vmatprep.mubr.bf16.mxu1 %v1552_v6  ;;  %v1390_v25 = vmax.f32 %v1054_v9, 0.0  ;;  %v1392_v26 = vmax.f32 %v1247_v12, 0.0 }
 0x1e3   : > { %v1057_v17 = vpop.f32.mrf.mxu0  ;;  %v1250_v18 = vpop.f32.mrf.mxu1  ;;  %2066 = vmatmul.mubr.bf16.gmra.mxu0 %v1549_v7  ;;  %2259 = vmatmul.mubr.bf16.gmra.mxu1 %v1551_v8 }
 0x1e4   : > { %v1058_v19 = vadd.f32 %v1057_v17, %v4202_v42  ;;  %v1251_v20 = vadd.f32 %v1250_v18, %v4204_v43  ;;  %v1393_v21 = vmax.f32 %v1056_v13, 0.0  ;;  %v1395_v22 = vmax.f32 %v1249_v14, 0.0 }
 0x1e5   : > { %v1061_v23 = vpop.f32.mrf.mxu0  ;;  %v1254_v24 = vpop.f32.mrf.mxu1 }
 0x1e6   : > { %v1394_v27 = vmax.f32 %v1058_v19, 0.0  ;;  %v1396_v28 = vmax.f32 %v1251_v20, 0.0  ;;  %v1553_v38 = vpack.c.bf16 %v1393_v21, %v1389_v29  ;;  %v1555_v39 = vpack.c.bf16 %v1395_v22, %v1391_v30 }
 0x1e7   : > { %v1063_v31 = vpop.f32.mrf.mxu0  ;;  %v1256_v32 = vpop.f32.mrf.mxu1  ;;  %v1062_v50 = vadd.f32 %v1061_v23, %v4208_v44  ;;  %v1255_v51 = vadd.f32 %v1254_v24, %v4210_v45 }
 0x1e8   : > { %v1554_v33 = vpack.c.bf16 %v1394_v27, %v1390_v25  ;;  %v1556_v36 = vpack.c.bf16 %v1396_v28, %v1392_v26  ;;  %v1064_v40 = vadd.f32 %v1063_v31, %v4202_v42  ;;  %v1257_v47 = vadd.f32 %v1256_v32, %v4204_v43 }
 0x1e9   : > { %v1065_v41 = vpop.f32.mrf.mxu0  ;;  %v1258_v46 = vpop.f32.mrf.mxu1  ;;  %v1397_v0 = vmax.f32 %v1062_v50, 0.0  ;;  %v1399_v1 = vmax.f32 %v1255_v51, 0.0 }
 0x1ea   : > { %v1066_v48 = vadd.f32 %v1065_v41, %v4208_v44  ;;  %v1259_v49 = vadd.f32 %v1258_v46, %v4210_v45  ;;  %2075 = vmatprep.mubr.bf16.mxu0 %v1554_v33  ;;  %2268 = vmatprep.mubr.bf16.mxu1 %v1556_v36  ;;  %v1398_v60 = vmax.f32 %v1064_v40, 0.0  ;;  %v1400_v61 = vmax.f32 %v1257_v47, 0.0 }
 0x1eb   : > { %v1067_v52 = vpop.f32.mrf.mxu0  ;;  %v1260_v53 = vpop.f32.mrf.mxu1  ;;  %2076 = vmatmul.mubr.bf16.gmra.mxu0 %v1553_v38  ;;  %2269 = vmatmul.mubr.bf16.gmra.mxu1 %v1555_v39 }
 0x1ec   : > { %v1068_v54 = vadd.f32 %v1067_v52, %v4202_v42  ;;  %v1261_v55 = vadd.f32 %v1260_v53, %v4204_v43  ;;  %v1401_v56 = vmax.f32 %v1066_v48, 0.0  ;;  %v1403_v57 = vmax.f32 %v1259_v49, 0.0 }
 0x1ed   : > { %v1071_v58 = vpop.f32.mrf.mxu0  ;;  %v1264_v59 = vpop.f32.mrf.mxu1 }
 0x1ee   : > { %v1402_v62 = vmax.f32 %v1068_v54, 0.0  ;;  %v1404_v63 = vmax.f32 %v1261_v55, 0.0  ;;  %v1557_v6 = vpack.c.bf16 %v1401_v56, %v1397_v0  ;;  %v1559_v7 = vpack.c.bf16 %v1403_v57, %v1399_v1 }
 0x1ef   : > { %v1073_v2 = vpop.f32.mrf.mxu0  ;;  %v1266_v3 = vpop.f32.mrf.mxu1  ;;  %v1072_v14 = vadd.f32 %v1071_v58, %v4208_v44  ;;  %v1265_v15 = vadd.f32 %v1264_v59, %v4210_v45 }
 0x1f0   : > { %v1558_v4 = vpack.c.bf16 %v1402_v62, %v1398_v60  ;;  %v1560_v5 = vpack.c.bf16 %v1404_v63, %v1400_v61  ;;  %v1074_v8 = vadd.f32 %v1073_v2, %v4202_v42  ;;  %v1267_v11 = vadd.f32 %v1266_v3, %v4204_v43 }
 0x1f1   : > { %v1075_v9 = vpop.f32.mrf.mxu0  ;;  %v1268_v10 = vpop.f32.mrf.mxu1  ;;  %v1405_v28 = vmax.f32 %v1072_v14, 0.0  ;;  %v1407_v29 = vmax.f32 %v1265_v15, 0.0 }
 0x1f2   : > { %v1076_v12 = vadd.f32 %v1075_v9, %v4208_v44  ;;  %v1269_v13 = vadd.f32 %v1268_v10, %v4210_v45  ;;  %2085 = vmatprep.mubr.bf16.mxu0 %v1558_v4  ;;  %2278 = vmatprep.mubr.bf16.mxu1 %v1560_v5  ;;  %v1406_v24 = vmax.f32 %v1074_v8, 0.0  ;;  %v1408_v25 = vmax.f32 %v1267_v11, 0.0 }
 0x1f3   : > { %v1077_v16 = vpop.f32.mrf.mxu0  ;;  %v1270_v17 = vpop.f32.mrf.mxu1  ;;  %2086 = vmatmul.mubr.bf16.gmra.mxu0 %v1557_v6  ;;  %2279 = vmatmul.mubr.bf16.gmra.mxu1 %v1559_v7 }
 0x1f4   : > { %v1078_v18 = vadd.f32 %v1077_v16, %v4202_v42  ;;  %v1271_v19 = vadd.f32 %v1270_v17, %v4204_v43  ;;  %v1409_v20 = vmax.f32 %v1076_v12, 0.0  ;;  %v1411_v21 = vmax.f32 %v1269_v13, 0.0 }
 0x1f5   : > { %v1081_v22 = vpop.f32.mrf.mxu0  ;;  %v1274_v23 = vpop.f32.mrf.mxu1 }
 0x1f6   : > { %v1410_v26 = vmax.f32 %v1078_v18, 0.0  ;;  %v1412_v27 = vmax.f32 %v1271_v19, 0.0  ;;  %v1561_v36 = vpack.c.bf16 %v1409_v20, %v1405_v28  ;;  %v1563_v38 = vpack.c.bf16 %v1411_v21, %v1407_v29 }
 0x1f7   : > { %v1083_v30 = vpop.f32.mrf.mxu0  ;;  %v1276_v31 = vpop.f32.mrf.mxu1  ;;  %v1082_v49 = vadd.f32 %v1081_v22, %v4208_v44  ;;  %v1275_v50 = vadd.f32 %v1274_v23, %v4210_v45 }
 0x1f8   : > { %v1562_v32 = vpack.c.bf16 %v1410_v26, %v1406_v24  ;;  %v1564_v33 = vpack.c.bf16 %v1412_v27, %v1408_v25  ;;  %v1084_v39 = vadd.f32 %v1083_v30, %v4202_v42  ;;  %v1277_v46 = vadd.f32 %v1276_v31, %v4204_v43 }
 0x1f9   : > { %v1085_v40 = vpop.f32.mrf.mxu0  ;;  %v1278_v41 = vpop.f32.mrf.mxu1  ;;  %v1413_v63 = vmax.f32 %v1082_v49, 0.0  ;;  %v1415_v0 = vmax.f32 %v1275_v50, 0.0 }
 0x1fa   : > { %v1086_v47 = vadd.f32 %v1085_v40, %v4208_v44  ;;  %v1279_v48 = vadd.f32 %v1278_v41, %v4210_v45  ;;  %2095 = vmatprep.mubr.bf16.mxu0 %v1562_v32  ;;  %2288 = vmatprep.mubr.bf16.mxu1 %v1564_v33  ;;  %v1414_v59 = vmax.f32 %v1084_v39, 0.0  ;;  %v1416_v60 = vmax.f32 %v1277_v46, 0.0 }
 0x1fb   : > { %v1087_v51 = vpop.f32.mrf.mxu0  ;;  %v1280_v52 = vpop.f32.mrf.mxu1  ;;  %2096 = vmatmul.mubr.bf16.gmra.mxu0 %v1561_v36  ;;  %2289 = vmatmul.mubr.bf16.gmra.mxu1 %v1563_v38 }
 0x1fc   : > { %v1088_v53 = vadd.f32 %v1087_v51, %v4202_v42  ;;  %v1281_v54 = vadd.f32 %v1280_v52, %v4204_v43  ;;  %v1417_v55 = vmax.f32 %v1086_v47, 0.0  ;;  %v1419_v56 = vmax.f32 %v1279_v48, 0.0 }
 0x1fd   : > { %v1091_v57 = vpop.f32.mrf.mxu0  ;;  %v1284_v58 = vpop.f32.mrf.mxu1 }
 0x1fe   : > { %v1418_v61 = vmax.f32 %v1088_v53, 0.0  ;;  %v1420_v62 = vmax.f32 %v1281_v54, 0.0  ;;  %v1565_v5 = vpack.c.bf16 %v1417_v55, %v1413_v63  ;;  %v1567_v6 = vpack.c.bf16 %v1419_v56, %v1415_v0 }
 0x1ff   : > { %v1093_v1 = vpop.f32.mrf.mxu0  ;;  %v1286_v2 = vpop.f32.mrf.mxu1  ;;  %v1092_v13 = vadd.f32 %v1091_v57, %v4208_v44  ;;  %v1285_v14 = vadd.f32 %v1284_v58, %v4210_v45 }
 0x200   : > { %v1566_v3 = vpack.c.bf16 %v1418_v61, %v1414_v59  ;;  %v1568_v4 = vpack.c.bf16 %v1420_v62, %v1416_v60  ;;  %v1094_v7 = vadd.f32 %v1093_v1, %v4202_v42  ;;  %v1287_v10 = vadd.f32 %v1286_v2, %v4204_v43 }
 0x201   : > { %v1095_v8 = vpop.f32.mrf.mxu0  ;;  %v1288_v9 = vpop.f32.mrf.mxu1  ;;  %v1421_v27 = vmax.f32 %v1092_v13, 0.0  ;;  %v1423_v28 = vmax.f32 %v1285_v14, 0.0 }
 0x202   : > { %v1096_v11 = vadd.f32 %v1095_v8, %v4208_v44  ;;  %v1289_v12 = vadd.f32 %v1288_v9, %v4210_v45  ;;  %2105 = vmatprep.mubr.bf16.mxu0 %v1566_v3  ;;  %2298 = vmatprep.mubr.bf16.mxu1 %v1568_v4  ;;  %v1422_v23 = vmax.f32 %v1094_v7, 0.0  ;;  %v1424_v24 = vmax.f32 %v1287_v10, 0.0 }
 0x203   : > { %v1097_v15 = vpop.f32.mrf.mxu0  ;;  %v1290_v16 = vpop.f32.mrf.mxu1  ;;  %2106 = vmatmul.mubr.bf16.gmra.mxu0 %v1565_v5  ;;  %2299 = vmatmul.mubr.bf16.gmra.mxu1 %v1567_v6 }
 0x204   : > { %v1098_v17 = vadd.f32 %v1097_v15, %v4202_v42  ;;  %v1291_v18 = vadd.f32 %v1290_v16, %v4204_v43  ;;  %v1425_v19 = vmax.f32 %v1096_v11, 0.0  ;;  %v1427_v20 = vmax.f32 %v1289_v12, 0.0 }
 0x205   : > { %v1101_v21 = vpop.f32.mrf.mxu0  ;;  %v1294_v22 = vpop.f32.mrf.mxu1 }
 0x206   : > { %v1426_v25 = vmax.f32 %v1098_v17, 0.0  ;;  %v1428_v26 = vmax.f32 %v1291_v18, 0.0  ;;  %v1569_v33 = vpack.c.bf16 %v1425_v19, %v1421_v27  ;;  %v1571_v36 = vpack.c.bf16 %v1427_v20, %v1423_v28 }
 0x207   : > { %v1103_v29 = vpop.f32.mrf.mxu0  ;;  %v1296_v30 = vpop.f32.mrf.mxu1  ;;  %v1102_v48 = vadd.f32 %v1101_v21, %v4208_v44  ;;  %v1295_v49 = vadd.f32 %v1294_v22, %v4210_v45 }
 0x208   : > { %v1570_v31 = vpack.c.bf16 %v1426_v25, %v1422_v23  ;;  %v1572_v32 = vpack.c.bf16 %v1428_v26, %v1424_v24  ;;  %v1104_v38 = vadd.f32 %v1103_v29, %v4202_v42  ;;  %v1297_v41 = vadd.f32 %v1296_v30, %v4204_v43 }
 0x209   : > { %v1105_v39 = vpop.f32.mrf.mxu0  ;;  %v1298_v40 = vpop.f32.mrf.mxu1  ;;  %v1429_v62 = vmax.f32 %v1102_v48, 0.0  ;;  %v1431_v63 = vmax.f32 %v1295_v49, 0.0 }
 0x20a   : > { %v1106_v46 = vadd.f32 %v1105_v39, %v4208_v44  ;;  %v1299_v47 = vadd.f32 %v1298_v40, %v4210_v45  ;;  %2115 = vmatprep.mubr.bf16.mxu0 %v1570_v31  ;;  %2308 = vmatprep.mubr.bf16.mxu1 %v1572_v32  ;;  %v1430_v58 = vmax.f32 %v1104_v38, 0.0  ;;  %v1432_v59 = vmax.f32 %v1297_v41, 0.0 }
 0x20b   : > { %v1107_v50 = vpop.f32.mrf.mxu0  ;;  %v1300_v51 = vpop.f32.mrf.mxu1  ;;  %2116 = vmatmul.mubr.bf16.gmra.mxu0 %v1569_v33  ;;  %2309 = vmatmul.mubr.bf16.gmra.mxu1 %v1571_v36 }
 0x20c   : > { %v1108_v52 = vadd.f32 %v1107_v50, %v4202_v42  ;;  %v1301_v53 = vadd.f32 %v1300_v51, %v4204_v43  ;;  %v1433_v54 = vmax.f32 %v1106_v46, 0.0  ;;  %v1435_v55 = vmax.f32 %v1299_v47, 0.0 }
 0x20d   : > { %v1111_v56 = vpop.f32.mrf.mxu0  ;;  %v1304_v57 = vpop.f32.mrf.mxu1 }
 0x20e   : > { %v1434_v60 = vmax.f32 %v1108_v52, 0.0  ;;  %v1436_v61 = vmax.f32 %v1301_v53, 0.0  ;;  %v1573_v4 = vpack.c.bf16 %v1433_v54, %v1429_v62  ;;  %v1575_v5 = vpack.c.bf16 %v1435_v55, %v1431_v63 }
 0x20f   : > { %v1113_v0 = vpop.f32.mrf.mxu0  ;;  %v1306_v1 = vpop.f32.mrf.mxu1  ;;  %v1112_v12 = vadd.f32 %v1111_v56, %v4208_v44  ;;  %v1305_v13 = vadd.f32 %v1304_v57, %v4210_v45 }
 0x210   : > { %v1574_v2 = vpack.c.bf16 %v1434_v60, %v1430_v58  ;;  %v1576_v3 = vpack.c.bf16 %v1436_v61, %v1432_v59  ;;  %v1114_v6 = vadd.f32 %v1113_v0, %v4202_v42  ;;  %v1307_v9 = vadd.f32 %v1306_v1, %v4204_v43 }
 0x211   : > { %v1115_v7 = vpop.f32.mrf.mxu0  ;;  %v1308_v8 = vpop.f32.mrf.mxu1  ;;  %v1437_v26 = vmax.f32 %v1112_v12, 0.0  ;;  %v1439_v27 = vmax.f32 %v1305_v13, 0.0 }
 0x212   : > { %v1116_v10 = vadd.f32 %v1115_v7, %v4208_v44  ;;  %v1309_v11 = vadd.f32 %v1308_v8, %v4210_v45  ;;  %2125 = vmatprep.mubr.bf16.mxu0 %v1574_v2  ;;  %2318 = vmatprep.mubr.bf16.mxu1 %v1576_v3  ;;  %v1438_v22 = vmax.f32 %v1114_v6, 0.0  ;;  %v1440_v23 = vmax.f32 %v1307_v9, 0.0 }
 0x213   : > { %v1117_v14 = vpop.f32.mrf.mxu0  ;;  %v1310_v15 = vpop.f32.mrf.mxu1  ;;  %2126 = vmatmul.mubr.bf16.gmra.mxu0 %v1573_v4  ;;  %2319 = vmatmul.mubr.bf16.gmra.mxu1 %v1575_v5 }
 0x214   : > { %v1118_v16 = vadd.f32 %v1117_v14, %v4202_v42  ;;  %v1311_v17 = vadd.f32 %v1310_v15, %v4204_v43  ;;  %v1441_v18 = vmax.f32 %v1116_v10, 0.0  ;;  %v1443_v19 = vmax.f32 %v1309_v11, 0.0 }
 0x215   : > { %v1121_v20 = vpop.f32.mrf.mxu0  ;;  %v1314_v21 = vpop.f32.mrf.mxu1 }
 0x216   : > { %v1442_v24 = vmax.f32 %v1118_v16, 0.0  ;;  %v1444_v25 = vmax.f32 %v1311_v17, 0.0  ;;  %v1577_v32 = vpack.c.bf16 %v1441_v18, %v1437_v26  ;;  %v1579_v33 = vpack.c.bf16 %v1443_v19, %v1439_v27 }
 0x217   : > { %v1123_v28 = vpop.f32.mrf.mxu0  ;;  %v1316_v29 = vpop.f32.mrf.mxu1  ;;  %v1122_v47 = vadd.f32 %v1121_v20, %v4208_v44  ;;  %v1315_v48 = vadd.f32 %v1314_v21, %v4210_v45 }
 0x218   : > { %v1578_v30 = vpack.c.bf16 %v1442_v24, %v1438_v22  ;;  %v1580_v31 = vpack.c.bf16 %v1444_v25, %v1440_v23  ;;  %v1124_v36 = vadd.f32 %v1123_v28, %v4202_v42  ;;  %v1317_v40 = vadd.f32 %v1316_v29, %v4204_v43 }
 0x219   : > { %v1125_v38 = vpop.f32.mrf.mxu0  ;;  %v1318_v39 = vpop.f32.mrf.mxu1  ;;  %v1445_v61 = vmax.f32 %v1122_v47, 0.0  ;;  %v1447_v62 = vmax.f32 %v1315_v48, 0.0  ;;  %v1464_v47 = vld [vmem:[%s3870_s17 + $0x18] sm:$0xff] }
 0x21a   : > { %v1126_v41 = vadd.f32 %v1125_v38, %v4208_v44  ;;  %v1319_v46 = vadd.f32 %v1318_v39, %v4210_v45  ;;  %2135 = vmatprep.mubr.bf16.mxu0 %v1578_v30  ;;  %2328 = vmatprep.mubr.bf16.mxu1 %v1580_v31  ;;  %v1446_v57 = vmax.f32 %v1124_v36, 0.0  ;;  %v1448_v58 = vmax.f32 %v1317_v40, 0.0  ;;  %v1462_v30 = vld [vmem:[%s3870_s17 + $0x8] sm:$0xff]  ;;  %v1463_v38 = vld [vmem:[%s3870_s17 + $0x10] sm:$0xff] }
 0x21b   : > { %v1127_v49 = vpop.f32.mrf.mxu0  ;;  %v1320_v50 = vpop.f32.mrf.mxu1  ;;  %2136 = vmatmul.mubr.bf16.gmra.mxu0 %v1577_v32  ;;  %2329 = vmatmul.mubr.bf16.gmra.mxu1 %v1579_v33 }
 0x21c   : > { %v1128_v51 = vadd.f32 %v1127_v49, %v4202_v42  ;;  %v1321_v52 = vadd.f32 %v1320_v50, %v4204_v43  ;;  %v1449_v53 = vmax.f32 %v1126_v41, 0.0  ;;  %v1451_v54 = vmax.f32 %v1319_v46, 0.0 }
 0x21d   : > { %v1131_v55 = vpop.f32.mrf.mxu0  ;;  %v1324_v56 = vpop.f32.mrf.mxu1 }
 0x21e   : > { %v1450_v59 = vmax.f32 %v1128_v51, 0.0  ;;  %v1452_v60 = vmax.f32 %v1321_v52, 0.0  ;;  %v1581_v3 = vpack.c.bf16 %v1449_v53, %v1445_v61  ;;  %v1583_v4 = vpack.c.bf16 %v1451_v54, %v1447_v62  ;;  %v1465_v52 = vld [vmem:[%s3870_s17 + $0x20] sm:$0xff]  ;;  %v1467_v62 = vld [vmem:[%s3870_s17 + $0x30] sm:$0xff] }
 0x21f   : > { %v1133_v63 = vpop.f32.mrf.mxu0  ;;  %v1326_v0 = vpop.f32.mrf.mxu1  ;;  %v1132_v11 = vadd.f32 %v1131_v55, %v4208_v44  ;;  %v1325_v12 = vadd.f32 %v1324_v56, %v4210_v45 }
 0x220   : > { %v1582_v1 = vpack.c.bf16 %v1450_v59, %v1446_v57  ;;  %v1584_v2 = vpack.c.bf16 %v1452_v60, %v1448_v58  ;;  %v1134_v5 = vadd.f32 %v1133_v63, %v4202_v42  ;;  %v1327_v8 = vadd.f32 %v1326_v0, %v4204_v43  ;;  %v1466_v57 = vld [vmem:[%s3870_s17 + $0x28] sm:$0xff] }
 0x221   : > { %v1135_v6 = vpop.f32.mrf.mxu0  ;;  %v1328_v7 = vpop.f32.mrf.mxu1  ;;  %v1453_v23 = vmax.f32 %v1132_v11, 0.0 }
 0x222   : > { %v1136_v9 = vadd.f32 %v1135_v6, %v4208_v44  ;;  %v1329_v10 = vadd.f32 %v1328_v7, %v4210_v45  ;;  %2145 = vmatprep.mubr.bf16.mxu0 %v1582_v1  ;;  %2338 = vmatprep.mubr.bf16.mxu1 %v1584_v2  ;;  %v1454_v19 = vmax.f32 %v1134_v5, 0.0  ;;  %v1456_v20 = vmax.f32 %v1327_v8, 0.0  ;;  %v1469_v8 = vld [vmem:[%s3870_s17 + $0x40] sm:$0xff] }
 0x223   : > { %v1137_v13 = vpop.f32.mrf.mxu0  ;;  %v1330_v14 = vpop.f32.mrf.mxu1  ;;  %2146 = vmatmul.mubr.bf16.gmra.mxu0 %v1581_v3  ;;  %2339 = vmatmul.mubr.bf16.gmra.mxu1 %v1583_v4  ;;  %v1455_v44 = vmax.f32 %v1325_v12, 0.0  ;;  %v1468_v3 = vld [vmem:[%s3870_s17 + $0x38] sm:$0xff] }
 0x224   : > { %v1138_v15 = vadd.f32 %v1137_v13, %v4202_v42  ;;  %v1331_v16 = vadd.f32 %v1330_v14, %v4204_v43  ;;  %v1457_v17 = vmax.f32 %v1136_v9, 0.0  ;;  %v1459_v18 = vmax.f32 %v1329_v10, 0.0  ;;  %v1461_v43 = vld [vmem:[%s3870_s17] sm:$0xff]  ;;  %v1470_v13 = vld [vmem:[%s3870_s17 + $0x48] sm:$0xff] }
 0x226   : > { %v1458_v21 = vmax.f32 %v1138_v15, 0.0  ;;  %v1460_v22 = vmax.f32 %v1331_v16, 0.0  ;;  %v1585_v25 = vpack.c.bf16 %v1457_v17, %v1453_v23  ;;  %v1587_v26 = vpack.c.bf16 %v1459_v18, %v1455_v44  ;;  %v1471_v18 = vld [vmem:[%s3870_s17 + $0x50] sm:$0xff]  ;;  %v1472_v23 = vld [vmem:[%s3870_s17 + $0x58] sm:$0xff] }
 0x228   : > { %v1586_v24 = vpack.c.bf16 %v1458_v21, %v1454_v19  ;;  %v1588_v45 = vpack.c.bf16 %v1460_v22, %v1456_v20 }
 0x22a   : > { %2155 = vmatprep.mubr.bf16.mxu0 %v1586_v24  ;;  %2348 = vmatprep.mubr.bf16.mxu1 %v1588_v45 }
 0x22b   : > { %2156 = vmatmul.mubr.bf16.gmra.mxu0 %v1585_v25  ;;  %2349 = vmatmul.mubr.bf16.gmra.mxu1 %v1587_v26  ;;  %v1473_v26 = vld [vmem:[%s3870_s17 + $0x60] sm:$0xff] }
 0x273   : > { %v2007_v42 = vpop.f32.mrf.mxu0  ;;  %v2200_v27 = vpop.f32.mrf.mxu1 }
 0x274   : > { %v2201_v28 = vadd.f32 %v2200_v27, %v2007_v42 }
 0x275   : > { %v2009_v29 = vpop.f32.mrf.mxu0  ;;  %v2202_v31 = vpop.f32.mrf.mxu1 }
 0x276   : > { %v2359_v32 = vadd.f32 %v2201_v28, %v1461_v43  ;;  %v2203_v33 = vadd.f32 %v2202_v31, %v2009_v29  ;;  %v1474_v29 = vld [vmem:[%s3870_s17 + $0x68] sm:$0xff] }
 0x277   : > { %v2011_v36 = vpop.f32.mrf.mxu0  ;;  %v2204_v39 = vpop.f32.mrf.mxu1 }
 0x278   : > { %2423 = vst [vmem:[%s3870_s17] sm:$0xff] %v2359_v32  ;;  %v2360_v40 = vadd.f32 %v2203_v33, %v1462_v30  ;;  %v2205_v41 = vadd.f32 %v2204_v39, %v2011_v36  ;;  %v1475_v36 = vld [vmem:[%s3870_s17 + $0x70] sm:$0xff] }
 0x279   : > { %v2013_v46 = vpop.f32.mrf.mxu0  ;;  %v2206_v48 = vpop.f32.mrf.mxu1 }
 0x27a   : > { %2424 = vst [vmem:[%s3870_s17 + $0x8] sm:$0xff] %v2360_v40  ;;  %v2361_v49 = vadd.f32 %v2205_v41, %v1463_v38  ;;  %v2207_v50 = vadd.f32 %v2206_v48, %v2013_v46  ;;  %v1476_v46 = vld [vmem:[%s3870_s17 + $0x78] sm:$0xff] }
 0x27b   : > { %v2017_v51 = vpop.f32.mrf.mxu0  ;;  %v2210_v53 = vpop.f32.mrf.mxu1 }
 0x27c   : > { %2425 = vst [vmem:[%s3870_s17 + $0x10] sm:$0xff] %v2361_v49  ;;  %v2362_v54 = vadd.f32 %v2207_v50, %v1464_v47  ;;  %v2211_v55 = vadd.f32 %v2210_v53, %v2017_v51  ;;  %v1477_v51 = vld [vmem:[%s3870_s17 + $0x80] sm:$0xff] }
 0x27d   : > { %v2019_v56 = vpop.f32.mrf.mxu0  ;;  %v2212_v58 = vpop.f32.mrf.mxu1 }
 0x27e   : > { %2426 = vst [vmem:[%s3870_s17 + $0x18] sm:$0xff] %v2362_v54  ;;  %v2363_v59 = vadd.f32 %v2211_v55, %v1465_v52  ;;  %v2213_v60 = vadd.f32 %v2212_v58, %v2019_v56  ;;  %v1478_v56 = vld [vmem:[%s3870_s17 + $0x88] sm:$0xff] }
 0x27f   : > { %v2021_v61 = vpop.f32.mrf.mxu0  ;;  %v2214_v63 = vpop.f32.mrf.mxu1 }
 0x280   : > { %2427 = vst [vmem:[%s3870_s17 + $0x20] sm:$0xff] %v2363_v59  ;;  %v2364_v0 = vadd.f32 %v2213_v60, %v1466_v57  ;;  %v2215_v1 = vadd.f32 %v2214_v63, %v2021_v61  ;;  %v1479_v61 = vld [vmem:[%s3870_s17 + $0x90] sm:$0xff] }
 0x281   : > { %v2023_v2 = vpop.f32.mrf.mxu0  ;;  %v2216_v4 = vpop.f32.mrf.mxu1 }
 0x282   : > { %2428 = vst [vmem:[%s3870_s17 + $0x28] sm:$0xff] %v2364_v0  ;;  %v2365_v5 = vadd.f32 %v2215_v1, %v1467_v62  ;;  %v2217_v6 = vadd.f32 %v2216_v4, %v2023_v2  ;;  %v1480_v2 = vld [vmem:[%s3870_s17 + $0x98] sm:$0xff] }
 0x283   : > { %v2027_v7 = vpop.f32.mrf.mxu0  ;;  %v2220_v9 = vpop.f32.mrf.mxu1 }
 0x284   : > { %2429 = vst [vmem:[%s3870_s17 + $0x30] sm:$0xff] %v2365_v5  ;;  %v2366_v10 = vadd.f32 %v2217_v6, %v1468_v3  ;;  %v2221_v11 = vadd.f32 %v2220_v9, %v2027_v7  ;;  %v1481_v7 = vld [vmem:[%s3870_s17 + $0xa0] sm:$0xff] }
 0x285   : > { %v2029_v12 = vpop.f32.mrf.mxu0  ;;  %v2222_v14 = vpop.f32.mrf.mxu1 }
 0x286   : > { %2430 = vst [vmem:[%s3870_s17 + $0x38] sm:$0xff] %v2366_v10  ;;  %v2367_v15 = vadd.f32 %v2221_v11, %v1469_v8  ;;  %v2223_v16 = vadd.f32 %v2222_v14, %v2029_v12  ;;  %v1482_v12 = vld [vmem:[%s3870_s17 + $0xa8] sm:$0xff] }
 0x287   : > { %v2031_v17 = vpop.f32.mrf.mxu0  ;;  %v2224_v19 = vpop.f32.mrf.mxu1 }
 0x288   : > { %2431 = vst [vmem:[%s3870_s17 + $0x40] sm:$0xff] %v2367_v15  ;;  %v2368_v20 = vadd.f32 %v2223_v16, %v1470_v13  ;;  %v2225_v21 = vadd.f32 %v2224_v19, %v2031_v17  ;;  %v1483_v17 = vld [vmem:[%s3870_s17 + $0xb0] sm:$0xff] }
 0x289   : > { %v2033_v22 = vpop.f32.mrf.mxu0  ;;  %v2226_v44 = vpop.f32.mrf.mxu1 }
 0x28a   : > { %2432 = vst [vmem:[%s3870_s17 + $0x48] sm:$0xff] %v2368_v20  ;;  %v2369_v24 = vadd.f32 %v2225_v21, %v1471_v18  ;;  %v2227_v45 = vadd.f32 %v2226_v44, %v2033_v22  ;;  %v1484_v22 = vld [vmem:[%s3870_s17 + $0xb8] sm:$0xff] }
 0x28b   : > { %v2037_v25 = vpop.f32.mrf.mxu0  ;;  %v2230_v42 = vpop.f32.mrf.mxu1 }
 0x28c   : > { %2433 = vst [vmem:[%s3870_s17 + $0x50] sm:$0xff] %v2369_v24  ;;  %v2370_v43 = vadd.f32 %v2227_v45, %v1472_v23  ;;  %v2231_v27 = vadd.f32 %v2230_v42, %v2037_v25  ;;  %v1485_v25 = vld [vmem:[%s3870_s17 + $0xc0] sm:$0xff] }
 0x28d   : > { %v2039_v28 = vpop.f32.mrf.mxu0  ;;  %v2232_v30 = vpop.f32.mrf.mxu1 }
 0x28e   : > { %2434 = vst [vmem:[%s3870_s17 + $0x58] sm:$0xff] %v2370_v43  ;;  %v2371_v31 = vadd.f32 %v2231_v27, %v1473_v26  ;;  %v2233_v32 = vadd.f32 %v2232_v30, %v2039_v28  ;;  %v1486_v28 = vld [vmem:[%s3870_s17 + $0xc8] sm:$0xff] }
 0x28f   : > { %v2041_v33 = vpop.f32.mrf.mxu0  ;;  %v2234_v38 = vpop.f32.mrf.mxu1 }
 0x290   : > { %2435 = vst [vmem:[%s3870_s17 + $0x60] sm:$0xff] %v2371_v31  ;;  %v2372_v39 = vadd.f32 %v2233_v32, %v1474_v29  ;;  %v2235_v40 = vadd.f32 %v2234_v38, %v2041_v33  ;;  %v1487_v33 = vld [vmem:[%s3870_s17 + $0xd0] sm:$0xff] }
 0x291   : > { %v2043_v41 = vpop.f32.mrf.mxu0  ;;  %v2236_v47 = vpop.f32.mrf.mxu1 }
 0x292   : > { %2436 = vst [vmem:[%s3870_s17 + $0x68] sm:$0xff] %v2372_v39  ;;  %v2373_v48 = vadd.f32 %v2235_v40, %v1475_v36  ;;  %v2237_v49 = vadd.f32 %v2236_v47, %v2043_v41  ;;  %v1488_v41 = vld [vmem:[%s3870_s17 + $0xd8] sm:$0xff] }
 0x293   : > { %v2047_v50 = vpop.f32.mrf.mxu0  ;;  %v2240_v52 = vpop.f32.mrf.mxu1 }
 0x294   : > { %2437 = vst [vmem:[%s3870_s17 + $0x70] sm:$0xff] %v2373_v48  ;;  %v2374_v53 = vadd.f32 %v2237_v49, %v1476_v46  ;;  %v2241_v54 = vadd.f32 %v2240_v52, %v2047_v50  ;;  %v1489_v50 = vld [vmem:[%s3870_s17 + $0xe0] sm:$0xff] }
 0x295   : > { %v2049_v55 = vpop.f32.mrf.mxu0  ;;  %v2242_v57 = vpop.f32.mrf.mxu1 }
 0x296   : > { %2438 = vst [vmem:[%s3870_s17 + $0x78] sm:$0xff] %v2374_v53  ;;  %v2375_v58 = vadd.f32 %v2241_v54, %v1477_v51  ;;  %v2243_v59 = vadd.f32 %v2242_v57, %v2049_v55  ;;  %v1490_v55 = vld [vmem:[%s3870_s17 + $0xe8] sm:$0xff] }
 0x297   : > { %v2051_v60 = vpop.f32.mrf.mxu0  ;;  %v2244_v62 = vpop.f32.mrf.mxu1 }
 0x298   : > { %2439 = vst [vmem:[%s3870_s17 + $0x80] sm:$0xff] %v2375_v58  ;;  %v2376_v63 = vadd.f32 %v2243_v59, %v1478_v56  ;;  %v2245_v0 = vadd.f32 %v2244_v62, %v2051_v60  ;;  %v1491_v60 = vld [vmem:[%s3870_s17 + $0xf0] sm:$0xff] }
 0x299   : > { %v2053_v1 = vpop.f32.mrf.mxu0  ;;  %v2246_v3 = vpop.f32.mrf.mxu1 }
 0x29a   : > { %2440 = vst [vmem:[%s3870_s17 + $0x88] sm:$0xff] %v2376_v63  ;;  %v2377_v4 = vadd.f32 %v2245_v0, %v1479_v61  ;;  %v2247_v5 = vadd.f32 %v2246_v3, %v2053_v1  ;;  %v1492_v1 = vld [vmem:[%s3870_s17 + $0xf8] sm:$0xff] }
 0x29b   : > { %v2057_v6 = vpop.f32.mrf.mxu0  ;;  %v2250_v8 = vpop.f32.mrf.mxu1 }
 0x29c   : > { %2441 = vst [vmem:[%s3870_s17 + $0x90] sm:$0xff] %v2377_v4  ;;  %v2378_v9 = vadd.f32 %v2247_v5, %v1480_v2  ;;  %v2251_v10 = vadd.f32 %v2250_v8, %v2057_v6  ;;  %v1493_v6 = vld [vmem:[%s3870_s17 + $0x100] sm:$0xff] }
 0x29d   : > { %v2059_v11 = vpop.f32.mrf.mxu0  ;;  %v2252_v13 = vpop.f32.mrf.mxu1 }
 0x29e   : > { %2442 = vst [vmem:[%s3870_s17 + $0x98] sm:$0xff] %v2378_v9  ;;  %v2379_v14 = vadd.f32 %v2251_v10, %v1481_v7  ;;  %v2253_v15 = vadd.f32 %v2252_v13, %v2059_v11  ;;  %v1494_v11 = vld [vmem:[%s3870_s17 + $0x108] sm:$0xff] }
 0x29f   : > { %v2061_v16 = vpop.f32.mrf.mxu0  ;;  %v2254_v18 = vpop.f32.mrf.mxu1 }
 0x2a0   : > { %2443 = vst [vmem:[%s3870_s17 + $0xa0] sm:$0xff] %v2379_v14  ;;  %v2380_v19 = vadd.f32 %v2253_v15, %v1482_v12  ;;  %v2255_v20 = vadd.f32 %v2254_v18, %v2061_v16  ;;  %v1495_v16 = vld [vmem:[%s3870_s17 + $0x110] sm:$0xff] }
 0x2a1   : > { %v2063_v21 = vpop.f32.mrf.mxu0  ;;  %v2256_v23 = vpop.f32.mrf.mxu1 }
 0x2a2   : > { %2444 = vst [vmem:[%s3870_s17 + $0xa8] sm:$0xff] %v2380_v19  ;;  %v2381_v44 = vadd.f32 %v2255_v20, %v1483_v17  ;;  %v2257_v24 = vadd.f32 %v2256_v23, %v2063_v21  ;;  %v1496_v21 = vld [vmem:[%s3870_s17 + $0x118] sm:$0xff] }
 0x2a3   : > { %v2067_v45 = vpop.f32.mrf.mxu0  ;;  %v2260_v26 = vpop.f32.mrf.mxu1 }
 0x2a4   : > { %2445 = vst [vmem:[%s3870_s17 + $0xb0] sm:$0xff] %v2381_v44  ;;  %v2382_v42 = vadd.f32 %v2257_v24, %v1484_v22  ;;  %v2261_v43 = vadd.f32 %v2260_v26, %v2067_v45  ;;  %v1497_v45 = vld [vmem:[%s3870_s17 + $0x120] sm:$0xff] }
 0x2a5   : > { %v2069_v27 = vpop.f32.mrf.mxu0  ;;  %v2262_v29 = vpop.f32.mrf.mxu1 }
 0x2a6   : > { %2446 = vst [vmem:[%s3870_s17 + $0xb8] sm:$0xff] %v2382_v42  ;;  %v2383_v30 = vadd.f32 %v2261_v43, %v1485_v25  ;;  %v2263_v31 = vadd.f32 %v2262_v29, %v2069_v27  ;;  %v1498_v27 = vld [vmem:[%s3870_s17 + $0x128] sm:$0xff] }
 0x2a7   : > { %v2071_v32 = vpop.f32.mrf.mxu0  ;;  %v2264_v36 = vpop.f32.mrf.mxu1 }
 0x2a8   : > { %2447 = vst [vmem:[%s3870_s17 + $0xc0] sm:$0xff] %v2383_v30  ;;  %v2384_v38 = vadd.f32 %v2263_v31, %v1486_v28  ;;  %v2265_v39 = vadd.f32 %v2264_v36, %v2071_v32  ;;  %v1499_v32 = vld [vmem:[%s3870_s17 + $0x130] sm:$0xff] }
 0x2a9   : > { %v2073_v40 = vpop.f32.mrf.mxu0  ;;  %v2266_v46 = vpop.f32.mrf.mxu1 }
 0x2aa   : > { %2448 = vst [vmem:[%s3870_s17 + $0xc8] sm:$0xff] %v2384_v38  ;;  %v2385_v47 = vadd.f32 %v2265_v39, %v1487_v33  ;;  %v2267_v48 = vadd.f32 %v2266_v46, %v2073_v40  ;;  %v1500_v40 = vld [vmem:[%s3870_s17 + $0x138] sm:$0xff] }
 0x2ab   : > { %v2077_v49 = vpop.f32.mrf.mxu0  ;;  %v2270_v51 = vpop.f32.mrf.mxu1 }
 0x2ac   : > { %2449 = vst [vmem:[%s3870_s17 + $0xd0] sm:$0xff] %v2385_v47  ;;  %v2386_v52 = vadd.f32 %v2267_v48, %v1488_v41  ;;  %v2271_v53 = vadd.f32 %v2270_v51, %v2077_v49  ;;  %v1501_v49 = vld [vmem:[%s3870_s17 + $0x140] sm:$0xff] }
 0x2ad   : > { %v2079_v54 = vpop.f32.mrf.mxu0  ;;  %v2272_v56 = vpop.f32.mrf.mxu1 }
 0x2ae   : > { %2450 = vst [vmem:[%s3870_s17 + $0xd8] sm:$0xff] %v2386_v52  ;;  %v2387_v57 = vadd.f32 %v2271_v53, %v1489_v50  ;;  %v2273_v58 = vadd.f32 %v2272_v56, %v2079_v54  ;;  %v1502_v54 = vld [vmem:[%s3870_s17 + $0x148] sm:$0xff] }
 0x2af   : > { %v2081_v59 = vpop.f32.mrf.mxu0  ;;  %v2274_v61 = vpop.f32.mrf.mxu1 }
 0x2b0   : > { %2451 = vst [vmem:[%s3870_s17 + $0xe0] sm:$0xff] %v2387_v57  ;;  %v2388_v62 = vadd.f32 %v2273_v58, %v1490_v55  ;;  %v2275_v63 = vadd.f32 %v2274_v61, %v2081_v59  ;;  %v1503_v59 = vld [vmem:[%s3870_s17 + $0x150] sm:$0xff] }
 0x2b1   : > { %v2083_v0 = vpop.f32.mrf.mxu0  ;;  %v2276_v2 = vpop.f32.mrf.mxu1 }
 0x2b2   : > { %2452 = vst [vmem:[%s3870_s17 + $0xe8] sm:$0xff] %v2388_v62  ;;  %v2389_v3 = vadd.f32 %v2275_v63, %v1491_v60  ;;  %v2277_v4 = vadd.f32 %v2276_v2, %v2083_v0  ;;  %v1504_v0 = vld [vmem:[%s3870_s17 + $0x158] sm:$0xff] }
 0x2b3   : > { %v2087_v5 = vpop.f32.mrf.mxu0  ;;  %v2280_v7 = vpop.f32.mrf.mxu1 }
 0x2b4   : > { %2453 = vst [vmem:[%s3870_s17 + $0xf0] sm:$0xff] %v2389_v3  ;;  %v2390_v8 = vadd.f32 %v2277_v4, %v1492_v1  ;;  %v2281_v9 = vadd.f32 %v2280_v7, %v2087_v5  ;;  %v1505_v5 = vld [vmem:[%s3870_s17 + $0x160] sm:$0xff] }
 0x2b5   : > { %v2089_v10 = vpop.f32.mrf.mxu0  ;;  %v2282_v12 = vpop.f32.mrf.mxu1 }
 0x2b6   : > { %2454 = vst [vmem:[%s3870_s17 + $0xf8] sm:$0xff] %v2390_v8  ;;  %v2391_v13 = vadd.f32 %v2281_v9, %v1493_v6  ;;  %v2283_v14 = vadd.f32 %v2282_v12, %v2089_v10  ;;  %v1506_v10 = vld [vmem:[%s3870_s17 + $0x168] sm:$0xff] }
 0x2b7   : > { %v2091_v15 = vpop.f32.mrf.mxu0  ;;  %v2284_v17 = vpop.f32.mrf.mxu1 }
 0x2b8   : > { %2455 = vst [vmem:[%s3870_s17 + $0x100] sm:$0xff] %v2391_v13  ;;  %v2392_v18 = vadd.f32 %v2283_v14, %v1494_v11  ;;  %v2285_v19 = vadd.f32 %v2284_v17, %v2091_v15  ;;  %v1507_v15 = vld [vmem:[%s3870_s17 + $0x170] sm:$0xff] }
 0x2b9   : > { %v2093_v20 = vpop.f32.mrf.mxu0  ;;  %v2286_v22 = vpop.f32.mrf.mxu1 }
 0x2ba   : > { %2456 = vst [vmem:[%s3870_s17 + $0x108] sm:$0xff] %v2392_v18  ;;  %v2393_v23 = vadd.f32 %v2285_v19, %v1495_v16  ;;  %v2287_v44 = vadd.f32 %v2286_v22, %v2093_v20  ;;  %v1508_v20 = vld [vmem:[%s3870_s17 + $0x178] sm:$0xff] }
 0x2bb   : > { %v2097_v24 = vpop.f32.mrf.mxu0  ;;  %v2290_v25 = vpop.f32.mrf.mxu1 }
 0x2bc   : > { %2457 = vst [vmem:[%s3870_s17 + $0x110] sm:$0xff] %v2393_v23  ;;  %v2394_v26 = vadd.f32 %v2287_v44, %v1496_v21  ;;  %v2291_v42 = vadd.f32 %v2290_v25, %v2097_v24  ;;  %v1509_v24 = vld [vmem:[%s3870_s17 + $0x180] sm:$0xff] }
 0x2bd   : > { %v2099_v43 = vpop.f32.mrf.mxu0  ;;  %v2292_v28 = vpop.f32.mrf.mxu1 }
 0x2be   : > { %2458 = vst [vmem:[%s3870_s17 + $0x118] sm:$0xff] %v2394_v26  ;;  %v2395_v29 = vadd.f32 %v2291_v42, %v1497_v45  ;;  %v2293_v30 = vadd.f32 %v2292_v28, %v2099_v43  ;;  %v1510_v43 = vld [vmem:[%s3870_s17 + $0x188] sm:$0xff] }
 0x2bf   : > { %v2101_v31 = vpop.f32.mrf.mxu0  ;;  %v2294_v33 = vpop.f32.mrf.mxu1 }
 0x2c0   : > { %2459 = vst [vmem:[%s3870_s17 + $0x120] sm:$0xff] %v2395_v29  ;;  %v2396_v36 = vadd.f32 %v2293_v30, %v1498_v27  ;;  %v2295_v38 = vadd.f32 %v2294_v33, %v2101_v31  ;;  %v1511_v31 = vld [vmem:[%s3870_s17 + $0x190] sm:$0xff] }
 0x2c1   : > { %v2103_v39 = vpop.f32.mrf.mxu0  ;;  %v2296_v41 = vpop.f32.mrf.mxu1 }
 0x2c2   : > { %2460 = vst [vmem:[%s3870_s17 + $0x128] sm:$0xff] %v2396_v36  ;;  %v2397_v46 = vadd.f32 %v2295_v38, %v1499_v32  ;;  %v2297_v47 = vadd.f32 %v2296_v41, %v2103_v39  ;;  %v1512_v39 = vld [vmem:[%s3870_s17 + $0x198] sm:$0xff] }
 0x2c3   : > { %v2107_v48 = vpop.f32.mrf.mxu0  ;;  %v2300_v50 = vpop.f32.mrf.mxu1 }
 0x2c4   : > { %2461 = vst [vmem:[%s3870_s17 + $0x130] sm:$0xff] %v2397_v46  ;;  %v2398_v51 = vadd.f32 %v2297_v47, %v1500_v40  ;;  %v2301_v52 = vadd.f32 %v2300_v50, %v2107_v48  ;;  %v1513_v48 = vld [vmem:[%s3870_s17 + $0x1a0] sm:$0xff] }
 0x2c5   : > { %v2109_v53 = vpop.f32.mrf.mxu0  ;;  %v2302_v55 = vpop.f32.mrf.mxu1 }
 0x2c6   : > { %2462 = vst [vmem:[%s3870_s17 + $0x138] sm:$0xff] %v2398_v51  ;;  %v2399_v56 = vadd.f32 %v2301_v52, %v1501_v49  ;;  %v2303_v57 = vadd.f32 %v2302_v55, %v2109_v53  ;;  %v1514_v53 = vld [vmem:[%s3870_s17 + $0x1a8] sm:$0xff] }
 0x2c7   : > { %v2111_v58 = vpop.f32.mrf.mxu0  ;;  %v2304_v60 = vpop.f32.mrf.mxu1 }
 0x2c8   : > { %2463 = vst [vmem:[%s3870_s17 + $0x140] sm:$0xff] %v2399_v56  ;;  %v2400_v61 = vadd.f32 %v2303_v57, %v1502_v54  ;;  %v2305_v62 = vadd.f32 %v2304_v60, %v2111_v58  ;;  %v1515_v58 = vld [vmem:[%s3870_s17 + $0x1b0] sm:$0xff] }
 0x2c9   : > { %v2113_v63 = vpop.f32.mrf.mxu0  ;;  %v2306_v1 = vpop.f32.mrf.mxu1 }
 0x2ca   : > { %2464 = vst [vmem:[%s3870_s17 + $0x148] sm:$0xff] %v2400_v61  ;;  %v2401_v2 = vadd.f32 %v2305_v62, %v1503_v59  ;;  %v2307_v3 = vadd.f32 %v2306_v1, %v2113_v63  ;;  %v1516_v63 = vld [vmem:[%s3870_s17 + $0x1b8] sm:$0xff] }
 0x2cb   : > { %v2117_v4 = vpop.f32.mrf.mxu0  ;;  %v2310_v6 = vpop.f32.mrf.mxu1 }
 0x2cc   : > { %2465 = vst [vmem:[%s3870_s17 + $0x150] sm:$0xff] %v2401_v2  ;;  %v2402_v7 = vadd.f32 %v2307_v3, %v1504_v0  ;;  %v2311_v8 = vadd.f32 %v2310_v6, %v2117_v4  ;;  %v1517_v4 = vld [vmem:[%s3870_s17 + $0x1c0] sm:$0xff] }
 0x2cd   : > { %v2119_v9 = vpop.f32.mrf.mxu0  ;;  %v2312_v11 = vpop.f32.mrf.mxu1 }
 0x2ce   : > { %2466 = vst [vmem:[%s3870_s17 + $0x158] sm:$0xff] %v2402_v7  ;;  %v2403_v12 = vadd.f32 %v2311_v8, %v1505_v5  ;;  %v2313_v13 = vadd.f32 %v2312_v11, %v2119_v9  ;;  %v1518_v9 = vld [vmem:[%s3870_s17 + $0x1c8] sm:$0xff] }
 0x2cf   : > { %v2121_v14 = vpop.f32.mrf.mxu0  ;;  %v2314_v16 = vpop.f32.mrf.mxu1 }
 0x2d0   : > { %2467 = vst [vmem:[%s3870_s17 + $0x160] sm:$0xff] %v2403_v12  ;;  %v2404_v17 = vadd.f32 %v2313_v13, %v1506_v10  ;;  %v2315_v18 = vadd.f32 %v2314_v16, %v2121_v14  ;;  %v1519_v14 = vld [vmem:[%s3870_s17 + $0x1d0] sm:$0xff] }
 0x2d1   : > { %v2123_v19 = vpop.f32.mrf.mxu0  ;;  %v2316_v21 = vpop.f32.mrf.mxu1 }
 0x2d2   : > { %2468 = vst [vmem:[%s3870_s17 + $0x168] sm:$0xff] %v2404_v17  ;;  %v2405_v22 = vadd.f32 %v2315_v18, %v1507_v15  ;;  %v2317_v23 = vadd.f32 %v2316_v21, %v2123_v19  ;;  %v1520_v19 = vld [vmem:[%s3870_s17 + $0x1d8] sm:$0xff] }
 0x2d3   : > { %v2127_v44 = vpop.f32.mrf.mxu0  ;;  %v2320_v45 = vpop.f32.mrf.mxu1 }
 0x2d4   : > { %2469 = vst [vmem:[%s3870_s17 + $0x170] sm:$0xff] %v2405_v22  ;;  %v2406_v25 = vadd.f32 %v2317_v23, %v1508_v20  ;;  %v2321_v26 = vadd.f32 %v2320_v45, %v2127_v44  ;;  %v1521_v44 = vld [vmem:[%s3870_s17 + $0x1e0] sm:$0xff] }
 0x2d5   : > { %v2129_v42 = vpop.f32.mrf.mxu0  ;;  %v2322_v27 = vpop.f32.mrf.mxu1 }
 0x2d6   : > { %2470 = vst [vmem:[%s3870_s17 + $0x178] sm:$0xff] %v2406_v25  ;;  %v2407_v28 = vadd.f32 %v2321_v26, %v1509_v24  ;;  %v2323_v29 = vadd.f32 %v2322_v27, %v2129_v42  ;;  %v1522_v42 = vld [vmem:[%s3870_s17 + $0x1e8] sm:$0xff] }
 0x2d7   : > { %v2131_v30 = vpop.f32.mrf.mxu0  ;;  %v2324_v32 = vpop.f32.mrf.mxu1 }
 0x2d8   : > { %2471 = vst [vmem:[%s3870_s17 + $0x180] sm:$0xff] %v2407_v28  ;;  %v2408_v33 = vadd.f32 %v2323_v29, %v1510_v43  ;;  %v2325_v36 = vadd.f32 %v2324_v32, %v2131_v30  ;;  %v1523_v30 = vld [vmem:[%s3870_s17 + $0x1f0] sm:$0xff] }
 0x2d9   : > { %v2133_v38 = vpop.f32.mrf.mxu0  ;;  %v2326_v40 = vpop.f32.mrf.mxu1 }
 0x2da   : > { %2472 = vst [vmem:[%s3870_s17 + $0x188] sm:$0xff] %v2408_v33  ;;  %v2409_v41 = vadd.f32 %v2325_v36, %v1511_v31  ;;  %v2327_v46 = vadd.f32 %v2326_v40, %v2133_v38  ;;  %v1524_v38 = vld [vmem:[%s3870_s17 + $0x1f8] sm:$0xff] }
 0x2db   : > { %v2137_v47 = vpop.f32.mrf.mxu0  ;;  %v2330_v49 = vpop.f32.mrf.mxu1 }
 0x2dc   : > { %2473 = vst [vmem:[%s3870_s17 + $0x190] sm:$0xff] %v2409_v41  ;;  %v2410_v50 = vadd.f32 %v2327_v46, %v1512_v39  ;;  %v2331_v51 = vadd.f32 %v2330_v49, %v2137_v47 }
 0x2dd   : > { %v2139_v52 = vpop.f32.mrf.mxu0  ;;  %v2332_v54 = vpop.f32.mrf.mxu1 }
 0x2de   : > { %2474 = vst [vmem:[%s3870_s17 + $0x198] sm:$0xff] %v2410_v50  ;;  %v2411_v55 = vadd.f32 %v2331_v51, %v1513_v48  ;;  %v2333_v56 = vadd.f32 %v2332_v54, %v2139_v52 }
 0x2df   : > { %v2141_v57 = vpop.f32.mrf.mxu0  ;;  %v2334_v59 = vpop.f32.mrf.mxu1 }
 0x2e0   : > { %2475 = vst [vmem:[%s3870_s17 + $0x1a0] sm:$0xff] %v2411_v55  ;;  %v2412_v60 = vadd.f32 %v2333_v56, %v1514_v53  ;;  %v2335_v61 = vadd.f32 %v2334_v59, %v2141_v57 }
 0x2e1   : > { %v2143_v62 = vpop.f32.mrf.mxu0  ;;  %v2336_v0 = vpop.f32.mrf.mxu1 }
 0x2e2   : > { %2476 = vst [vmem:[%s3870_s17 + $0x1a8] sm:$0xff] %v2412_v60  ;;  %v2413_v1 = vadd.f32 %v2335_v61, %v1515_v58  ;;  %v2337_v2 = vadd.f32 %v2336_v0, %v2143_v62 }
 0x2e3   : > { %v2147_v3 = vpop.f32.mrf.mxu0  ;;  %v2340_v5 = vpop.f32.mrf.mxu1 }
 0x2e4   : > { %2477 = vst [vmem:[%s3870_s17 + $0x1b0] sm:$0xff] %v2413_v1  ;;  %v2414_v6 = vadd.f32 %v2337_v2, %v1516_v63  ;;  %v2341_v7 = vadd.f32 %v2340_v5, %v2147_v3 }
 0x2e5   : > { %v2149_v8 = vpop.f32.mrf.mxu0  ;;  %v2342_v10 = vpop.f32.mrf.mxu1 }
 0x2e6   : > { %2478 = vst [vmem:[%s3870_s17 + $0x1b8] sm:$0xff] %v2414_v6  ;;  %v2415_v11 = vadd.f32 %v2341_v7, %v1517_v4  ;;  %v2343_v12 = vadd.f32 %v2342_v10, %v2149_v8 }
 0x2e7   : > { %v2151_v13 = vpop.f32.mrf.mxu0  ;;  %v2344_v15 = vpop.f32.mrf.mxu1 }
 0x2e8   : > { %2479 = vst [vmem:[%s3870_s17 + $0x1c0] sm:$0xff] %v2415_v11  ;;  %v2416_v16 = vadd.f32 %v2343_v12, %v1518_v9  ;;  %v2345_v17 = vadd.f32 %v2344_v15, %v2151_v13 }
 0x2e9   : > { %v2153_v18 = vpop.f32.mrf.mxu0  ;;  %v2346_v20 = vpop.f32.mrf.mxu1 }
 0x2ea   : > { %2480 = vst [vmem:[%s3870_s17 + $0x1c8] sm:$0xff] %v2416_v16  ;;  %v2417_v21 = vadd.f32 %v2345_v17, %v1519_v14  ;;  %v2347_v22 = vadd.f32 %v2346_v20, %v2153_v18 }
 0x2eb   : > { %v2157_v23 = vpop.f32.mrf.mxu0  ;;  %v2350_v24 = vpop.f32.mrf.mxu1 }
 0x2ec   : > { %2481 = vst [vmem:[%s3870_s17 + $0x1d0] sm:$0xff] %v2417_v21  ;;  %v2418_v45 = vadd.f32 %v2347_v22, %v1520_v19  ;;  %v2351_v25 = vadd.f32 %v2350_v24, %v2157_v23 }
 0x2ed   : > { %v2159_v26 = vpop.f32.mrf.mxu0  ;;  %v2352_v43 = vpop.f32.mrf.mxu1 }
 0x2ee   : > { %2482 = vst [vmem:[%s3870_s17 + $0x1d8] sm:$0xff] %v2418_v45  ;;  %v2419_v27 = vadd.f32 %v2351_v25, %v1521_v44  ;;  %v2353_v28 = vadd.f32 %v2352_v43, %v2159_v26 }
 0x2ef   : > { %v2161_v29 = vpop.f32.mrf.mxu0  ;;  %v2354_v31 = vpop.f32.mrf.mxu1 }
 0x2f0   : > { %2483 = vst [vmem:[%s3870_s17 + $0x1e0] sm:$0xff] %v2419_v27  ;;  %v2420_v32 = vadd.f32 %v2353_v28, %v1522_v42  ;;  %v2355_v33 = vadd.f32 %v2354_v31, %v2161_v29 }
 0x2f1   : > { %v2163_v36 = vpop.f32.mrf.mxu0  ;;  %v2356_v39 = vpop.f32.mrf.mxu1 }
 0x2f2   : > { %2484 = vst [vmem:[%s3870_s17 + $0x1e8] sm:$0xff] %v2420_v32  ;;  %v2421_v40 = vadd.f32 %v2355_v33, %v1523_v30  ;;  %v2357_v41 = vadd.f32 %v2356_v39, %v2163_v36  ;;  %2490 = sbr.rel (%p3013_p8) target bundleno = 796 (0x31c), region = 64 }
 0x2f4   : > { %2485 = vst [vmem:[%s3870_s17 + $0x1f0] sm:$0xff] %v2421_v40  ;;  %v2422_v46 = vadd.f32 %v2357_v41, %v1524_v38 }
 0x2f6   : > { %2486 = vst [vmem:[%s3870_s17 + $0x1f8] sm:$0xff] %v2422_v46 }
 0x2f7   : > { %v2491_v47 = vld [vmem:[%s3870_s17] sm:$0xff]  ;;  %v2555_v48 = vld [vmem:[%s4793_s7] sm:$0x3]  ;;  %v2492_v49 = vld [vmem:[%s3870_s17 + $0x8] sm:$0xff] }
 0x2f8   : > { %v4476_v50 = vrot.slane %v2555_v48, %v609_v37  ;;  %v4480_v51 = vrot.slane %v2555_v48, %v613_v35  ;;  %v2493_v52 = vld [vmem:[%s3870_s17 + $0x10] sm:$0xff]  ;;  %v2494_v53 = vld [vmem:[%s3870_s17 + $0x18] sm:$0xff]  ;;  %v2495_v54 = vld [vmem:[%s3870_s17 + $0x20] sm:$0xff] }
 0x2f9   : > { %v2496_v55 = vld [vmem:[%s3870_s17 + $0x28] sm:$0xff]  ;;  %v2497_v56 = vld [vmem:[%s3870_s17 + $0x30] sm:$0xff]  ;;  %v2498_v57 = vld [vmem:[%s3870_s17 + $0x38] sm:$0xff] }
 0x2fa   : > { %v2567_v58 = vadd.f32 %v4476_v50, %v2491_v47  ;;  %v2568_v37 = vadd.f32 %v4480_v51, %v2492_v49  ;;  %v2569_v34 = vadd.f32 %v4476_v50, %v2493_v52  ;;  %v2570_v35 = vadd.f32 %v4480_v51, %v2494_v53  ;;  %v2499_v59 = vld [vmem:[%s3870_s17 + $0x40] sm:$0xff]  ;;  %v2500_v60 = vld [vmem:[%s3870_s17 + $0x48] sm:$0xff]  ;;  %v2501_v61 = vld [vmem:[%s3870_s17 + $0x50] sm:$0xff] }
 0x2fb   : > { %v2571_v62 = vadd.f32 %v4476_v50, %v2495_v54  ;;  %v2572_v63 = vadd.f32 %v4480_v51, %v2496_v55  ;;  %v2573_v0 = vadd.f32 %v4476_v50, %v2497_v56  ;;  %v2574_v1 = vadd.f32 %v4480_v51, %v2498_v57  ;;  %v2502_v2 = vld [vmem:[%s3870_s17 + $0x58] sm:$0xff]  ;;  %v2503_v3 = vld [vmem:[%s3870_s17 + $0x60] sm:$0xff]  ;;  %v2504_v4 = vld [vmem:[%s3870_s17 + $0x68] sm:$0xff] }
 0x2fc   : > { %2631 = vst [vmem:[%s3870_s17] sm:$0xff] %v2567_v58  ;;  %2632 = vst [vmem:[%s3870_s17 + $0x8] sm:$0xff] %v2568_v37  ;;  %v2575_v5 = vadd.f32 %v4476_v50, %v2499_v59  ;;  %v2576_v6 = vadd.f32 %v4480_v51, %v2500_v60  ;;  %v2577_v7 = vadd.f32 %v4476_v50, %v2501_v61  ;;  %v2505_v9 = vld [vmem:[%s3870_s17 + $0x70] sm:$0xff]  ;;  %v2506_v10 = vld [vmem:[%s3870_s17 + $0x78] sm:$0xff] }
 0x2fd   : > { %2633 = vst [vmem:[%s3870_s17 + $0x10] sm:$0xff] %v2569_v34  ;;  %2634 = vst [vmem:[%s3870_s17 + $0x18] sm:$0xff] %v2570_v35  ;;  %v2578_v8 = vadd.f32 %v4480_v51, %v2502_v2  ;;  %v2507_v11 = vld [vmem:[%s3870_s17 + $0x80] sm:$0xff]  ;;  %v2579_v12 = vadd.f32 %v4476_v50, %v2503_v3  ;;  %v2580_v13 = vadd.f32 %v4480_v51, %v2504_v4  ;;  %v2508_v16 = vld [vmem:[%s3870_s17 + $0x88] sm:$0xff] }
 0x2fe   : > { %2635 = vst [vmem:[%s3870_s17 + $0x20] sm:$0xff] %v2571_v62  ;;  %2636 = vst [vmem:[%s3870_s17 + $0x28] sm:$0xff] %v2572_v63  ;;  %v2581_v14 = vadd.f32 %v4476_v50, %v2505_v9  ;;  %v2582_v15 = vadd.f32 %v4480_v51, %v2506_v10  ;;  %v2509_v17 = vld [vmem:[%s3870_s17 + $0x90] sm:$0xff]  ;;  %v2510_v18 = vld [vmem:[%s3870_s17 + $0x98] sm:$0xff]  ;;  %v2583_v19 = vadd.f32 %v4476_v50, %v2507_v11 }
 0x2ff   : > { %2637 = vst [vmem:[%s3870_s17 + $0x30] sm:$0xff] %v2573_v0  ;;  %2638 = vst [vmem:[%s3870_s17 + $0x38] sm:$0xff] %v2574_v1  ;;  %v2584_v20 = vadd.f32 %v4480_v51, %v2508_v16  ;;  %v2585_v21 = vadd.f32 %v4476_v50, %v2509_v17  ;;  %v2586_v22 = vadd.f32 %v4480_v51, %v2510_v18  ;;  %v2511_v23 = vld [vmem:[%s3870_s17 + $0xa0] sm:$0xff]  ;;  %v2512_v44 = vld [vmem:[%s3870_s17 + $0xa8] sm:$0xff] }
 0x300   : > { %2639 = vst [vmem:[%s3870_s17 + $0x40] sm:$0xff] %v2575_v5  ;;  %2640 = vst [vmem:[%s3870_s17 + $0x48] sm:$0xff] %v2576_v6  ;;  %v2513_v24 = vld [vmem:[%s3870_s17 + $0xb0] sm:$0xff]  ;;  %v2587_v45 = vadd.f32 %v4476_v50, %v2511_v23  ;;  %v2588_v25 = vadd.f32 %v4480_v51, %v2512_v44  ;;  %v2514_v42 = vld [vmem:[%s3870_s17 + $0xb8] sm:$0xff] }
 0x301   : > { %2641 = vst [vmem:[%s3870_s17 + $0x50] sm:$0xff] %v2577_v7  ;;  %2642 = vst [vmem:[%s3870_s17 + $0x58] sm:$0xff] %v2578_v8  ;;  %v2589_v26 = vadd.f32 %v4476_v50, %v2513_v24  ;;  %v2515_v43 = vld [vmem:[%s3870_s17 + $0xc0] sm:$0xff]  ;;  %v2516_v27 = vld [vmem:[%s3870_s17 + $0xc8] sm:$0xff]  ;;  %v2590_v28 = vadd.f32 %v4480_v51, %v2514_v42 }
 0x302   : > { %2643 = vst [vmem:[%s3870_s17 + $0x60] sm:$0xff] %v2579_v12  ;;  %2644 = vst [vmem:[%s3870_s17 + $0x68] sm:$0xff] %v2580_v13  ;;  %v2591_v29 = vadd.f32 %v4476_v50, %v2515_v43  ;;  %v2592_v30 = vadd.f32 %v4480_v51, %v2516_v27  ;;  %v2517_v31 = vld [vmem:[%s3870_s17 + $0xd0] sm:$0xff]  ;;  %v2518_v32 = vld [vmem:[%s3870_s17 + $0xd8] sm:$0xff] }
 0x303   : > { %2645 = vst [vmem:[%s3870_s17 + $0x70] sm:$0xff] %v2581_v14  ;;  %2646 = vst [vmem:[%s3870_s17 + $0x78] sm:$0xff] %v2582_v15  ;;  %v2519_v33 = vld [vmem:[%s3870_s17 + $0xe0] sm:$0xff]  ;;  %v2593_v36 = vadd.f32 %v4476_v50, %v2517_v31  ;;  %v2594_v38 = vadd.f32 %v4480_v51, %v2518_v32  ;;  %v2520_v40 = vld [vmem:[%s3870_s17 + $0xe8] sm:$0xff] }
 0x304   : > { %2647 = vst [vmem:[%s3870_s17 + $0x80] sm:$0xff] %v2583_v19  ;;  %2648 = vst [vmem:[%s3870_s17 + $0x88] sm:$0xff] %v2584_v20  ;;  %v2595_v39 = vadd.f32 %v4476_v50, %v2519_v33  ;;  %v2521_v41 = vld [vmem:[%s3870_s17 + $0xf0] sm:$0xff]  ;;  %v2522_v46 = vld [vmem:[%s3870_s17 + $0xf8] sm:$0xff]  ;;  %v2596_v47 = vadd.f32 %v4480_v51, %v2520_v40 }
 0x305   : > { %2649 = vst [vmem:[%s3870_s17 + $0x90] sm:$0xff] %v2585_v21  ;;  %2650 = vst [vmem:[%s3870_s17 + $0x98] sm:$0xff] %v2586_v22  ;;  %v2597_v48 = vadd.f32 %v4476_v50, %v2521_v41  ;;  %v2598_v49 = vadd.f32 %v4480_v51, %v2522_v46  ;;  %v2523_v52 = vld [vmem:[%s3870_s17 + $0x100] sm:$0xff]  ;;  %v2524_v53 = vld [vmem:[%s3870_s17 + $0x108] sm:$0xff] }
 0x306   : > { %2651 = vst [vmem:[%s3870_s17 + $0xa0] sm:$0xff] %v2587_v45  ;;  %2652 = vst [vmem:[%s3870_s17 + $0xa8] sm:$0xff] %v2588_v25  ;;  %v2525_v54 = vld [vmem:[%s3870_s17 + $0x110] sm:$0xff]  ;;  %v2599_v55 = vadd.f32 %v4476_v50, %v2523_v52  ;;  %v2600_v56 = vadd.f32 %v4480_v51, %v2524_v53  ;;  %v2526_v58 = vld [vmem:[%s3870_s17 + $0x118] sm:$0xff] }
 0x307   : > { %2653 = vst [vmem:[%s3870_s17 + $0xb0] sm:$0xff] %v2589_v26  ;;  %2654 = vst [vmem:[%s3870_s17 + $0xb8] sm:$0xff] %v2590_v28  ;;  %v2601_v57 = vadd.f32 %v4476_v50, %v2525_v54  ;;  %v2527_v37 = vld [vmem:[%s3870_s17 + $0x120] sm:$0xff]  ;;  %v2528_v34 = vld [vmem:[%s3870_s17 + $0x128] sm:$0xff]  ;;  %v2602_v35 = vadd.f32 %v4480_v51, %v2526_v58 }
 0x308   : > { %2655 = vst [vmem:[%s3870_s17 + $0xc0] sm:$0xff] %v2591_v29  ;;  %2656 = vst [vmem:[%s3870_s17 + $0xc8] sm:$0xff] %v2592_v30  ;;  %v2603_v59 = vadd.f32 %v4476_v50, %v2527_v37  ;;  %v2604_v60 = vadd.f32 %v4480_v51, %v2528_v34  ;;  %v2529_v61 = vld [vmem:[%s3870_s17 + $0x130] sm:$0xff]  ;;  %v2530_v62 = vld [vmem:[%s3870_s17 + $0x138] sm:$0xff] }
 0x309   : > { %2657 = vst [vmem:[%s3870_s17 + $0xd0] sm:$0xff] %v2593_v36  ;;  %2658 = vst [vmem:[%s3870_s17 + $0xd8] sm:$0xff] %v2594_v38  ;;  %v2531_v63 = vld [vmem:[%s3870_s17 + $0x140] sm:$0xff]  ;;  %v2605_v0 = vadd.f32 %v4476_v50, %v2529_v61  ;;  %v2606_v1 = vadd.f32 %v4480_v51, %v2530_v62  ;;  %v2532_v3 = vld [vmem:[%s3870_s17 + $0x148] sm:$0xff] }
 0x30a   : > { %2659 = vst [vmem:[%s3870_s17 + $0xe0] sm:$0xff] %v2595_v39  ;;  %2660 = vst [vmem:[%s3870_s17 + $0xe8] sm:$0xff] %v2596_v47  ;;  %v2607_v2 = vadd.f32 %v4476_v50, %v2531_v63  ;;  %v2533_v4 = vld [vmem:[%s3870_s17 + $0x150] sm:$0xff]  ;;  %v2534_v5 = vld [vmem:[%s3870_s17 + $0x158] sm:$0xff]  ;;  %v2608_v6 = vadd.f32 %v4480_v51, %v2532_v3 }
 0x30b   : > { %2661 = vst [vmem:[%s3870_s17 + $0xf0] sm:$0xff] %v2597_v48  ;;  %2662 = vst [vmem:[%s3870_s17 + $0xf8] sm:$0xff] %v2598_v49  ;;  %v2609_v7 = vadd.f32 %v4476_v50, %v2533_v4  ;;  %v2610_v8 = vadd.f32 %v4480_v51, %v2534_v5  ;;  %v2535_v9 = vld [vmem:[%s3870_s17 + $0x160] sm:$0xff]  ;;  %v2536_v10 = vld [vmem:[%s3870_s17 + $0x168] sm:$0xff] }
 0x30c   : > { %2663 = vst [vmem:[%s3870_s17 + $0x100] sm:$0xff] %v2599_v55  ;;  %2664 = vst [vmem:[%s3870_s17 + $0x108] sm:$0xff] %v2600_v56  ;;  %v2537_v11 = vld [vmem:[%s3870_s17 + $0x170] sm:$0xff]  ;;  %v2611_v12 = vadd.f32 %v4476_v50, %v2535_v9  ;;  %v2612_v13 = vadd.f32 %v4480_v51, %v2536_v10  ;;  %v2538_v15 = vld [vmem:[%s3870_s17 + $0x178] sm:$0xff] }
 0x30d   : > { %2665 = vst [vmem:[%s3870_s17 + $0x110] sm:$0xff] %v2601_v57  ;;  %2666 = vst [vmem:[%s3870_s17 + $0x118] sm:$0xff] %v2602_v35  ;;  %v2613_v14 = vadd.f32 %v4476_v50, %v2537_v11  ;;  %v2539_v16 = vld [vmem:[%s3870_s17 + $0x180] sm:$0xff]  ;;  %v2540_v17 = vld [vmem:[%s3870_s17 + $0x188] sm:$0xff]  ;;  %v2614_v18 = vadd.f32 %v4480_v51, %v2538_v15 }
 0x30e   : > { %2667 = vst [vmem:[%s3870_s17 + $0x120] sm:$0xff] %v2603_v59  ;;  %2668 = vst [vmem:[%s3870_s17 + $0x128] sm:$0xff] %v2604_v60  ;;  %v2615_v19 = vadd.f32 %v4476_v50, %v2539_v16  ;;  %v2616_v20 = vadd.f32 %v4480_v51, %v2540_v17  ;;  %v2541_v21 = vld [vmem:[%s3870_s17 + $0x190] sm:$0xff]  ;;  %v2542_v22 = vld [vmem:[%s3870_s17 + $0x198] sm:$0xff] }
 0x30f   : > { %2669 = vst [vmem:[%s3870_s17 + $0x130] sm:$0xff] %v2605_v0  ;;  %2670 = vst [vmem:[%s3870_s17 + $0x138] sm:$0xff] %v2606_v1  ;;  %v2543_v23 = vld [vmem:[%s3870_s17 + $0x1a0] sm:$0xff]  ;;  %v2617_v44 = vadd.f32 %v4476_v50, %v2541_v21  ;;  %v2618_v24 = vadd.f32 %v4480_v51, %v2542_v22  ;;  %v2544_v25 = vld [vmem:[%s3870_s17 + $0x1a8] sm:$0xff] }
 0x310   : > { %2671 = vst [vmem:[%s3870_s17 + $0x140] sm:$0xff] %v2607_v2  ;;  %2672 = vst [vmem:[%s3870_s17 + $0x148] sm:$0xff] %v2608_v6  ;;  %v2619_v45 = vadd.f32 %v4476_v50, %v2543_v23  ;;  %v2545_v26 = vld [vmem:[%s3870_s17 + $0x1b0] sm:$0xff]  ;;  %v2546_v42 = vld [vmem:[%s3870_s17 + $0x1b8] sm:$0xff]  ;;  %v2620_v43 = vadd.f32 %v4480_v51, %v2544_v25 }
 0x311   : > { %2673 = vst [vmem:[%s3870_s17 + $0x150] sm:$0xff] %v2609_v7  ;;  %2674 = vst [vmem:[%s3870_s17 + $0x158] sm:$0xff] %v2610_v8  ;;  %v2621_v27 = vadd.f32 %v4476_v50, %v2545_v26  ;;  %v2622_v28 = vadd.f32 %v4480_v51, %v2546_v42  ;;  %v2547_v29 = vld [vmem:[%s3870_s17 + $0x1c0] sm:$0xff]  ;;  %v2548_v30 = vld [vmem:[%s3870_s17 + $0x1c8] sm:$0xff] }
 0x312   : > { %2675 = vst [vmem:[%s3870_s17 + $0x160] sm:$0xff] %v2611_v12  ;;  %2676 = vst [vmem:[%s3870_s17 + $0x168] sm:$0xff] %v2612_v13  ;;  %v2549_v31 = vld [vmem:[%s3870_s17 + $0x1d0] sm:$0xff]  ;;  %v2623_v32 = vadd.f32 %v4476_v50, %v2547_v29  ;;  %v2624_v33 = vadd.f32 %v4480_v51, %v2548_v30  ;;  %v2550_v38 = vld [vmem:[%s3870_s17 + $0x1d8] sm:$0xff] }
 0x313   : > { %2677 = vst [vmem:[%s3870_s17 + $0x170] sm:$0xff] %v2613_v14  ;;  %2678 = vst [vmem:[%s3870_s17 + $0x178] sm:$0xff] %v2614_v18  ;;  %v2625_v36 = vadd.f32 %v4476_v50, %v2549_v31  ;;  %v2551_v39 = vld [vmem:[%s3870_s17 + $0x1e0] sm:$0xff]  ;;  %v2552_v40 = vld [vmem:[%s3870_s17 + $0x1e8] sm:$0xff]  ;;  %v2626_v41 = vadd.f32 %v4480_v51, %v2550_v38 }
 0x314   : > { %2679 = vst [vmem:[%s3870_s17 + $0x180] sm:$0xff] %v2615_v19  ;;  %2680 = vst [vmem:[%s3870_s17 + $0x188] sm:$0xff] %v2616_v20  ;;  %v2627_v46 = vadd.f32 %v4476_v50, %v2551_v39  ;;  %v2628_v47 = vadd.f32 %v4480_v51, %v2552_v40  ;;  %v2553_v48 = vld [vmem:[%s3870_s17 + $0x1f0] sm:$0xff]  ;;  %v2554_v49 = vld [vmem:[%s3870_s17 + $0x1f8] sm:$0xff] }
 0x315   : > { %2681 = vst [vmem:[%s3870_s17 + $0x190] sm:$0xff] %v2617_v44  ;;  %2682 = vst [vmem:[%s3870_s17 + $0x198] sm:$0xff] %v2618_v24  ;;  %v2629_v52 = vadd.f32 %v4476_v50, %v2553_v48  ;;  %v2630_v53 = vadd.f32 %v4480_v51, %v2554_v49 }
 0x316   : > { %2683 = vst [vmem:[%s3870_s17 + $0x1a0] sm:$0xff] %v2619_v45  ;;  %2684 = vst [vmem:[%s3870_s17 + $0x1a8] sm:$0xff] %v2620_v43 }
 0x317   : > { %2685 = vst [vmem:[%s3870_s17 + $0x1b0] sm:$0xff] %v2621_v27  ;;  %2686 = vst [vmem:[%s3870_s17 + $0x1b8] sm:$0xff] %v2622_v28 }
 0x318   : > { %2687 = vst [vmem:[%s3870_s17 + $0x1c0] sm:$0xff] %v2623_v32  ;;  %2688 = vst [vmem:[%s3870_s17 + $0x1c8] sm:$0xff] %v2624_v33 }
 0x319   : > { %2689 = vst [vmem:[%s3870_s17 + $0x1d0] sm:$0xff] %v2625_v36  ;;  %2690 = vst [vmem:[%s3870_s17 + $0x1d8] sm:$0xff] %v2626_v41 }
 0x31a   : > { %2691 = vst [vmem:[%s3870_s17 + $0x1e0] sm:$0xff] %v2627_v46  ;;  %2692 = vst [vmem:[%s3870_s17 + $0x1e8] sm:$0xff] %v2628_v47 }
 0x31b   : > { %2693 = vst [vmem:[%s3870_s17 + $0x1f0] sm:$0xff] %v2629_v52  ;;  %2694 = vst [vmem:[%s3870_s17 + $0x1f8] sm:$0xff] %v2630_v53 }
 0x31c PF: > { %s4794_s24 = sld [smem:[#allocation18_spill]]  ;;  %s2710_s15 = sshll.u32 %s3870_s17, 4  ;;  %s4679_s15 = int_to_ptr.vmem [resolvable:$true] %s2710_s15 }
 0x31d   : > { %s4795_s10 = sld [smem:[#allocation29_spill]]  ;;  %s2696_s8 = scalar_lea.sflag [#allocation4], %s3844_s6 }
 0x31e   : > { %s3457_s20 = scalar_lea.vmem %s4679_s15, 8192  ;;  %s3597_s27 = smov [#allocation10]  }
 0x31f   : > { %p3458_p1 = scmp.ne.s32.totalorder %s4679_s15, %s3457_s20  ;;  %s3461_s11 = sshll.u32 %s3597_s27, 4  ;;  %s3462_s11 = int_to_ptr.vmem [resolvable:$false] %s3461_s11 }
 0x320   : > { %s3463_s14 = scalar_lea.vmem %s3462_s11, 16384  ;;  %p3464_p2 = scmp.lt.s32.totalorder %s4679_s15, %s3462_s11 }
 0x321   : > { %p3459_p0 = pnand %p3458_p1, %p3788_p13  ;;  %p3465_p3 = scmp.lt.s32.totalorder %s3463_s14, %s3457_s20 }
 0x322   : > { %s3027_s28 = sshll.u32 %s4794_s24, 13 }
 0x323   : > { %s4676_s0 = scalar_lea.hbm %s4795_s10, %s3027_s28  ;;  %p3460_p6 = pneg %p3459_p0 }
 0x324   : > { %p3466_p4 = por %p3465_p3, %p3464_p2 }
 0x326   : > { %p3467_p10 = pnand %p3466_p4, %p3460_p6 }
 0x328   : > { %3470 = shalt.err (!%p3467_p10)
}
 0x329   : > { %s3471_s16 = scalar_lea.hbm %s4676_s0, 8192  ;;  %s3475_s21 = scalar_lea.hbm %s4795_s10, 16384 }
 0x32a   : > { %p3472_p11 = scmp.ne.s32.totalorder %s4676_s0, %s3471_s16  ;;  %p3476_p7 = scmp.lt.s32.totalorder %s4676_s0, %s4795_s10 }
 0x32b   : > { %p3477_p5 = scmp.lt.s32.totalorder %s3475_s21, %s3471_s16 }
 0x32c   : > { %p3473_p12 = pnand %p3472_p11, %p3788_p13 }
 0x32d   : > { %p3478_p8 = por %p3477_p5, %p3476_p7 }
 0x32e   : > { %p3474_p9 = pneg %p3473_p12 }
 0x330   : > { %p3479_p1 = pnand %p3478_p8, %p3474_p9 }
 0x332   : > { %3482 = shalt.err (!%p3479_p1)
}
 0x333   : > { %s3598_s30 = smov 256   ;;  %s3599_s18 = smov 16  }
 0x334   : > { %3036 = dma.vmem_to_hbm [thread:$0]  (%p3788_p13), %s4679_s15, 8192, %s4676_s0, %s2696_s8, %s3598_s30, %s3598_s30, %s3599_s18  }
 0x335 PF: > { %s4796_s17 = sld [smem:[#allocation20_spill]] }
 0x336   : > { %s4797_s5 = sld [smem:[#allocation16_spill]] }
 0x337   : > { %s4798_s1 = sld [smem:[#allocation25_spill]] }
 0x33b   : > { %p3056_p0 = scmp.ge.s32.totalorder %s4796_s17, 2 }
 0x33c   : > { %s2725_s7 = sand.u32 1, %s4797_s5  }
 0x33d   : > { %p4799_p6 = scmp.ne.s32.totalorder %s4798_s1, 0  ;;  %s2726_s24 = scalar_lea.sflag [#allocation4], %s2725_s7 }
 0x33f   : > { %p3052_p2 = pnand %p3056_p0, %p4799_p6 }
 0x341   : > { %p3053_p3 = pneg %p3052_p2 }
 0x343   : > { %3540 = dma.done.wait (%p3053_p3), %s2726_s24, 8192  }
 0x344   : > { %3542 = vsyncadd (%p3053_p3), %s2726_s24, 4294959104  ;;  %s27_s28 = sadd.s32 1, %s4796_s17   ;;  %s4800_s12 = sld [smem:[#allocation15_spill]] }
 0x345   : > { %p24_p4 = scmp.ge.s32.totalorder %s27_s28, 6   ;;  %s4801_s20 = sld [smem:[#allocation23_spill]] }
 0x346   : > { %s4802_s29 = sld [smem:[#allocation17_spill]]  ;;  %s4807_s18 = smov %s3549_s19 }
 0x347   : > { %s4803_s23 = sld [smem:[#allocation24_spill]]  ;;  %s4809_s21 = smov %s3561_s22 }
 0x348   : > { %s4804_s25 = sld [smem:[#allocation19_spill]]  ;;  %s4811_s24 = smov %s3577_s26 }
 0x349   : > { %s4805_s6 = sld [smem:[#allocation21_spill]] }
 0x34a   : > { %s4806_s27 = sld [smem:[#allocation22_spill]]  ;;  %s4808_s19 = smov %s4800_s12 }
 0x34b   :  { %26 = sbr.rel (!%p24_p4) target bundleno = 18 (0x12), region = 130 }
 0x34c   : > { %s4810_s22 = smov %s4802_s29 }
 0x34f   : > { %s4812_s26 = smov %s4805_s6 }
 0x350   :  { %2731 = vsyncpa [#allocation3], 1 }
 0x351   :  { %2733 = vsyncpa [#allocation3 + $0x1], 1 }
 0x352   :  { %2734 = vsyncpa [#allocation6], 1 }
 0x353   :  { %2736 = vsyncpa [#allocation6 + $0x1], 1 }
 0x354   :  { %2737 = vsyncpa [#allocation9], 1 }
 0x355   :  { %2739 = vsyncpa [#allocation9 + $0x1], 1 }
 0x356   :  { %2740 = vsyncpa [#allocation4], 1 }
 0x357   :  { %2742 = vsyncpa [#allocation4 + $0x1], 1 }

</bundles_post_ra>
